<compile_context>
chip_gen: v7x
topology: tpu7x:2x2x1
jax: 0.10.0
libtpu: 0.0.40
codegen_flags: <defaults>
</compile_context>

<pallas_src>
import functools
import math

import numpy as np
import jax
import jax.numpy as jnp
from jax import lax
from jax.experimental import pallas as pl
from jax.experimental.pallas import tpu as pltpu  # noqa: F401  (TPU backend)


def _erf(z):
    # Abramowitz & Stegun 7.1.26 polynomial (max abs err ~1.5e-7).
    p = 0.3275911
    a1, a2, a3, a4, a5 = (0.254829592, -0.284496736, 1.421413741,
                          -1.453152027, 1.061405429)
    sgn = jnp.where(z >= 0.0, 1.0, -1.0)
    az = jnp.abs(z)
    t = 1.0 / (1.0 + p * az)
    poly = ((((a5 * t + a4) * t + a3) * t + a2) * t + a1) * t
    return sgn * (1.0 - poly * jnp.exp(-az * az))


# ----------------------------------------------------------------------------
# Fused kernel: QKV proj -> local rel-attention -> add+LN -> FFN(GELU) -> add+LN
# Single invocation (no grid); everything VMEM-resident.
# ----------------------------------------------------------------------------
def _fused_block_kernel(x_ref, wqkv_ref, pe_ref, hmask_ref, bband_ref,
                        smask_ref, g1_ref, b1_ref, w1_ref, bb1_ref,
                        w2_ref, bb2_ref, g2_ref, b2_ref, o_ref,
                        *, B, L, C, H, W, P, eps, shifts):
    f32 = jnp.float32
    J = L + 2 * P                       # padded key coordinate range
    HL = H * L

    x = x_ref[...]                                                  # (B*L, C)

    # Fused QKV projection (q columns already carry the 1/sqrt(C) scale).
    qkv = jnp.dot(x, wqkv_ref[...], preferred_element_type=f32)     # (B*L, 3C)
    q = qkv[:, 0 * C:1 * C]
    k = qkv[:, 1 * C:2 * C]
    v = qkv[:, 2 * C:3 * C]

    hmask = hmask_ref[...]              # (HL, C)  0/1 head block-diagonal mask
    bband = bband_ref[...]              # (HL, J)  0 in-band / -1e30 off-band
    peJ = pe_ref[...]                   # (C, J)   pe in cols [0, W), 0 after

    zpad = jnp.zeros((P, C), f32)
    att_rows = []
    for b in range(B):                  # B == 2, static python loop
        qb = q[b * L:(b + 1) * L, :]                                # (L, C)
        kb = k[b * L:(b + 1) * L, :]
        vb = v[b * L:(b + 1) * L, :]

        # Zero-row padded K/V in absolute padded-key coordinates.   (J, C)
        k_pad = jnp.concatenate([zpad, kb, zpad], axis=0)
        v_pad = jnp.concatenate([zpad, vb, zpad], axis=0)

        # Head-packed (block-diagonal) queries: row h*L+l holds q[l] masked
        # to head h's Dh channels.                                  (HL, C)
        q_bd = jnp.broadcast_to(qb[None], (H, L, C)).reshape(HL, C) * hmask

        # Content scores for all heads in one MXU op.               (HL, J)
        s_frame = lax.dot_general(q_bd, k_pad, (((1,), (1,)), ((), ())),
                                  preferred_element_type=f32)

        # Relative-position scores, window coords in cols [0, W).   (HL, J)
        ps = jnp.dot(q_bd, peJ, preferred_element_type=f32)

        # Skew: shift row h*L+l right by l (binary-decomposed static shifts
        # + precomputed row masks).  TODO(synk): a single strided pltpu.roll
        # would do this in one XLU op.
        for i, s in enumerate(shifts):
            shifted = jnp.concatenate(
                [jnp.zeros((HL, s), f32), ps[:, :J - s]], axis=1)
            ps = jnp.where(smask_ref[i] > 0.5, shifted, ps)

        energy = s_frame + ps + bband
        m = jnp.max(energy, axis=-1, keepdims=True)
        e = jnp.exp(energy - m)
        attn = e * pl.reciprocal(jnp.sum(e, axis=-1, keepdims=True),
                                 approx=True)

        # Value contraction over the full padded frame (zero rows free), then
        # each row-block keeps its own head's channels and blocks are summed.
        out_big = jnp.dot(attn, v_pad, preferred_element_type=f32)   # (HL, C)
        att_b = jnp.sum((out_big * hmask).reshape(H, L, C), axis=0)  # (L, C)
        att_rows.append(att_b)

    att = jnp.concatenate(att_rows, axis=0)                         # (B*L, C)

    def layer_norm(z, g, bias):
        mu = jnp.mean(z, axis=-1, keepdims=True)
        var = jnp.mean((z - mu) ** 2, axis=-1, keepdims=True)
        return (z - mu) * lax.rsqrt(var + eps) * g + bias

    # TODO(synk): dropout (p=0.1) is identity here (eval mode); train-mode
    # stochastic dropout is not reproduced.
    x1 = layer_norm(x + att, g1_ref[...], b1_ref[...])

    # FFN: linear2(gelu(linear1(x1)))  (exact-erf GELU via polynomial)
    h1 = jnp.dot(x1, w1_ref[...], preferred_element_type=f32) + bb1_ref[...]
    h1 = 0.5 * h1 * (1.0 + _erf(h1 * 0.7071067811865476))
    h2 = jnp.dot(h1, w2_ref[...], preferred_element_type=f32) + bb2_ref[...]

    o_ref[...] = layer_norm(x1 + h2, g2_ref[...], b2_ref[...]).astype(o_ref.dtype)


# ----------------------------------------------------------------------------
# One-time parameter / constant preparation (weight repacks + skew/band masks)
# ----------------------------------------------------------------------------
def prepare_inputs(params, *, L, nhead=8, wsize=21, padding=10):
    C = params["wq"].shape[0]
    H, Dh, W, P = nhead, C // nhead, wsize, padding
    J = L + 2 * P
    HL = H * L
    FF = params["w1"].shape[0]
    scale = 1.0 / math.sqrt(C)
    f32 = jnp.float32

    wqkv = jnp.concatenate(
        [params["wq"].T * scale, params["wk"].T, params["wv"].T], axis=1)
    peJ = jnp.concatenate(
        [params["pe"].reshape(C, W), jnp.zeros((C, J - W), f32)], axis=1)

    hmask = np.zeros((HL, C), np.float32)
    for h in range(H):
        hmask[h * L:(h + 1) * L, h * Dh:(h + 1) * Dh] = 1.0

    l_of_row = np.tile(np.arange(L), H)                         # (HL,)
    rel = np.arange(J)[None, :] - l_of_row[:, None]             # (HL, J)
    bband = np.where((rel >= 0) & (rel < W), 0.0, -1e30).astype(np.float32)

    shifts = tuple(1 << i for i in range(max(1, (L - 1).bit_length())))
    smask = np.zeros((len(shifts), HL, J), np.float32)
    for i, bit in enumerate(shifts):
        smask[i, (l_of_row & bit) != 0, :] = 1.0

    return {
        "wqkv": wqkv, "peJ": peJ,
        "hmask": jnp.asarray(hmask), "bband": jnp.asarray(bband),
        "smask": jnp.asarray(smask), "shifts": shifts,
        "g1": params["g1"].reshape(1, C), "b1": params["b1"].reshape(1, C),
        "w1t": params["w1"].T, "bias1": params["bias1"].reshape(1, FF),
        "w2t": params["w2"].T, "bias2": params["bias2"].reshape(1, C),
        "g2": params["g2"].reshape(1, C), "b2": params["b2"].reshape(1, C),
    }


# ----------------------------------------------------------------------------
# Net_a forward (Pallas-backed, single fused kernel, batch folded into rows)
# ----------------------------------------------------------------------------
def net_a_forward(x, prep, *, nhead=8, wsize=21, padding=10, eps=1e-5):
    L, B, C = x.shape
    H, W, P = nhead, wsize, padding
    J = L + 2 * P
    FF = prep["w1t"].shape[1]
    shifts = prep["shifts"]

    xf = jnp.transpose(x, (1, 0, 2)).reshape(B * L, C)           # (B*L, C)

    kernel = functools.partial(
        _fused_block_kernel, B=B, L=L, C=C, H=H, W=W, P=P, eps=eps,
        shifts=shifts)

    args = (xf, prep["wqkv"], prep["peJ"], prep["hmask"], prep["bband"],
            prep["smask"], prep["g1"], prep["b1"], prep["w1t"], prep["bias1"],
            prep["w2t"], prep["bias2"], prep["g2"], prep["b2"])

    flops = int(2 * B * L * C * 3 * C            # fused QKV
                + B * 3 * 2 * H * L * C * J      # scores / pe / values
                + 2 * 2 * B * L * C * FF)        # FFN
    transcendentals = int(B * H * L * J + 2 * B * L * FF)
    bytes_accessed = int(4 * (sum(int(a.size) for a in args) + B * L * C))

    out = pl.pallas_call(
        kernel,
        out_shape=jax.ShapeDtypeStruct((B * L, C), x.dtype),
        cost_estimate=pl.CostEstimate(flops=flops,
                                      transcendentals=transcendentals,
                                      bytes_accessed=bytes_accessed),
    )(*args)

    return out.reshape(B, L, C).transpose(1, 0, 2)               # (L, B, C)


# ----------------------------------------------------------------------------
# Pure-JAX reference (mirrors the PyTorch math) for a correctness check.
# ----------------------------------------------------------------------------
def reference_forward(x, params, nhead=8, wsize=21, padding=10):
    L, B, C = x.shape
    H, Dh = nhead, C // nhead
    q = (x @ params["wq"].T).reshape(L, B, H, Dh)
    k = (x @ params["wk"].T).reshape(L, B, H, Dh)
    v = (x @ params["wv"].T).reshape(L, B, H, Dh)

    def slide(t):  # (L, B, H, Dh) -> (L, B, H, Dh, W)
        tp = jnp.pad(t, [(padding, padding), (0, 0), (0, 0), (0, 0)])
        return jnp.stack([tp[w:w + L] for w in range(wsize)], axis=-1)

    sw_k, sw_v = slide(k), slide(v)
    pe = params["pe"]                                            # (H, Dh, W)
    energy = jnp.einsum("lbhi,lbhiw->lbhw", q, sw_k + pe[None, None])
    attn = jax.nn.softmax(energy / math.sqrt(C), axis=-1)
    att = jnp.einsum("lbhw,lbhiw->lbhi", attn, sw_v).reshape(L, B, C)

    def ln(z, g, b):
        mu = z.mean(-1, keepdims=True)
        var = ((z - mu) ** 2).mean(-1, keepdims=True)
        return (z - mu) / jnp.sqrt(var + 1e-5) * g + b

    x1 = ln(x + att, params["g1"], params["b1"])
    h = jax.nn.gelu(x1 @ params["w1"].T + params["bias1"], approximate=False)
    h = h @ params["w2"].T + params["bias2"]
    return ln(x1 + h, params["g2"], params["b2"])


# ----------------------------------------------------------------------------
# Main
# ----------------------------------------------------------------------------
if __name__ == "__main__":
    L, B, C = 16, 2, 32          # seq, batch, d_model (dim_emb)
    H, Dh, W, P = 8, C // 8, 21, 10
    FF = 64                      # dim_feedforward

    key = jax.random.PRNGKey(0)
    ks = jax.random.split(key, 12)
    f32 = jnp.float32
    params = {
        "wq": 0.1 * jax.random.normal(ks[0], (C, C), f32),
        "wk": 0.1 * jax.random.normal(ks[1], (C, C), f32),
        "wv": 0.1 * jax.random.normal(ks[2], (C, C), f32),
        "pe": 0.1 * jax.random.normal(ks[3], (H, Dh, W), f32),
        "g1": jnp.ones((C,), f32),
        "b1": jnp.zeros((C,), f32),
        "w1": 0.1 * jax.random.normal(ks[4], (FF, C), f32),
        "bias1": 0.01 * jax.random.normal(ks[5], (FF,), f32),
        "w2": 0.1 * jax.random.normal(ks[6], (C, FF), f32),
        "bias2": 0.01 * jax.random.normal(ks[7], (C,), f32),
        "g2": jnp.ones((C,), f32),
        "b2": jnp.zeros((C,), f32),
    }
    x = jax.random.normal(ks[8], (L, B, C), f32)

    prep = prepare_inputs(params, L=L, nhead=H, wsize=W, padding=P)
    out = jax.block_until_ready(net_a_forward(x, prep, nhead=H, wsize=W,
                                              padding=P))
    ref = jax.block_until_ready(reference_forward(x, params, nhead=H,
                                                  wsize=W, padding=P))

    assert out.shape == (L, B, C)
    np.testing.assert_allclose(np.asarray(out), np.asarray(ref),
                               rtol=2e-2, atol=2e-2)
    print("KERNEL_OK")
</pallas_src>

<mosaic_0001>
module attributes {stable_mosaic.version = 11 : i64} {
  func.func @_fused_block_kernel(%arg0: memref<32x32xf32, #tpu.memory_space<vmem>>, %arg1: memref<32x96xf32, #tpu.memory_space<vmem>>, %arg2: memref<32x36xf32, #tpu.memory_space<vmem>>, %arg3: memref<128x32xf32, #tpu.memory_space<vmem>>, %arg4: memref<128x36xf32, #tpu.memory_space<vmem>>, %arg5: memref<4x128x36xf32, #tpu.memory_space<vmem>>, %arg6: memref<1x32xf32, #tpu.memory_space<vmem>>, %arg7: memref<1x32xf32, #tpu.memory_space<vmem>>, %arg8: memref<32x64xf32, #tpu.memory_space<vmem>>, %arg9: memref<1x64xf32, #tpu.memory_space<vmem>>, %arg10: memref<64x32xf32, #tpu.memory_space<vmem>>, %arg11: memref<1x32xf32, #tpu.memory_space<vmem>>, %arg12: memref<1x32xf32, #tpu.memory_space<vmem>>, %arg13: memref<1x32xf32, #tpu.memory_space<vmem>>, %arg14: memref<32x32xf32, #tpu.memory_space<vmem>>) attributes {dimension_semantics = [], scalar_prefetch = 0 : i64, scratch_operands = 0 : i64, tpu.core_type = #tpu.core_type<tc>} {
    %c0 = arith.constant 0 : index
    %c0_0 = arith.constant 0 : index
    %0 = vector.load %arg0[%c0, %c0_0] : memref<32x32xf32, #tpu.memory_space<vmem>>, vector<32x32xf32>
    %c0_1 = arith.constant 0 : index
    %c0_2 = arith.constant 0 : index
    %1 = vector.load %arg1[%c0_1, %c0_2] : memref<32x96xf32, #tpu.memory_space<vmem>>, vector<32x96xf32>
    %cst = arith.constant dense<0.000000e+00> : vector<32x96xf32>
    %2 = tpu.matmul %0, %1, %cst {dimension_numbers = #tpu.dot_dimension_numbers<[1], [0], [0], [1], [0, 0, 1, 1], [], []>} : vector<32x32xf32>, vector<32x96xf32>, vector<32x96xf32> -> vector<32x96xf32>
    %3 = vector.extract_strided_slice %2 {offsets = [0, 0], sizes = [32, 32], strides = [1, 1]} : vector<32x96xf32> to vector<32x32xf32>
    %4 = vector.extract_strided_slice %2 {offsets = [0, 32], sizes = [32, 32], strides = [1, 1]} : vector<32x96xf32> to vector<32x32xf32>
    %5 = vector.extract_strided_slice %2 {offsets = [0, 64], sizes = [32, 32], strides = [1, 1]} : vector<32x96xf32> to vector<32x32xf32>
    %c0_3 = arith.constant 0 : index
    %c0_4 = arith.constant 0 : index
    %6 = vector.load %arg3[%c0_3, %c0_4] : memref<128x32xf32, #tpu.memory_space<vmem>>, vector<128x32xf32>
    %c0_5 = arith.constant 0 : index
    %c0_6 = arith.constant 0 : index
    %7 = vector.load %arg4[%c0_5, %c0_6] : memref<128x36xf32, #tpu.memory_space<vmem>>, vector<128x36xf32>
    %c0_7 = arith.constant 0 : index
    %c0_8 = arith.constant 0 : index
    %8 = vector.load %arg2[%c0_7, %c0_8] : memref<32x36xf32, #tpu.memory_space<vmem>>, vector<32x36xf32>
    %cst_9 = arith.constant 0.000000e+00 : f32
    %9 = vector.broadcast %cst_9 : f32 to vector<10x32xf32>
    %10 = vector.extract_strided_slice %3 {offsets = [0, 0], sizes = [16, 32], strides = [1, 1]} : vector<32x32xf32> to vector<16x32xf32>
    %11 = vector.extract_strided_slice %4 {offsets = [0, 0], sizes = [16, 32], strides = [1, 1]} : vector<32x32xf32> to vector<16x32xf32>
    %12 = vector.extract_strided_slice %5 {offsets = [0, 0], sizes = [16, 32], strides = [1, 1]} : vector<32x32xf32> to vector<16x32xf32>
    %13 = tpu.concatenate %9, %11, %9 in 0 : vector<10x32xf32>, vector<16x32xf32>, vector<10x32xf32> -> vector<36x32xf32>
    %14 = tpu.concatenate %9, %12, %9 in 0 : vector<10x32xf32>, vector<16x32xf32>, vector<10x32xf32> -> vector<36x32xf32>
    %15 = vector.shape_cast %10 : vector<16x32xf32> to vector<1x16x32xf32>
    %16 = vector.shape_cast %15 : vector<1x16x32xf32> to vector<1x16x32xf32>
    %17 = vector.broadcast %16 : vector<1x16x32xf32> to vector<8x16x32xf32>
    %18 = vector.shape_cast %17 : vector<8x16x32xf32> to vector<128x32xf32>
    %19 = arith.mulf %18, %6 : vector<128x32xf32>
    %cst_10 = arith.constant dense<0.000000e+00> : vector<128x36xf32>
    %20 = tpu.matmul %19, %13, %cst_10 {dimension_numbers = #tpu.dot_dimension_numbers<[1], [1], [0], [0], [0, 0, 1, 0], [], []>} : vector<128x32xf32>, vector<36x32xf32>, vector<128x36xf32> -> vector<128x36xf32>
    %cst_11 = arith.constant dense<0.000000e+00> : vector<128x36xf32>
    %21 = tpu.matmul %19, %8, %cst_11 {dimension_numbers = #tpu.dot_dimension_numbers<[1], [0], [0], [1], [0, 0, 1, 1], [], []>} : vector<128x32xf32>, vector<32x36xf32>, vector<128x36xf32> -> vector<128x36xf32>
    %cst_12 = arith.constant 0.000000e+00 : f32
    %22 = vector.broadcast %cst_12 : f32 to vector<128x1xf32>
    %23 = vector.extract_strided_slice %21 {offsets = [0, 0], sizes = [128, 35], strides = [1, 1]} : vector<128x36xf32> to vector<128x35xf32>
    %24 = tpu.concatenate %22, %23 in 1 : vector<128x1xf32>, vector<128x35xf32> -> vector<128x36xf32>
    %c0_13 = arith.constant 0 : index
    %c0_14 = arith.constant 0 : index
    %c0_15 = arith.constant 0 : index
    %25 = vector.load %arg5[%c0_13, %c0_14, %c0_15] : memref<4x128x36xf32, #tpu.memory_space<vmem>>, vector<1x128x36xf32>
    %26 = vector.shape_cast %25 : vector<1x128x36xf32> to vector<128x36xf32>
    %cst_16 = arith.constant 5.000000e-01 : f32
    %27 = vector.broadcast %cst_16 : f32 to vector<128x36xf32>
    %28 = arith.cmpf ogt, %26, %27 : vector<128x36xf32>
    %29 = arith.select %28, %24, %21 : vector<128x36xi1>, vector<128x36xf32>
    %cst_17 = arith.constant 0.000000e+00 : f32
    %30 = vector.broadcast %cst_17 : f32 to vector<128x2xf32>
    %31 = vector.extract_strided_slice %29 {offsets = [0, 0], sizes = [128, 34], strides = [1, 1]} : vector<128x36xf32> to vector<128x34xf32>
    %32 = tpu.concatenate %30, %31 in 1 : vector<128x2xf32>, vector<128x34xf32> -> vector<128x36xf32>
    %c1 = arith.constant 1 : index
    %c0_18 = arith.constant 0 : index
    %c0_19 = arith.constant 0 : index
    %33 = vector.load %arg5[%c1, %c0_18, %c0_19] : memref<4x128x36xf32, #tpu.memory_space<vmem>>, vector<1x128x36xf32>
    %34 = vector.shape_cast %33 : vector<1x128x36xf32> to vector<128x36xf32>
    %cst_20 = arith.constant 5.000000e-01 : f32
    %35 = vector.broadcast %cst_20 : f32 to vector<128x36xf32>
    %36 = arith.cmpf ogt, %34, %35 : vector<128x36xf32>
    %37 = arith.select %36, %32, %29 : vector<128x36xi1>, vector<128x36xf32>
    %cst_21 = arith.constant 0.000000e+00 : f32
    %38 = vector.broadcast %cst_21 : f32 to vector<128x4xf32>
    %39 = vector.extract_strided_slice %37 {offsets = [0, 0], sizes = [128, 32], strides = [1, 1]} : vector<128x36xf32> to vector<128x32xf32>
    %40 = tpu.concatenate %38, %39 in 1 : vector<128x4xf32>, vector<128x32xf32> -> vector<128x36xf32>
    %c2 = arith.constant 2 : index
    %c0_22 = arith.constant 0 : index
    %c0_23 = arith.constant 0 : index
    %41 = vector.load %arg5[%c2, %c0_22, %c0_23] : memref<4x128x36xf32, #tpu.memory_space<vmem>>, vector<1x128x36xf32>
    %42 = vector.shape_cast %41 : vector<1x128x36xf32> to vector<128x36xf32>
    %cst_24 = arith.constant 5.000000e-01 : f32
    %43 = vector.broadcast %cst_24 : f32 to vector<128x36xf32>
    %44 = arith.cmpf ogt, %42, %43 : vector<128x36xf32>
    %45 = arith.select %44, %40, %37 : vector<128x36xi1>, vector<128x36xf32>
    %cst_25 = arith.constant 0.000000e+00 : f32
    %46 = vector.broadcast %cst_25 : f32 to vector<128x8xf32>
    %47 = vector.extract_strided_slice %45 {offsets = [0, 0], sizes = [128, 28], strides = [1, 1]} : vector<128x36xf32> to vector<128x28xf32>
    %48 = tpu.concatenate %46, %47 in 1 : vector<128x8xf32>, vector<128x28xf32> -> vector<128x36xf32>
    %c3 = arith.constant 3 : index
    %c0_26 = arith.constant 0 : index
    %c0_27 = arith.constant 0 : index
    %49 = vector.load %arg5[%c3, %c0_26, %c0_27] : memref<4x128x36xf32, #tpu.memory_space<vmem>>, vector<1x128x36xf32>
    %50 = vector.shape_cast %49 : vector<1x128x36xf32> to vector<128x36xf32>
    %cst_28 = arith.constant 5.000000e-01 : f32
    %51 = vector.broadcast %cst_28 : f32 to vector<128x36xf32>
    %52 = arith.cmpf ogt, %50, %51 : vector<128x36xf32>
    %53 = arith.select %52, %48, %45 : vector<128x36xi1>, vector<128x36xf32>
    %54 = arith.addf %20, %53 : vector<128x36xf32>
    %55 = arith.addf %54, %7 : vector<128x36xf32>
    %cst_29 = arith.constant dense<0xFF800000> : vector<128xf32>
    %56 = vector.multi_reduction <maximumf>, %55, %cst_29 [1] : vector<128x36xf32> to vector<128xf32>
    %57 = vector.shape_cast %56 : vector<128xf32> to vector<128x1xf32>
    %58 = vector.broadcast %57 : vector<128x1xf32> to vector<128x36xf32>
    %59 = arith.subf %55, %58 : vector<128x36xf32>
    %60 = math.exp %59 : vector<128x36xf32>
    %cst_30 = arith.constant dense<0.000000e+00> : vector<128xf32>
    %61 = vector.multi_reduction <add>, %60, %cst_30 [1] : vector<128x36xf32> to vector<128xf32>
    %62 = vector.shape_cast %61 : vector<128xf32> to vector<128x1xf32>
    %63 = tpu.reciprocal %62 {approx = true} : vector<128x1xf32> -> vector<128x1xf32>
    %64 = vector.broadcast %63 : vector<128x1xf32> to vector<128x36xf32>
    %65 = arith.mulf %60, %64 : vector<128x36xf32>
    %cst_31 = arith.constant dense<0.000000e+00> : vector<128x32xf32>
    %66 = tpu.matmul %65, %14, %cst_31 {dimension_numbers = #tpu.dot_dimension_numbers<[1], [0], [0], [1], [0, 0, 1, 1], [], []>} : vector<128x36xf32>, vector<36x32xf32>, vector<128x32xf32> -> vector<128x32xf32>
    %67 = arith.mulf %66, %6 : vector<128x32xf32>
    %68 = vector.shape_cast %67 : vector<128x32xf32> to vector<8x16x32xf32>
    %cst_32 = arith.constant dense<0.000000e+00> : vector<16x32xf32>
    %69 = vector.multi_reduction <add>, %68, %cst_32 [0] : vector<8x16x32xf32> to vector<16x32xf32>
    %70 = vector.extract_strided_slice %3 {offsets = [16, 0], sizes = [16, 32], strides = [1, 1]} : vector<32x32xf32> to vector<16x32xf32>
    %71 = vector.extract_strided_slice %4 {offsets = [16, 0], sizes = [16, 32], strides = [1, 1]} : vector<32x32xf32> to vector<16x32xf32>
    %72 = vector.extract_strided_slice %5 {offsets = [16, 0], sizes = [16, 32], strides = [1, 1]} : vector<32x32xf32> to vector<16x32xf32>
    %73 = tpu.concatenate %9, %71, %9 in 0 : vector<10x32xf32>, vector<16x32xf32>, vector<10x32xf32> -> vector<36x32xf32>
    %74 = tpu.concatenate %9, %72, %9 in 0 : vector<10x32xf32>, vector<16x32xf32>, vector<10x32xf32> -> vector<36x32xf32>
    %75 = vector.shape_cast %70 : vector<16x32xf32> to vector<1x16x32xf32>
    %76 = vector.shape_cast %75 : vector<1x16x32xf32> to vector<1x16x32xf32>
    %77 = vector.broadcast %76 : vector<1x16x32xf32> to vector<8x16x32xf32>
    %78 = vector.shape_cast %77 : vector<8x16x32xf32> to vector<128x32xf32>
    %79 = arith.mulf %78, %6 : vector<128x32xf32>
    %cst_33 = arith.constant dense<0.000000e+00> : vector<128x36xf32>
    %80 = tpu.matmul %79, %73, %cst_33 {dimension_numbers = #tpu.dot_dimension_numbers<[1], [1], [0], [0], [0, 0, 1, 0], [], []>} : vector<128x32xf32>, vector<36x32xf32>, vector<128x36xf32> -> vector<128x36xf32>
    %cst_34 = arith.constant dense<0.000000e+00> : vector<128x36xf32>
    %81 = tpu.matmul %79, %8, %cst_34 {dimension_numbers = #tpu.dot_dimension_numbers<[1], [0], [0], [1], [0, 0, 1, 1], [], []>} : vector<128x32xf32>, vector<32x36xf32>, vector<128x36xf32> -> vector<128x36xf32>
    %cst_35 = arith.constant 0.000000e+00 : f32
    %82 = vector.broadcast %cst_35 : f32 to vector<128x1xf32>
    %83 = vector.extract_strided_slice %81 {offsets = [0, 0], sizes = [128, 35], strides = [1, 1]} : vector<128x36xf32> to vector<128x35xf32>
    %84 = tpu.concatenate %82, %83 in 1 : vector<128x1xf32>, vector<128x35xf32> -> vector<128x36xf32>
    %c0_36 = arith.constant 0 : index
    %c0_37 = arith.constant 0 : index
    %c0_38 = arith.constant 0 : index
    %85 = vector.load %arg5[%c0_36, %c0_37, %c0_38] : memref<4x128x36xf32, #tpu.memory_space<vmem>>, vector<1x128x36xf32>
    %86 = vector.shape_cast %85 : vector<1x128x36xf32> to vector<128x36xf32>
    %cst_39 = arith.constant 5.000000e-01 : f32
    %87 = vector.broadcast %cst_39 : f32 to vector<128x36xf32>
    %88 = arith.cmpf ogt, %86, %87 : vector<128x36xf32>
    %89 = arith.select %88, %84, %81 : vector<128x36xi1>, vector<128x36xf32>
    %cst_40 = arith.constant 0.000000e+00 : f32
    %90 = vector.broadcast %cst_40 : f32 to vector<128x2xf32>
    %91 = vector.extract_strided_slice %89 {offsets = [0, 0], sizes = [128, 34], strides = [1, 1]} : vector<128x36xf32> to vector<128x34xf32>
    %92 = tpu.concatenate %90, %91 in 1 : vector<128x2xf32>, vector<128x34xf32> -> vector<128x36xf32>
    %c1_41 = arith.constant 1 : index
    %c0_42 = arith.constant 0 : index
    %c0_43 = arith.constant 0 : index
    %93 = vector.load %arg5[%c1_41, %c0_42, %c0_43] : memref<4x128x36xf32, #tpu.memory_space<vmem>>, vector<1x128x36xf32>
    %94 = vector.shape_cast %93 : vector<1x128x36xf32> to vector<128x36xf32>
    %cst_44 = arith.constant 5.000000e-01 : f32
    %95 = vector.broadcast %cst_44 : f32 to vector<128x36xf32>
    %96 = arith.cmpf ogt, %94, %95 : vector<128x36xf32>
    %97 = arith.select %96, %92, %89 : vector<128x36xi1>, vector<128x36xf32>
    %cst_45 = arith.constant 0.000000e+00 : f32
    %98 = vector.broadcast %cst_45 : f32 to vector<128x4xf32>
    %99 = vector.extract_strided_slice %97 {offsets = [0, 0], sizes = [128, 32], strides = [1, 1]} : vector<128x36xf32> to vector<128x32xf32>
    %100 = tpu.concatenate %98, %99 in 1 : vector<128x4xf32>, vector<128x32xf32> -> vector<128x36xf32>
    %c2_46 = arith.constant 2 : index
    %c0_47 = arith.constant 0 : index
    %c0_48 = arith.constant 0 : index
    %101 = vector.load %arg5[%c2_46, %c0_47, %c0_48] : memref<4x128x36xf32, #tpu.memory_space<vmem>>, vector<1x128x36xf32>
    %102 = vector.shape_cast %101 : vector<1x128x36xf32> to vector<128x36xf32>
    %cst_49 = arith.constant 5.000000e-01 : f32
    %103 = vector.broadcast %cst_49 : f32 to vector<128x36xf32>
    %104 = arith.cmpf ogt, %102, %103 : vector<128x36xf32>
    %105 = arith.select %104, %100, %97 : vector<128x36xi1>, vector<128x36xf32>
    %cst_50 = arith.constant 0.000000e+00 : f32
    %106 = vector.broadcast %cst_50 : f32 to vector<128x8xf32>
    %107 = vector.extract_strided_slice %105 {offsets = [0, 0], sizes = [128, 28], strides = [1, 1]} : vector<128x36xf32> to vector<128x28xf32>
    %108 = tpu.concatenate %106, %107 in 1 : vector<128x8xf32>, vector<128x28xf32> -> vector<128x36xf32>
    %c3_51 = arith.constant 3 : index
    %c0_52 = arith.constant 0 : index
    %c0_53 = arith.constant 0 : index
    %109 = vector.load %arg5[%c3_51, %c0_52, %c0_53] : memref<4x128x36xf32, #tpu.memory_space<vmem>>, vector<1x128x36xf32>
    %110 = vector.shape_cast %109 : vector<1x128x36xf32> to vector<128x36xf32>
    %cst_54 = arith.constant 5.000000e-01 : f32
    %111 = vector.broadcast %cst_54 : f32 to vector<128x36xf32>
    %112 = arith.cmpf ogt, %110, %111 : vector<128x36xf32>
    %113 = arith.select %112, %108, %105 : vector<128x36xi1>, vector<128x36xf32>
    %114 = arith.addf %80, %113 : vector<128x36xf32>
    %115 = arith.addf %114, %7 : vector<128x36xf32>
    %cst_55 = arith.constant dense<0xFF800000> : vector<128xf32>
    %116 = vector.multi_reduction <maximumf>, %115, %cst_55 [1] : vector<128x36xf32> to vector<128xf32>
    %117 = vector.shape_cast %116 : vector<128xf32> to vector<128x1xf32>
    %118 = vector.broadcast %117 : vector<128x1xf32> to vector<128x36xf32>
    %119 = arith.subf %115, %118 : vector<128x36xf32>
    %120 = math.exp %119 : vector<128x36xf32>
    %cst_56 = arith.constant dense<0.000000e+00> : vector<128xf32>
    %121 = vector.multi_reduction <add>, %120, %cst_56 [1] : vector<128x36xf32> to vector<128xf32>
    %122 = vector.shape_cast %121 : vector<128xf32> to vector<128x1xf32>
    %123 = tpu.reciprocal %122 {approx = true} : vector<128x1xf32> -> vector<128x1xf32>
    %124 = vector.broadcast %123 : vector<128x1xf32> to vector<128x36xf32>
    %125 = arith.mulf %120, %124 : vector<128x36xf32>
    %cst_57 = arith.constant dense<0.000000e+00> : vector<128x32xf32>
    %126 = tpu.matmul %125, %74, %cst_57 {dimension_numbers = #tpu.dot_dimension_numbers<[1], [0], [0], [1], [0, 0, 1, 1], [], []>} : vector<128x36xf32>, vector<36x32xf32>, vector<128x32xf32> -> vector<128x32xf32>
    %127 = arith.mulf %126, %6 : vector<128x32xf32>
    %128 = vector.shape_cast %127 : vector<128x32xf32> to vector<8x16x32xf32>
    %cst_58 = arith.constant dense<0.000000e+00> : vector<16x32xf32>
    %129 = vector.multi_reduction <add>, %128, %cst_58 [0] : vector<8x16x32xf32> to vector<16x32xf32>
    %130 = tpu.concatenate %69, %129 in 0 : vector<16x32xf32>, vector<16x32xf32> -> vector<32x32xf32>
    %131 = arith.addf %0, %130 : vector<32x32xf32>
    %c0_59 = arith.constant 0 : index
    %c0_60 = arith.constant 0 : index
    %132 = vector.load %arg6[%c0_59, %c0_60] : memref<1x32xf32, #tpu.memory_space<vmem>>, vector<1x32xf32>
    %c0_61 = arith.constant 0 : index
    %c0_62 = arith.constant 0 : index
    %133 = vector.load %arg7[%c0_61, %c0_62] : memref<1x32xf32, #tpu.memory_space<vmem>>, vector<1x32xf32>
    %cst_63 = arith.constant dense<0.000000e+00> : vector<32xf32>
    %134 = vector.multi_reduction <add>, %131, %cst_63 [1] : vector<32x32xf32> to vector<32xf32>
    %135 = vector.shape_cast %134 : vector<32xf32> to vector<32x1xf32>
    %cst_64 = arith.constant 3.200000e+01 : f32
    %136 = vector.broadcast %cst_64 : f32 to vector<32x1xf32>
    %137 = arith.divf %135, %136 : vector<32x1xf32>
    %138 = vector.broadcast %137 : vector<32x1xf32> to vector<32x32xf32>
    %139 = arith.subf %131, %138 : vector<32x32xf32>
    %140 = arith.mulf %139, %139 : vector<32x32xf32>
    %cst_65 = arith.constant dense<0.000000e+00> : vector<32xf32>
    %141 = vector.multi_reduction <add>, %140, %cst_65 [1] : vector<32x32xf32> to vector<32xf32>
    %142 = vector.shape_cast %141 : vector<32xf32> to vector<32x1xf32>
    %cst_66 = arith.constant 3.200000e+01 : f32
    %143 = vector.broadcast %cst_66 : f32 to vector<32x1xf32>
    %144 = arith.divf %142, %143 : vector<32x1xf32>
    %145 = vector.broadcast %137 : vector<32x1xf32> to vector<32x32xf32>
    %146 = arith.subf %131, %145 : vector<32x32xf32>
    %cst_67 = arith.constant 9.99999974E-6 : f32
    %147 = vector.broadcast %cst_67 : f32 to vector<32x1xf32>
    %148 = arith.addf %144, %147 : vector<32x1xf32>
    %149 = math.rsqrt %148 : vector<32x1xf32>
    %150 = vector.broadcast %149 : vector<32x1xf32> to vector<32x32xf32>
    %151 = arith.mulf %146, %150 : vector<32x32xf32>
    %152 = vector.broadcast %132 : vector<1x32xf32> to vector<32x32xf32>
    %153 = arith.mulf %151, %152 : vector<32x32xf32>
    %154 = vector.broadcast %133 : vector<1x32xf32> to vector<32x32xf32>
    %155 = arith.addf %153, %154 : vector<32x32xf32>
    %c0_68 = arith.constant 0 : index
    %c0_69 = arith.constant 0 : index
    %156 = vector.load %arg8[%c0_68, %c0_69] : memref<32x64xf32, #tpu.memory_space<vmem>>, vector<32x64xf32>
    %cst_70 = arith.constant dense<0.000000e+00> : vector<32x64xf32>
    %157 = tpu.matmul %155, %156, %cst_70 {dimension_numbers = #tpu.dot_dimension_numbers<[1], [0], [0], [1], [0, 0, 1, 1], [], []>} : vector<32x32xf32>, vector<32x64xf32>, vector<32x64xf32> -> vector<32x64xf32>
    %c0_71 = arith.constant 0 : index
    %c0_72 = arith.constant 0 : index
    %158 = vector.load %arg9[%c0_71, %c0_72] : memref<1x64xf32, #tpu.memory_space<vmem>>, vector<1x64xf32>
    %159 = vector.broadcast %158 : vector<1x64xf32> to vector<32x64xf32>
    %160 = arith.addf %157, %159 : vector<32x64xf32>
    %cst_73 = arith.constant 5.000000e-01 : f32
    %161 = vector.broadcast %cst_73 : f32 to vector<32x64xf32>
    %162 = arith.mulf %161, %160 : vector<32x64xf32>
    %cst_74 = arith.constant 0.707106769 : f32
    %163 = vector.broadcast %cst_74 : f32 to vector<32x64xf32>
    %164 = arith.mulf %160, %163 : vector<32x64xf32>
    %cst_75 = arith.constant 0.000000e+00 : f32
    %165 = vector.broadcast %cst_75 : f32 to vector<32x64xf32>
    %166 = arith.cmpf oge, %164, %165 : vector<32x64xf32>
    %cst_76 = arith.constant 1.000000e+00 : f32
    %cst_77 = arith.constant -1.000000e+00 : f32
    %167 = vector.broadcast %cst_76 : f32 to vector<32x64xf32>
    %168 = vector.broadcast %cst_77 : f32 to vector<32x64xf32>
    %169 = arith.select %166, %167, %168 : vector<32x64xi1>, vector<32x64xf32>
    %170 = math.absf %164 : vector<32x64xf32>
    %cst_78 = arith.constant 0.327591091 : f32
    %171 = vector.broadcast %cst_78 : f32 to vector<32x64xf32>
    %172 = arith.mulf %171, %170 : vector<32x64xf32>
    %cst_79 = arith.constant 1.000000e+00 : f32
    %173 = vector.broadcast %cst_79 : f32 to vector<32x64xf32>
    %174 = arith.addf %173, %172 : vector<32x64xf32>
    %cst_80 = arith.constant 1.000000e+00 : f32
    %175 = vector.broadcast %cst_80 : f32 to vector<32x64xf32>
    %176 = arith.divf %175, %174 : vector<32x64xf32>
    %cst_81 = arith.constant 1.06140542 : f32
    %177 = vector.broadcast %cst_81 : f32 to vector<32x64xf32>
    %178 = arith.mulf %177, %176 : vector<32x64xf32>
    %cst_82 = arith.constant -1.45315206 : f32
    %179 = vector.broadcast %cst_82 : f32 to vector<32x64xf32>
    %180 = arith.addf %178, %179 : vector<32x64xf32>
    %181 = arith.mulf %180, %176 : vector<32x64xf32>
    %cst_83 = arith.constant 1.42141378 : f32
    %182 = vector.broadcast %cst_83 : f32 to vector<32x64xf32>
    %183 = arith.addf %181, %182 : vector<32x64xf32>
    %184 = arith.mulf %183, %176 : vector<32x64xf32>
    %cst_84 = arith.constant -0.284496725 : f32
    %185 = vector.broadcast %cst_84 : f32 to vector<32x64xf32>
    %186 = arith.addf %184, %185 : vector<32x64xf32>
    %187 = arith.mulf %186, %176 : vector<32x64xf32>
    %cst_85 = arith.constant 0.254829586 : f32
    %188 = vector.broadcast %cst_85 : f32 to vector<32x64xf32>
    %189 = arith.addf %187, %188 : vector<32x64xf32>
    %190 = arith.mulf %189, %176 : vector<32x64xf32>
    %cst_86 = arith.constant 0.000000e+00 : f32
    %191 = vector.broadcast %cst_86 : f32 to vector<32x64xf32>
    %192 = arith.subf %191, %170 : vector<32x64xf32>
    %193 = arith.mulf %192, %170 : vector<32x64xf32>
    %194 = math.exp %193 : vector<32x64xf32>
    %195 = arith.mulf %190, %194 : vector<32x64xf32>
    %cst_87 = arith.constant 1.000000e+00 : f32
    %196 = vector.broadcast %cst_87 : f32 to vector<32x64xf32>
    %197 = arith.subf %196, %195 : vector<32x64xf32>
    %198 = arith.mulf %169, %197 : vector<32x64xf32>
    %cst_88 = arith.constant 1.000000e+00 : f32
    %199 = vector.broadcast %cst_88 : f32 to vector<32x64xf32>
    %200 = arith.addf %199, %198 : vector<32x64xf32>
    %201 = arith.mulf %162, %200 : vector<32x64xf32>
    %c0_89 = arith.constant 0 : index
    %c0_90 = arith.constant 0 : index
    %202 = vector.load %arg10[%c0_89, %c0_90] : memref<64x32xf32, #tpu.memory_space<vmem>>, vector<64x32xf32>
    %cst_91 = arith.constant dense<0.000000e+00> : vector<32x32xf32>
    %203 = tpu.matmul %201, %202, %cst_91 {dimension_numbers = #tpu.dot_dimension_numbers<[1], [0], [0], [1], [0, 0, 1, 1], [], []>} : vector<32x64xf32>, vector<64x32xf32>, vector<32x32xf32> -> vector<32x32xf32>
    %c0_92 = arith.constant 0 : index
    %c0_93 = arith.constant 0 : index
    %204 = vector.load %arg11[%c0_92, %c0_93] : memref<1x32xf32, #tpu.memory_space<vmem>>, vector<1x32xf32>
    %205 = vector.broadcast %204 : vector<1x32xf32> to vector<32x32xf32>
    %206 = arith.addf %203, %205 : vector<32x32xf32>
    %207 = arith.addf %155, %206 : vector<32x32xf32>
    %c0_94 = arith.constant 0 : index
    %c0_95 = arith.constant 0 : index
    %208 = vector.load %arg12[%c0_94, %c0_95] : memref<1x32xf32, #tpu.memory_space<vmem>>, vector<1x32xf32>
    %c0_96 = arith.constant 0 : index
    %c0_97 = arith.constant 0 : index
    %209 = vector.load %arg13[%c0_96, %c0_97] : memref<1x32xf32, #tpu.memory_space<vmem>>, vector<1x32xf32>
    %cst_98 = arith.constant dense<0.000000e+00> : vector<32xf32>
    %210 = vector.multi_reduction <add>, %207, %cst_98 [1] : vector<32x32xf32> to vector<32xf32>
    %211 = vector.shape_cast %210 : vector<32xf32> to vector<32x1xf32>
    %cst_99 = arith.constant 3.200000e+01 : f32
    %212 = vector.broadcast %cst_99 : f32 to vector<32x1xf32>
    %213 = arith.divf %211, %212 : vector<32x1xf32>
    %214 = vector.broadcast %213 : vector<32x1xf32> to vector<32x32xf32>
    %215 = arith.subf %207, %214 : vector<32x32xf32>
    %216 = arith.mulf %215, %215 : vector<32x32xf32>
    %cst_100 = arith.constant dense<0.000000e+00> : vector<32xf32>
    %217 = vector.multi_reduction <add>, %216, %cst_100 [1] : vector<32x32xf32> to vector<32xf32>
    %218 = vector.shape_cast %217 : vector<32xf32> to vector<32x1xf32>
    %cst_101 = arith.constant 3.200000e+01 : f32
    %219 = vector.broadcast %cst_101 : f32 to vector<32x1xf32>
    %220 = arith.divf %218, %219 : vector<32x1xf32>
    %221 = vector.broadcast %213 : vector<32x1xf32> to vector<32x32xf32>
    %222 = arith.subf %207, %221 : vector<32x32xf32>
    %cst_102 = arith.constant 9.99999974E-6 : f32
    %223 = vector.broadcast %cst_102 : f32 to vector<32x1xf32>
    %224 = arith.addf %220, %223 : vector<32x1xf32>
    %225 = math.rsqrt %224 : vector<32x1xf32>
    %226 = vector.broadcast %225 : vector<32x1xf32> to vector<32x32xf32>
    %227 = arith.mulf %222, %226 : vector<32x32xf32>
    %228 = vector.broadcast %208 : vector<1x32xf32> to vector<32x32xf32>
    %229 = arith.mulf %227, %228 : vector<32x32xf32>
    %230 = vector.broadcast %209 : vector<1x32xf32> to vector<32x32xf32>
    %231 = arith.addf %229, %230 : vector<32x32xf32>
    %c0_103 = arith.constant 0 : index
    %c0_104 = arith.constant 0 : index
    %232 = vector.load %arg14[%c0_103, %c0_104] : memref<32x32xf32, #tpu.memory_space<vmem>>, vector<32x32xf32>
    tpu.vector_store %arg14[%c0_103, %c0_104], %231 {strides = array<i32>} : memref<32x32xf32, #tpu.memory_space<vmem>>, vector<32x32xf32>,
    return
  }
}

</mosaic_0001>

<bundles_post_ra>
// kernel: tpu_custom_call.1
= control target key start
LH: loop header
LB: loop body
LE: loop exit
PB: predicated region body
PF: predicated region fallthrough
CT: control target
= control target key end

     0   :  { %vm56_vm0 = vcmask 261120   ;;  %s6892_s0 = inlined_call_operand.vmem [shape: f32[32,32], index: 0, kind: input, shape index: {}]   ;;  %s6893_s1 = inlined_call_operand.vmem [shape: f32[32,96], index: 1, kind: input, shape index: {}]   ;;  %s6894_s2 = inlined_call_operand.vmem [shape: f32[32,36], index: 2, kind: input, shape index: {}]   ;;  %s6895_s3 = inlined_call_operand.vmem [shape: f32[128,32], index: 3, kind: input, shape index: {}]   ;;  %s6896_s4 = inlined_call_operand.vmem [shape: f32[128,36], index: 4, kind: input, shape index: {}]   ;;  %s6897_s5 = inlined_call_operand.vmem [shape: f32[4,128,36], index: 5, kind: input, shape index: {}]   ;;  %s6898_s6 = inlined_call_operand.vmem [shape: f32[1,32], index: 6, kind: input, shape index: {}]   ;;  %s6899_s7 = inlined_call_operand.vmem [shape: f32[1,32], index: 7, kind: input, shape index: {}]   ;;  %s6900_s8 = inlined_call_operand.vmem [shape: f32[32,64], index: 8, kind: input, shape index: {}]   ;;  %s6901_s9 = inlined_call_operand.vmem [shape: f32[1,64], index: 9, kind: input, shape index: {}]   ;;  %s6902_s10 = inlined_call_operand.vmem [shape: f32[64,32], index: 10, kind: input, shape index: {}]   ;;  %s6903_s11 = inlined_call_operand.vmem [shape: f32[1,32], index: 11, kind: input, shape index: {}]   ;;  %s6904_s12 = inlined_call_operand.vmem [shape: f32[1,32], index: 12, kind: input, shape index: {}]   ;;  %s6905_s13 = inlined_call_operand.vmem [shape: f32[1,32], index: 13, kind: input, shape index: {}]   ;;  %s6906_s14 = inlined_call_operand.hbm [shape: f32[32,32], index: 14, kind: output, shape index: {}]  }
   0x1   :  { %v52_v0 = vld [vmem:[%s6893_s1] sm:$0xff]  ;;  %v53_v1 = vld [vmem:[%s6893_s1 + $0x8] sm:$0xff]  ;;  %v54_v2 = vld [vmem:[%s6893_s1 + $0x10] sm:$0xff] }
   0x2   :  { %v3809_v3 = vpack.c.bf16 %v53_v1, %v52_v0  ;;  %v55_v4 = vld [vmem:[%s6893_s1 + $0x18] sm:$0xff]  ;;  %v48_v5 = vld [vmem:[%s6892_s0] sm:$0xff]  ;;  %v187_v8 = vld [vmem:[%s6894_s2 + $0x8] sm:$0xff] }
   0x3   :  { %v3813_v6 = vpack.c.bf16 %v55_v4, %v54_v2  ;;  %3575 = vmatprep.mubr.msk.f32.mxu1 %vm56_vm0, %v48_v5  ;;  %v186_v7 = vld [vmem:[%s6894_s2] sm:$0xff] }
   0x4   :  { %3810 = vmatprep.subr.bf16.mxu1 %v3809_v3 }
   0x5   :  { %19 = vsyncpa [#allocation3], 0  ;;  %3812 = vmatpush3.bf16.msra.mxu1 %v3809_v3  ;;  %v4264_v9 = vpack.c.bf16 %v187_v8, %v186_v7  ;;  %v49_v10 = vld [vmem:[%s6892_s0 + $0x8] sm:$0xff]  ;;  %v50_v11 = vld [vmem:[%s6892_s0 + $0x10] sm:$0xff]  ;;  %vm192_vm1 = vcmask 1041408   ;;  %s4156_s1 = smov 96  }
   0x6   :  { %3814 = vmatprep.subr.bf16.mxu1 %v3813_v6  ;;  %v51_v12 = vld [vmem:[%s6892_s0 + $0x18] sm:$0xff]  ;;  %v188_v13 = vld [vmem:[%s6894_s2 + $0x10] sm:$0xff]  ;;  %v4293_v16 = vld [vmem:[%s6895_s3] sm:$0xff]  ;;  %vm4157_vm2 = vmmov 1   ;;  %v7057_v59 = vmov 0  ;;  %v6910_v60 = vmov 0.0  }
   0x7   :  { %v189_v14 = vld [vmem:[%s6894_s2 + $0x18] sm:$0xff]  ;;  %v4298_v18 = vld [vmem:[%s6895_s3 + $0x8] sm:$0xff]  ;;  %v4303_v20 = vld [vmem:[%s6895_s3 + $0x10] sm:$0xff]  ;;  %v7060_v2 = vmov 0  ;;  %s4159_s18 = smov 1   ;;  %vm490_vm5 = vcmask 7168  }
   0x8   :  { %v4286_v15 = vpack.c.bf16 %v189_v14, %v188_v13  ;;  %v4326_v27 = vld [vmem:[%s6895_s3 + $0x18] sm:$0xff]  ;;  %v4337_v29 = vld [vmem:[%s6895_s3 + $0x20] sm:$0xff]  ;;  %v4348_v33 = vld [vmem:[%s6895_s3 + $0x28] sm:$0xff]  ;;  %s4160_s2 = smov 2   ;;  %s4161_s27 = smov 4  }
   0x9   :  { %3816 = vmatpush3.bf16.msra.mxu1 %v3813_v6  ;;  %v4355_v34 = vld [vmem:[%s6895_s3 + $0x30] sm:$0xff]  ;;  %v4363_v37 = vld [vmem:[%s6895_s3 + $0x38] sm:$0xff]  ;;  %v4369_v38 = vld [vmem:[%s6895_s3 + $0x40] sm:$0xff]  ;;  %s4162_s16 = smov 8   ;;  %s4163_s30 = smov 64  }
   0xa   :  { %3818 = vmatprep.subr.bf16.mxu1 %v4264_v9  ;;  %v4377_v41 = vld [vmem:[%s6895_s3 + $0x48] sm:$0xff]  ;;  %v4383_v42 = vld [vmem:[%s6895_s3 + $0x50] sm:$0xff]  ;;  %v4391_v45 = vld [vmem:[%s6895_s3 + $0x58] sm:$0xff] }
   0xb   :  { %v4397_v46 = vld [vmem:[%s6895_s3 + $0x60] sm:$0xff]  ;;  %v4405_v49 = vld [vmem:[%s6895_s3 + $0x68] sm:$0xff]  ;;  %v4411_v50 = vld [vmem:[%s6895_s3 + $0x70] sm:$0xff] }
   0xc   :  { %3576 = vmatmul.mubr.msk.f32.vlgmr.msra.gmra.mrb[0].mxu1 %vm56_vm0, %v49_v10  ;;  %v4419_v53 = vld [vmem:[%s6895_s3 + $0x78] sm:$0xff]  ;;  %vm4432_vm3 = vmpackc.low %vm56_vm0, %vm4157_vm2 }
   0xd   :  { %3578 = vmatprep.mubr.msk.f32.mxu1 %vm56_vm0, %v50_v11  ;;  %3820 = vmatpush3.bf16.msra.mxu1 %v4264_v9  ;;  %v7058_v59 = vsel %vm4432_vm3, 4294967295, %v7057_v59  ;;  %vm4444_vm4 = vmpackc.low %vm56_vm0, %vm56_vm0 }
   0xe   :  { %3822 = vmatprep.subr.bf16.mxu1 %v4286_v15  ;;  %7059 = vst [vmem:[#allocation5_spill] sm:$0xff] %v7058_v59  ;;  %v7061_v2 = vsel %vm4444_vm4, 4294967295, %v7060_v2 }
   0xf   :  { %7062 = vst [vmem:[#allocation6_spill] sm:$0xff] %v7061_v2  ;;  %v4930_v2 = vld [vmem:[%s6897_s5 + $0x98] sm:$0xff] }
  0x10   :  { %3579 = vmatmul.mubr.msk.f32.gmra.mrb[2].mxu1 %vm56_vm0, %v51_v12  ;;  %7099 = vst [vmem:[#allocation43_spill] sm:$0xff] %v4930_v2 }
  0x11   :  { %3824 = vmatpush3.bf16.msra.mxu1 %v4286_v15 }
  0xdf   :  { %v3577_v17 = vpop.f32.mrb[0].mxu1 }
  0xe0   :  { %v135_v19 = vpop.f32.mrb[1].mxu1  ;;  %v4305_v21 = vrot.slane %v3577_v17, 6  ;;  %v4311_v24 = vmul.f32 %v3577_v17, %v4298_v18  ;;  %v220_v31 = vmul.f32 %v3577_v17, %v4326_v27  ;;  %v222_v35 = vmul.f32 %v3577_v17, %v4348_v33 }
  0xe1   :  { %v217_v22 = vmul.f32 %v4293_v16, %v135_v19  ;;  %v4308_v23 = vrot.slane %v135_v19, 6  ;;  %v4316_v25 = vmul.f32 %v4303_v20, %v135_v19  ;;  %v221_v32 = vmul.f32 %v4337_v29, %v135_v19 }
  0xe2   :  { %v223_v36 = vmul.f32 %v4355_v34, %v135_v19  ;;  %v224_v39 = vmul.f32 %v3577_v17, %v4363_v37  ;;  %v225_v40 = vmul.f32 %v4369_v38, %v135_v19  ;;  %v226_v43 = vmul.f32 %v3577_v17, %v4377_v41 }
  0xe3   :  { %3589 = vmatprep.mubr.msk.f32.mxu1 %vm56_vm0, %v217_v22  ;;  %3621 = vmatprep.mubr.msk.f32.mxu0 %vm56_vm0, %v217_v22  ;;  %v4321_v26 = vsel %vm192_vm1, %v4308_v23, %v4305_v21  ;;  %v227_v44 = vmul.f32 %v4383_v42, %v135_v19  ;;  %v228_v47 = vmul.f32 %v3577_v17, %v4391_v45  ;;  %v4425_v55 = vpop.f32.mrb[2].mxu1 }
  0xe4   :  { %196 = vrot.lane.b32.xlu0 %v4308_v23, %s4156_s1  ;;  %3590 = vmatmul.mubr.msk.f32.vlgmr.msra.gmra.mrb[4].mxu1 %vm56_vm0, %v4311_v24  ;;  %v3916_v28 = vpack.i.bf16 %v4321_v26, %v4305_v21  ;;  %v229_v48 = vmul.f32 %v4397_v46, %v135_v19  ;;  %v230_v51 = vmul.f32 %v3577_v17, %v4405_v49  ;;  %v4427_v56 = vpop.f32.mrb[3].mxu1 }
  0xe5   :  { %3592 = vmatprep.mubr.msk.f32.mxu1 %vm56_vm0, %v4316_v25  ;;  %v231_v52 = vmul.f32 %v4411_v50, %v135_v19  ;;  %v232_v54 = vmul.f32 %v3577_v17, %v4419_v53  ;;  %v4474_v4 = vmul.f32 %v4293_v16, %v4427_v56  ;;  %v4479_v5 = vmul.f32 %v4425_v55, %v4298_v18 }
  0xe6   :  { %v4485_v6 = vmul.f32 %v4303_v20, %v4427_v56  ;;  %v4491_v7 = vmul.f32 %v4425_v55, %v4326_v27  ;;  %v4497_v8 = vmul.f32 %v4337_v29, %v4427_v56  ;;  %v4509_v10 = vmul.f32 %v4355_v34, %v4427_v56 }
  0xe7   :  { %7063 = vst [vmem:[#allocation7_spill] sm:$0xff] %v4474_v4  ;;  %7064 = vst [vmem:[#allocation8_spill] sm:$0xff] %v4479_v5  ;;  %v4515_v11 = vmul.f32 %v4425_v55, %v4363_v37  ;;  %v4521_v12 = vmul.f32 %v4369_v38, %v4427_v56  ;;  %v4527_v13 = vmul.f32 %v4425_v55, %v4377_v41 }
  0xe8   :  { %3917 = vrot.lane.b32.xlu0 %v3916_v28, %s4156_s1  ;;  %3593 = vmatmul.mubr.msk.f32.gmra.mrb[6].mxu1 %vm56_vm0, %v220_v31  ;;  %7065 = vst [vmem:[#allocation9_spill] sm:$0xff] %v4485_v6  ;;  %7066 = vst [vmem:[#allocation10_spill] sm:$0xff] %v4491_v7  ;;  %v4533_v14 = vmul.f32 %v4383_v42, %v4427_v56  ;;  %v4545_v16 = vmul.f32 %v4397_v46, %v4427_v56  ;;  %v4627_v42 = vld [vmem:[%s6897_s5 + $0x8] sm:$0xff] }
  0xe9   :  { %3595 = vmatprep.mubr.msk.f32.mxu1 %vm56_vm0, %v221_v32  ;;  %7067 = vst [vmem:[#allocation11_spill] sm:$0xff] %v4497_v8  ;;  %7069 = vst [vmem:[#allocation13_spill] sm:$0xff] %v4509_v10  ;;  %v4551_v17 = vmul.f32 %v4425_v55, %v4405_v49  ;;  %v4557_v18 = vmul.f32 %v4411_v50, %v4427_v56  ;;  %v4563_v19 = vmul.f32 %v4425_v55, %v4419_v53  ;;  %v4651_v49 = vld [vmem:[%s6897_s5 + $0x20] sm:$0xff] }
  0xea   :  { %7070 = vst [vmem:[#allocation14_spill] sm:$0xff] %v4515_v11  ;;  %7071 = vst [vmem:[#allocation15_spill] sm:$0xff] %v4521_v12  ;;  %vm524_vm7 = vcmp.gt.f32.partialorder %v4627_v42, 0.5  ;;  %vm7025_vm10 = vcmp.gt.f32.partialorder %v4651_v49, 0.5 }
  0xeb   :  { %7072 = vst [vmem:[#allocation16_spill] sm:$0xff] %v4527_v13  ;;  %7073 = vst [vmem:[#allocation17_spill] sm:$0xff] %v4533_v14 }
  0xec   :  { %3596 = vmatmul.mubr.msk.f32.gmra.mrb[8].mxu1 %vm56_vm0, %v222_v35  ;;  %7075 = vst [vmem:[#allocation19_spill] sm:$0xff] %v4545_v16  ;;  %7076 = vst [vmem:[#allocation20_spill] sm:$0xff] %v4551_v17 }
  0xed   :  { %3598 = vmatprep.mubr.msk.f32.mxu1 %vm56_vm0, %v223_v36  ;;  %7077 = vst [vmem:[#allocation21_spill] sm:$0xff] %v4557_v18  ;;  %7078 = vst [vmem:[#allocation22_spill] sm:$0xff] %v4563_v19 }
  0xee   :  { %7080 = vst [vmem:[#allocation24_spill] sm:$0xff] %v4627_v42  ;;  %7083 = vst [vmem:[#allocation27_spill] sm:$0xff] %v4651_v49  ;;  %v4915_v49 = vld [vmem:[%s6897_s5 + $0x90] sm:$0xff] }
  0xef   :  { %7098 = vst [vmem:[#allocation42_spill] sm:$0xff] %v4915_v49 }
  0xf0   :  { %3599 = vmatmul.mubr.msk.f32.gmra.mrb[10].mxu1 %vm56_vm0, %v224_v39 }
  0xf1   :  { %3601 = vmatprep.mubr.msk.f32.mxu1 %vm56_vm0, %v225_v40 }
  0xf4   :  { %3602 = vmatmul.mubr.msk.f32.gmra.mrb[12].mxu1 %vm56_vm0, %v226_v43 }
  0xf5   :  { %3604 = vmatprep.mubr.msk.f32.mxu1 %vm56_vm0, %v227_v44 }
  0xf8   :  { %3605 = vmatmul.mubr.msk.f32.gmra.mrb[14].mxu1 %vm56_vm0, %v228_v47 }
  0xf9   :  { %3607 = vmatprep.mubr.msk.f32.mxu1 %vm56_vm0, %v229_v48 }
  0xfc   :  { %3608 = vmatmul.mubr.msk.f32.gmra.mrb[16].mxu1 %vm56_vm0, %v230_v51 }
  0xfd   :  { %3610 = vmatprep.mubr.msk.f32.mxu1 %vm56_vm0, %v231_v52 }
 0x100   :  { %3611 = vmatmul.mubr.msk.f32.gmra.mrb[18].mxu1 %vm56_vm0, %v232_v54 }
 0x156   :  { %v197_v57 = vpop.permute.xlu0 %196 }
 0x157   :  { %v204_v58 = vsel %vm192_vm1, 0.0, %v197_v57 }
 0x158   :  { %v3825_v61 = vpack.c.bf16 %v204_v58, %v6910_v60  ;;  %v4672_v58 = vld [vmem:[%s6897_s5 + $0x28] sm:$0xff] }
 0x159   :  { %7084 = vst [vmem:[#allocation28_spill] sm:$0xff] %v4672_v58  ;;  %vm6955_vm11 = vcmp.gt.f32.partialorder %v4672_v58, 0.5  ;;  %v4910_v58 = vld [vmem:[%s6897_s5 + $0x88] sm:$0xff] }
 0x15a   :  { %3827 = vmatprep.subr.msk.bf16.mxu0 %vm4432_vm3, %v3825_v61  ;;  %v3918_v62 = vpop.permute.xlu0 %3917  ;;  %7097 = vst [vmem:[#allocation41_spill] sm:$0xff] %v4910_v58 }
 0x15b   :  { %v3920_v63 = vunpack.i.h.bf16 %v3918_v62  ;;  %v3919_v0 = vunpack.i.l.bf16 %v3918_v62  ;;  %3830 = vmatpush3.bf16.xpose.msk.msra.mxu0 %vm4432_vm3, %v3825_v61  ;;  %v4677_v61 = vld [vmem:[%s6897_s5 + $0x30] sm:$0xff] }
 0x15c   :  { %7085 = vst [vmem:[#allocation29_spill] sm:$0xff] %v4677_v61  ;;  %vm6907_vm12 = vcmp.gt.f32.partialorder %v4677_v61, 0.5 }
 0x15d   :  { %v205_v1 = vsel %vm192_vm1, %v3919_v0, 0.0 }
 0x15e   :  { %v3831_v3 = vpack.c.bf16 %v205_v1, %v3920_v63 }
 0x160   :  { %3833 = vmatprep.subr.msk.bf16.mxu0 %vm4444_vm4, %v3831_v3 }
 0x163   :  { %3836 = vmatpush3.bf16.xpose.msk.msra.mxu0 %vm4444_vm4, %v3831_v3 }
 0x164   :  { %3850 = vmatprep.subr.bf16.mxu0 %v4264_v9 }
 0x16a   :  { %3622 = vmatmul.mubr.msk.f32.vlgmr.msra.gmra.mrb[0].mxu0 %vm56_vm0, %v4311_v24 }
 0x16b   :  { %3624 = vmatprep.mubr.msk.f32.mxu0 %vm56_vm0, %v4316_v25  ;;  %3852 = vmatpush3.bf16.msra.mxu0 %v4264_v9  ;;  %v4503_v9 = vmul.f32 %v4425_v55, %v4348_v33 }
 0x16c   :  { %3854 = vmatprep.subr.bf16.mxu0 %v4286_v15 }
 0x16d   :  { %7068 = vst [vmem:[#allocation12_spill] sm:$0xff] %v4503_v9 }
 0x16e   :  { %3625 = vmatmul.mubr.msk.f32.gmra.mrb[2].mxu0 %vm56_vm0, %v220_v31 }
 0x16f   :  { %3627 = vmatprep.mubr.msk.f32.mxu0 %vm56_vm0, %v221_v32  ;;  %3856 = vmatpush3.bf16.msra.mxu0 %v4286_v15  ;;  %v4539_v15 = vmul.f32 %v4425_v55, %v4391_v45 }
 0x171   :  { %7074 = vst [vmem:[#allocation18_spill] sm:$0xff] %v4539_v15 }
 0x172   :  { %3628 = vmatmul.mubr.msk.f32.gmra.mrb[4].mxu0 %vm56_vm0, %v222_v35 }
 0x173   :  { %3630 = vmatprep.mubr.msk.f32.mxu0 %vm56_vm0, %v223_v36 }
 0x176   :  { %3631 = vmatmul.mubr.msk.f32.gmra.mrb[6].mxu0 %vm56_vm0, %v224_v39 }
 0x177   :  { %3633 = vmatprep.mubr.msk.f32.mxu0 %vm56_vm0, %v225_v40  ;;  %v4621_v40 = vld [vmem:[%s6897_s5] sm:$0xff] }
 0x178   :  { %7079 = vst [vmem:[#allocation23_spill] sm:$0xff] %v4621_v40  ;;  %vm523_vm6 = vcmp.gt.f32.partialorder %v4621_v40, 0.5 }
 0x17a   :  { %3634 = vmatmul.mubr.msk.f32.gmra.mrb[8].mxu0 %vm56_vm0, %v226_v43  ;;  %v4632_v43 = vld [vmem:[%s6897_s5 + $0x10] sm:$0xff] }
 0x17b   :  { %3636 = vmatprep.mubr.msk.f32.mxu0 %vm56_vm0, %v227_v44  ;;  %7081 = vst [vmem:[#allocation25_spill] sm:$0xff] %v4632_v43  ;;  %vm525_vm8 = vcmp.gt.f32.partialorder %v4632_v43, 0.5 }
 0x17e   :  { %3637 = vmatmul.mubr.msk.f32.gmra.mrb[10].mxu0 %vm56_vm0, %v228_v47 }
 0x17f   :  { %3639 = vmatprep.mubr.msk.f32.mxu0 %vm56_vm0, %v229_v48  ;;  %v4646_v48 = vld [vmem:[%s6897_s5 + $0x18] sm:$0xff] }
 0x180   :  { %7082 = vst [vmem:[#allocation26_spill] sm:$0xff] %v4646_v48  ;;  %vm526_vm9 = vcmp.gt.f32.partialorder %v4646_v48, 0.5 }
 0x182   :  { %3640 = vmatmul.mubr.msk.f32.gmra.mrb[12].mxu0 %vm56_vm0, %v230_v51 }
 0x183   :  { %3642 = vmatprep.mubr.msk.f32.mxu0 %vm56_vm0, %v231_v52 }
 0x186   :  { %3643 = vmatmul.mubr.msk.f32.gmra.mrb[14].mxu0 %vm56_vm0, %v232_v54 }
 0x187   :  { %3685 = vmatprep.mubr.msk.f32.mxu0 %vm56_vm0, %v4474_v4 }
 0x18a   :  { %3686 = vmatmul.mubr.msk.f32.vlgmr.msra.gmra.mrb[16].mxu0 %vm56_vm0, %v4479_v5  ;;  %v4904_v5 = vld [vmem:[%s6897_s5 + $0x80] sm:$0xff] }
 0x18b   :  { %3688 = vmatprep.mubr.msk.f32.mxu0 %vm56_vm0, %v4485_v6  ;;  %7096 = vst [vmem:[#allocation40_spill] sm:$0xff] %v4904_v5 }
 0x18e   :  { %3689 = vmatmul.mubr.msk.f32.gmra.mrb[18].mxu0 %vm56_vm0, %v4491_v7 }
 0x18f   :  { %3691 = vmatprep.mubr.msk.f32.mxu0 %vm56_vm0, %v4497_v8 }
 0x192   :  { %3692 = vmatmul.mubr.msk.f32.gmra.mrb[20].mxu0 %vm56_vm0, %v4503_v9 }
 0x193   :  { %3694 = vmatprep.mubr.msk.f32.mxu0 %vm56_vm0, %v4509_v10 }
 0x196   :  { %3695 = vmatmul.mubr.msk.f32.gmra.mrb[22].mxu0 %vm56_vm0, %v4515_v11 }
 0x197   :  { %3697 = vmatprep.mubr.msk.f32.mxu0 %vm56_vm0, %v4521_v12 }
 0x19a   :  { %3698 = vmatmul.mubr.msk.f32.gmra.mrb[24].mxu0 %vm56_vm0, %v4527_v13 }
 0x19b   :  { %3700 = vmatprep.mubr.msk.f32.mxu0 %vm56_vm0, %v4533_v14 }
 0x19e   :  { %3701 = vmatmul.mubr.msk.f32.gmra.mrb[26].mxu0 %vm56_vm0, %v4539_v15 }
 0x19f   :  { %3703 = vmatprep.mubr.msk.f32.mxu0 %vm56_vm0, %v4545_v16 }
 0x1a2   :  { %3704 = vmatmul.mubr.msk.f32.gmra.mrb[28].mxu0 %vm56_vm0, %v4551_v17 }
 0x1a3   :  { %3706 = vmatprep.mubr.msk.f32.mxu0 %vm56_vm0, %v4557_v18 }
 0x1a6   :  { %3707 = vmatmul.mubr.msk.f32.gmra.mrb[30].mxu0 %vm56_vm0, %v4563_v19 }
 0x1b7   :  { %v3591_v20 = vpop.f32.mrb[4].mxu1 }
 0x1b8   :  { %v347_v22 = vpop.f32.mrb[5].mxu1 }
 0x1b9   :  { %442 = vrot.lane.b32.xlu1 %v347_v22, %s4159_s18 }
 0x1bb   :  { %v3594_v24 = vpop.f32.mrb[6].mxu1 }
 0x1bc   :  { %v357_v25 = vpop.f32.mrb[7].mxu1 }
 0x1bd   :  { %444 = vrot.lane.b32.xlu1 %v3591_v20, %s4159_s18  ;;  %446 = vrot.lane.b32.xlu0 %v357_v25, %s4159_s18 }
 0x1bf   :  { %v4572_v27 = vpop.f32.mrb[8].mxu1 }
 0x1c0   :  { %v367_v28 = vpop.f32.mrb[9].mxu1 }
 0x1c1   :  { %448 = vrot.lane.b32.xlu1 %v3594_v24, %s4159_s18  ;;  %450 = vrot.lane.b32.xlu0 %v367_v28, %s4159_s18 }
 0x1c3   :  { %v4576_v29 = vpop.f32.mrb[10].mxu1 }
 0x1c4   :  { %v4578_v31 = vpop.f32.mrb[11].mxu1 }
 0x1c5   :  { %452 = vrot.lane.b32.xlu1 %v4572_v27, %s4159_s18  ;;  %454 = vrot.lane.b32.xlu0 %v4578_v31, %s4159_s18 }
 0x1c7   :  { %v4584_v32 = vpop.f32.mrb[12].mxu1 }
 0x1c8   :  { %v4586_v33 = vpop.f32.mrb[13].mxu1 }
 0x1c9   :  { %456 = vrot.lane.b32.xlu1 %v4576_v29, %s4159_s18  ;;  %458 = vrot.lane.b32.xlu0 %v4586_v33, %s4159_s18 }
 0x1cb   :  { %v4592_v34 = vpop.f32.mrb[14].mxu1 }
 0x1cc   :  { %v4594_v35 = vpop.f32.mrb[15].mxu1 }
 0x1cd   :  { %460 = vrot.lane.b32.xlu1 %v4584_v32, %s4159_s18  ;;  %462 = vrot.lane.b32.xlu0 %v4594_v35, %s4159_s18 }
 0x1cf   :  { %v4600_v36 = vpop.f32.mrb[16].mxu1 }
 0x1d0   :  { %v4602_v37 = vpop.f32.mrb[17].mxu1 }
 0x1d1   :  { %464 = vrot.lane.b32.xlu1 %v4592_v34, %s4159_s18  ;;  %466 = vrot.lane.b32.xlu0 %v4602_v37, %s4159_s18 }
 0x1d3   :  { %v4608_v38 = vpop.f32.mrb[18].mxu1 }
 0x1d4   :  { %v4610_v39 = vpop.f32.mrb[19].mxu1 }
 0x1d5   :  { %468 = vrot.lane.b32.xlu1 %v4600_v36, %s4159_s18  ;;  %470 = vrot.lane.b32.xlu0 %v4610_v39, %s4159_s18 }
 0x1d9   :  { %472 = vrot.lane.b32.xlu1 %v4608_v38, %s4159_s18 }
 0x22b   :  { %v443_v41 = vpop.permute.xlu1 %442 }
 0x22c   :  { %v491_v44 = vsel %vm490_vm5, 0.0, %v443_v41 }
 0x22d   :  { %v4637_v45 = vsel %vm523_vm6, %v491_v44, %v347_v22  ;;  %v4698_v22 = vld [vmem:[%s6897_s5 + $0x38] sm:$0xff] }
 0x22e   :  { %571 = vrot.lane.b32.xlu0 %v4637_v45, %s4160_s2  ;;  %7086 = vst [vmem:[#allocation30_spill] sm:$0xff] %v4698_v22  ;;  %vm6909_vm13 = vcmp.gt.f32.partialorder %v4698_v22, 0.5 }
 0x22f   :  { %v445_v46 = vpop.permute.xlu1 %444  ;;  %v447_v47 = vpop.permute.xlu0 %446 }
 0x230   :  { %v492_v50 = vsel %vm490_vm5, 0.0, %v445_v46  ;;  %v493_v51 = vsel %vm490_vm5, 0.0, %v447_v47 }
 0x231   :  { %v4657_v52 = vsel %vm524_vm7, %v492_v50, %v3591_v20  ;;  %v4661_v53 = vsel %vm525_vm8, %v493_v51, %v357_v25 }
 0x232   :  { %573 = vrot.lane.b32.xlu1 %v4657_v52, %s4160_s2  ;;  %575 = vrot.lane.b32.xlu0 %v4661_v53, %s4160_s2 }
 0x233   :  { %v449_v54 = vpop.permute.xlu1 %448  ;;  %v451_v57 = vpop.permute.xlu0 %450 }
 0x234   :  { %v494_v62 = vsel %vm490_vm5, 0.0, %v449_v54  ;;  %v495_v63 = vsel %vm490_vm5, 0.0, %v451_v57 }
 0x235   :  { %v4683_v0 = vsel %vm526_vm9, %v494_v62, %v3594_v24  ;;  %v4687_v1 = vsel %vm7025_vm10, %v495_v63, %v367_v28  ;;  %v4703_v24 = vld [vmem:[%s6897_s5 + $0x40] sm:$0xff] }
 0x236   :  { %577 = vrot.lane.b32.xlu1 %v4683_v0, %s4160_s2  ;;  %579 = vrot.lane.b32.xlu0 %v4687_v1, %s4160_s2  ;;  %7087 = vst [vmem:[#allocation31_spill] sm:$0xff] %v4703_v24  ;;  %vm6908_vm14 = vcmp.gt.f32.partialorder %v4703_v24, 0.5 }
 0x237   :  { %v453_v3 = vpop.permute.xlu1 %452  ;;  %v455_v20 = vpop.permute.xlu0 %454 }
 0x238   :  { %v496_v25 = vsel %vm490_vm5, 0.0, %v453_v3  ;;  %v497_v28 = vsel %vm490_vm5, 0.0, %v455_v20  ;;  %v4758_v20 = vld [vmem:[%s6897_s5 + $0x58] sm:$0xff] }
 0x239   :  { %v4710_v41 = vsel %vm6955_vm11, %v496_v25, %v4572_v27  ;;  %v4715_v44 = vsel %vm6907_vm12, %v497_v28, %v4578_v31  ;;  %v4726_v27 = vld [vmem:[%s6897_s5 + $0x48] sm:$0xff]  ;;  %v4731_v31 = vld [vmem:[%s6897_s5 + $0x50] sm:$0xff]  ;;  %7090 = vst [vmem:[#allocation34_spill] sm:$0xff] %v4758_v20 }
 0x23a   :  { %581 = vrot.lane.b32.xlu1 %v4710_v41, %s4160_s2  ;;  %583 = vrot.lane.b32.xlu0 %v4715_v44, %s4160_s2  ;;  %7088 = vst [vmem:[#allocation32_spill] sm:$0xff] %v4726_v27  ;;  %7089 = vst [vmem:[#allocation33_spill] sm:$0xff] %v4731_v31  ;;  %vm6915_vm15 = vcmp.gt.f32.partialorder %v4726_v27, 0.5  ;;  %vm6914_vm12 = vcmp.gt.f32.partialorder %v4731_v31, 0.5 }
 0x23b   :  { %v457_v46 = vpop.permute.xlu1 %456  ;;  %v459_v47 = vpop.permute.xlu0 %458 }
 0x23c   :  { %v498_v50 = vsel %vm490_vm5, 0.0, %v457_v46  ;;  %v499_v51 = vsel %vm490_vm5, 0.0, %v459_v47 }
 0x23d   :  { %v4735_v54 = vpop.f32.mrb[0].mxu0  ;;  %v4740_v57 = vsel %vm6909_vm13, %v498_v50, %v4576_v29  ;;  %v4745_v62 = vsel %vm6908_vm14, %v499_v51, %v4586_v33  ;;  %v4763_v33 = vld [vmem:[%s6897_s5 + $0x60] sm:$0xff]  ;;  %vm6947_vm14 = vcmp.gt.f32.partialorder %v4758_v20, 0.5 }
 0x23e   :  { %v4747_v63 = vpop.f32.mrb[1].mxu0  ;;  %585 = vrot.lane.b32.xlu1 %v4740_v57, %s4160_s2  ;;  %587 = vrot.lane.b32.xlu0 %v4745_v62, %s4160_s2  ;;  %7091 = vst [vmem:[#allocation35_spill] sm:$0xff] %v4763_v33  ;;  %vm6919_vm13 = vcmp.gt.f32.partialorder %v4763_v33, 0.5 }
 0x23f   :  { %v461_v3 = vpop.permute.xlu1 %460  ;;  %v463_v29 = vpop.permute.xlu0 %462 }
 0x240   :  { %v500_v25 = vsel %vm490_vm5, 0.0, %v461_v3  ;;  %v501_v28 = vsel %vm490_vm5, 0.0, %v463_v29  ;;  %v4790_v29 = vld [vmem:[%s6897_s5 + $0x68] sm:$0xff] }
 0x241   :  { %v4767_v46 = vpop.f32.mrb[2].mxu0  ;;  %v4772_v47 = vsel %vm6915_vm15, %v500_v25, %v4584_v32  ;;  %v4777_v50 = vsel %vm6914_vm12, %v501_v28, %v4594_v35  ;;  %7092 = vst [vmem:[#allocation36_spill] sm:$0xff] %v4790_v29  ;;  %v4795_v35 = vld [vmem:[%s6897_s5 + $0x70] sm:$0xff]  ;;  %vm6946_vm12 = vcmp.gt.f32.partialorder %v4790_v29, 0.5 }
 0x242   :  { %v4779_v51 = vpop.f32.mrb[3].mxu0  ;;  %589 = vrot.lane.b32.xlu1 %v4772_v47, %s4160_s2  ;;  %591 = vrot.lane.b32.xlu0 %v4777_v50, %s4160_s2  ;;  %7093 = vst [vmem:[#allocation37_spill] sm:$0xff] %v4795_v35  ;;  %vm6940_vm15 = vcmp.gt.f32.partialorder %v4795_v35, 0.5 }
 0x243   :  { %v465_v3 = vpop.permute.xlu1 %464  ;;  %v467_v32 = vpop.permute.xlu0 %466 }
 0x244   :  { %v502_v25 = vsel %vm490_vm5, 0.0, %v465_v3  ;;  %v503_v28 = vsel %vm490_vm5, 0.0, %v467_v32  ;;  %v4822_v32 = vld [vmem:[%s6897_s5 + $0x78] sm:$0xff] }
 0x245   :  { %v4799_v60 = vpop.f32.mrb[4].mxu0  ;;  %v4804_v30 = vsel %vm6947_vm14, %v502_v25, %v4592_v34  ;;  %v4809_v19 = vsel %vm6919_vm13, %v503_v28, %v4602_v37  ;;  %7094 = vst [vmem:[#allocation38_spill] sm:$0xff] %v4822_v32  ;;  %vm6939_vm13 = vcmp.gt.f32.partialorder %v4822_v32, 0.5  ;;  %vm6958_vm14 = vcmp.gt.f32.partialorder %v4915_v49, 0.5 }
 0x246   :  { %v4811_v18 = vpop.f32.mrb[5].mxu0  ;;  %593 = vrot.lane.b32.xlu1 %v4804_v30, %s4160_s2  ;;  %595 = vrot.lane.b32.xlu0 %v4809_v19, %s4160_s2 }
 0x247   :  { %v469_v3 = vpop.permute.xlu1 %468  ;;  %v471_v34 = vpop.permute.xlu0 %470 }
 0x248   :  { %v504_v37 = vsel %vm490_vm5, 0.0, %v469_v3  ;;  %v505_v25 = vsel %vm490_vm5, 0.0, %v471_v34 }
 0x249   :  { %v4826_v28 = vpop.f32.mrb[6].mxu0  ;;  %v4831_v17 = vsel %vm6946_vm12, %v504_v37, %v4600_v36  ;;  %v4836_v16 = vsel %vm6940_vm15, %v505_v25, %v4610_v39  ;;  %vm6954_vm15 = vcmp.gt.f32.partialorder %v4904_v5, 0.5  ;;  %vm6959_vm12 = vcmp.gt.f32.partialorder %v4910_v58, 0.5 }
 0x24a   :  { %v4838_v15 = vpop.f32.mrb[7].mxu0  ;;  %597 = vrot.lane.b32.xlu1 %v4831_v17, %s4160_s2  ;;  %599 = vrot.lane.b32.xlu0 %v4836_v16, %s4160_s2 }
 0x24b   :  { %v473_v3 = vpop.permute.xlu1 %472 }
 0x24c   :  { %v506_v34 = vsel %vm490_vm5, 0.0, %v473_v3 }
 0x24d   :  { %v4846_v36 = vpop.f32.mrb[8].mxu0  ;;  %v4851_v39 = vsel %vm6939_vm13, %v506_v34, %v4608_v38  ;;  %vm6988_vm13 = vcmask 15360  }
 0x24e   :  { %v4853_v37 = vpop.f32.mrb[9].mxu0  ;;  %601 = vrot.lane.b32.xlu1 %v4851_v39, %s4160_s2 }
 0x251   :  { %v4857_v25 = vpop.f32.mrb[10].mxu0 }
 0x252   :  { %v4859_v14 = vpop.f32.mrb[11].mxu0 }
 0x255   :  { %v4861_v13 = vpop.f32.mrb[12].mxu0 }
 0x256   :  { %v4863_v35 = vpop.f32.mrb[13].mxu0 }
 0x259   :  { %v4865_v3 = vpop.f32.mrb[14].mxu0 }
 0x25a   :  { %v4867_v29 = vpop.f32.mrb[15].mxu0 }
 0x25d   :  { %v4869_v32 = vpop.f32.mrb[16].mxu0 }
 0x25e   :  { %v4871_v38 = vpop.f32.mrb[17].mxu0 }
 0x261   :  { %v4873_v34 = vpop.f32.mrb[18].mxu0 }
 0x262   :  { %v4875_v12 = vpop.f32.mrb[19].mxu0 }
 0x265   :  { %v4877_v11 = vpop.f32.mrb[20].mxu0 }
 0x266   :  { %v4879_v33 = vpop.f32.mrb[21].mxu0 }
 0x269   :  { %v4881_v20 = vpop.f32.mrb[22].mxu0 }
 0x26a   :  { %v4883_v10 = vpop.f32.mrb[23].mxu0 }
 0x26d   :  { %v4885_v9 = vpop.f32.mrb[24].mxu0 }
 0x26e   :  { %v4887_v31 = vpop.f32.mrb[25].mxu0 }
 0x271   :  { %v4889_v27 = vpop.f32.mrb[26].mxu0 }
 0x272   :  { %v4891_v8 = vpop.f32.mrb[27].mxu0 }
 0x275   :  { %v4893_v7 = vpop.f32.mrb[28].mxu0 }
 0x276   :  { %v4895_v24 = vpop.f32.mrb[29].mxu0 }
 0x279   :  { %v4897_v22 = vpop.f32.mrb[30].mxu0 }
 0x27a   :  { %7095 = vst [vmem:[#allocation39_spill] sm:$0xff] %v4897_v22  ;;  %v4899_v6 = vpop.f32.mrb[31].mxu0 }
 0x2a0   :  { %v572_v61 = vpop.permute.xlu0 %571 }
 0x2a1   :  { %v620_v48 = vsel %vm6988_vm13, 0.0, %v572_v61 }
 0x2a2   :  { %v4921_v4 = vsel %vm6954_vm15, %v620_v48, %v4637_v45  ;;  %v4935_v45 = vld [vmem:[%s6897_s5 + $0xa0] sm:$0xff]  ;;  %vm6963_vm15 = vcmp.gt.f32.partialorder %v4930_v2, 0.5 }
 0x2a3   :  { %701 = vrot.lane.b32.xlu0 %v4921_v4, %s4161_s27  ;;  %7100 = vst [vmem:[#allocation44_spill] sm:$0xff] %v4935_v45  ;;  %vm6962_vm11 = vcmp.gt.f32.partialorder %v4935_v45, 0.5 }
 0x2a4   :  { %v574_v43 = vpop.permute.xlu1 %573  ;;  %v576_v42 = vpop.permute.xlu0 %575 }
 0x2a5   :  { %v621_v48 = vsel %vm6988_vm13, 0.0, %v574_v43  ;;  %v622_v61 = vsel %vm6988_vm13, 0.0, %v576_v42 }
 0x2a6   :  { %v4942_v5 = vsel %vm6959_vm12, %v621_v48, %v4657_v52  ;;  %v4947_v40 = vsel %vm6958_vm14, %v622_v61, %v4661_v53  ;;  %v4958_v52 = vld [vmem:[%s6897_s5 + $0xa8] sm:$0xff]  ;;  %v4963_v53 = vld [vmem:[%s6897_s5 + $0xb0] sm:$0xff] }
 0x2a7   :  { %703 = vrot.lane.b32.xlu1 %v4942_v5, %s4161_s27  ;;  %705 = vrot.lane.b32.xlu0 %v4947_v40, %s4161_s27  ;;  %7101 = vst [vmem:[#allocation45_spill] sm:$0xff] %v4958_v52  ;;  %7102 = vst [vmem:[#allocation46_spill] sm:$0xff] %v4963_v53  ;;  %vm6967_vm14 = vcmp.gt.f32.partialorder %v4958_v52, 0.5  ;;  %vm6966_vm12 = vcmp.gt.f32.partialorder %v4963_v53, 0.5 }
 0x2a8   :  { %v578_v42 = vpop.permute.xlu1 %577  ;;  %v580_v43 = vpop.permute.xlu0 %579 }
 0x2a9   :  { %v623_v48 = vsel %vm6988_vm13, 0.0, %v578_v42  ;;  %v624_v61 = vsel %vm6988_vm13, 0.0, %v580_v43 }
 0x2aa   :  { %v4970_v49 = vsel %vm6963_vm15, %v623_v48, %v4683_v0  ;;  %v4975_v58 = vsel %vm6962_vm11, %v624_v61, %v4687_v1  ;;  %v4986_v0 = vld [vmem:[%s6897_s5 + $0xb8] sm:$0xff]  ;;  %v4991_v1 = vld [vmem:[%s6897_s5 + $0xc0] sm:$0xff] }
 0x2ab   :  { %707 = vrot.lane.b32.xlu1 %v4970_v49, %s4161_s27  ;;  %709 = vrot.lane.b32.xlu0 %v4975_v58, %s4161_s27  ;;  %7103 = vst [vmem:[#allocation47_spill] sm:$0xff] %v4986_v0  ;;  %7104 = vst [vmem:[#allocation48_spill] sm:$0xff] %v4991_v1  ;;  %vm6971_vm11 = vcmp.gt.f32.partialorder %v4986_v0, 0.5  ;;  %vm6970_vm15 = vcmp.gt.f32.partialorder %v4991_v1, 0.5 }
 0x2ac   :  { %v582_v42 = vpop.permute.xlu1 %581  ;;  %v584_v43 = vpop.permute.xlu0 %583 }
 0x2ad   :  { %v625_v48 = vsel %vm6988_vm13, 0.0, %v582_v42  ;;  %v626_v61 = vsel %vm6988_vm13, 0.0, %v584_v43 }
 0x2ae   :  { %v4998_v45 = vsel %vm6967_vm14, %v625_v48, %v4710_v41  ;;  %v5003_v2 = vsel %vm6966_vm12, %v626_v61, %v4715_v44  ;;  %v5014_v41 = vld [vmem:[%s6897_s5 + $0xc8] sm:$0xff]  ;;  %v5019_v44 = vld [vmem:[%s6897_s5 + $0xd0] sm:$0xff] }
 0x2af   :  { %711 = vrot.lane.b32.xlu1 %v4998_v45, %s4161_s27  ;;  %713 = vrot.lane.b32.xlu0 %v5003_v2, %s4161_s27  ;;  %7105 = vst [vmem:[#allocation49_spill] sm:$0xff] %v5014_v41  ;;  %7106 = vst [vmem:[#allocation50_spill] sm:$0xff] %v5019_v44  ;;  %vm6975_vm12 = vcmp.gt.f32.partialorder %v5014_v41, 0.5  ;;  %vm6974_vm14 = vcmp.gt.f32.partialorder %v5019_v44, 0.5 }
 0x2b0   :  { %v586_v42 = vpop.permute.xlu1 %585  ;;  %v588_v43 = vpop.permute.xlu0 %587 }
 0x2b1   :  { %v627_v48 = vsel %vm6988_vm13, 0.0, %v586_v42  ;;  %v628_v61 = vsel %vm6988_vm13, 0.0, %v588_v43 }
 0x2b2   :  { %v5026_v53 = vsel %vm6971_vm11, %v627_v48, %v4740_v57  ;;  %v5031_v52 = vsel %vm6970_vm15, %v628_v61, %v4745_v62  ;;  %v5042_v57 = vld [vmem:[%s6897_s5 + $0xd8] sm:$0xff]  ;;  %v5047_v62 = vld [vmem:[%s6897_s5 + $0xe0] sm:$0xff] }
 0x2b3   :  { %715 = vrot.lane.b32.xlu1 %v5026_v53, %s4161_s27  ;;  %717 = vrot.lane.b32.xlu0 %v5031_v52, %s4161_s27  ;;  %7107 = vst [vmem:[#allocation51_spill] sm:$0xff] %v5042_v57  ;;  %7108 = vst [vmem:[#allocation52_spill] sm:$0xff] %v5047_v62  ;;  %vm6981_vm15 = vcmp.gt.f32.partialorder %v5042_v57, 0.5  ;;  %vm6977_vm11 = vcmp.gt.f32.partialorder %v5047_v62, 0.5 }
 0x2b4   :  { %v590_v42 = vpop.permute.xlu1 %589  ;;  %v592_v43 = vpop.permute.xlu0 %591 }
 0x2b5   :  { %v629_v48 = vsel %vm6988_vm13, 0.0, %v590_v42  ;;  %v630_v61 = vsel %vm6988_vm13, 0.0, %v592_v43 }
 0x2b6   :  { %v5054_v1 = vsel %vm6975_vm12, %v629_v48, %v4772_v47  ;;  %v5059_v0 = vsel %vm6974_vm14, %v630_v61, %v4777_v50  ;;  %v5070_v47 = vld [vmem:[%s6897_s5 + $0xe8] sm:$0xff]  ;;  %v5075_v50 = vld [vmem:[%s6897_s5 + $0xf0] sm:$0xff] }
 0x2b7   :  { %719 = vrot.lane.b32.xlu1 %v5054_v1, %s4161_s27  ;;  %721 = vrot.lane.b32.xlu0 %v5059_v0, %s4161_s27  ;;  %7109 = vst [vmem:[#allocation53_spill] sm:$0xff] %v5070_v47  ;;  %7110 = vst [vmem:[#allocation54_spill] sm:$0xff] %v5075_v50  ;;  %vm6979_vm14 = vcmp.gt.f32.partialorder %v5070_v47, 0.5  ;;  %vm6978_vm12 = vcmp.gt.f32.partialorder %v5075_v50, 0.5  ;;  %v5154_v47 = vld [vmem:[%s6897_s5 + $0x118] sm:$0xff] }
 0x2b8   :  { %v594_v42 = vpop.permute.xlu1 %593  ;;  %v596_v43 = vpop.permute.xlu0 %595  ;;  %7115 = vst [vmem:[#allocation59_spill] sm:$0xff] %v5154_v47 }
 0x2b9   :  { %v631_v48 = vsel %vm6988_vm13, 0.0, %v594_v42  ;;  %v632_v61 = vsel %vm6988_vm13, 0.0, %v596_v43 }
 0x2ba   :  { %v5082_v44 = vsel %vm6981_vm15, %v631_v48, %v4804_v30  ;;  %v5087_v41 = vsel %vm6977_vm11, %v632_v61, %v4809_v19  ;;  %v5098_v30 = vld [vmem:[%s6897_s5 + $0xf8] sm:$0xff] }
 0x2bb   :  { %723 = vrot.lane.b32.xlu1 %v5082_v44, %s4161_s27  ;;  %725 = vrot.lane.b32.xlu0 %v5087_v41, %s4161_s27  ;;  %7111 = vst [vmem:[#allocation55_spill] sm:$0xff] %v5098_v30  ;;  %vm6980_vm11 = vcmp.gt.f32.partialorder %v5098_v30, 0.5 }
 0x2bc   :  { %v598_v42 = vpop.permute.xlu1 %597  ;;  %v600_v43 = vpop.permute.xlu0 %599 }
 0x2bd   :  { %v633_v19 = vsel %vm6988_vm13, 0.0, %v598_v42  ;;  %v634_v48 = vsel %vm6988_vm13, 0.0, %v600_v43 }
 0x2be   :  { %v5105_v61 = vsel %vm6979_vm14, %v633_v19, %v4831_v17  ;;  %v5110_v62 = vsel %vm6978_vm12, %v634_v48, %v4836_v16  ;;  %v5128_v16 = vld [vmem:[%s6897_s5 + $0x100] sm:$0xff]  ;;  %vm7019_vm12 = vcmask 31744   ;;  %v5134_v48 = vld [vmem:[%s6897_s5 + $0x108] sm:$0xff] }
 0x2bf   :  { %727 = vrot.lane.b32.xlu1 %v5105_v61, %s4161_s27  ;;  %729 = vrot.lane.b32.xlu0 %v5110_v62, %s4161_s27  ;;  %7112 = vst [vmem:[#allocation56_spill] sm:$0xff] %v5128_v16  ;;  %vm6987_vm14 = vcmp.gt.f32.partialorder %v5128_v16, 0.5  ;;  %7113 = vst [vmem:[#allocation57_spill] sm:$0xff] %v5134_v48 }
 0x2c0   :  { %v602_v42 = vpop.permute.xlu1 %601 }
 0x2c1   :  { %v635_v43 = vsel %vm6988_vm13, 0.0, %v602_v42 }
 0x2c2   :  { %v5121_v17 = vsel %vm6980_vm11, %v635_v43, %v4851_v39  ;;  %v5139_v39 = vld [vmem:[%s6897_s5 + $0x110] sm:$0xff]  ;;  %vm6992_vm11 = vcmp.gt.f32.partialorder %v5134_v48, 0.5 }
 0x2c3   :  { %731 = vrot.lane.b32.xlu1 %v5121_v17, %s4161_s27  ;;  %7114 = vst [vmem:[#allocation58_spill] sm:$0xff] %v5139_v39  ;;  %vm6991_vm15 = vcmp.gt.f32.partialorder %v5139_v39, 0.5 }
 0x315   :  { %v702_v19 = vpop.permute.xlu0 %701 }
 0x316   :  { %v750_v42 = vsel %vm7019_vm12, 0.0, %v702_v19 }
 0x317   :  { %v5145_v43 = vsel %vm6987_vm14, %v750_v42, %v4921_v4  ;;  %v5159_v4 = vld [vmem:[%s6897_s5 + $0x120] sm:$0xff]  ;;  %vm6996_vm14 = vcmp.gt.f32.partialorder %v5154_v47, 0.5 }
 0x318   :  { %831 = vrot.lane.b32.xlu0 %v5145_v43, %s4162_s16  ;;  %7116 = vst [vmem:[#allocation60_spill] sm:$0xff] %v5159_v4  ;;  %vm6995_vm13 = vcmp.gt.f32.partialorder %v5159_v4, 0.5 }
 0x319   :  { %v704_v30 = vpop.permute.xlu1 %703  ;;  %v706_v50 = vpop.permute.xlu0 %705 }
 0x31a   :  { %v751_v19 = vsel %vm7019_vm12, 0.0, %v704_v30  ;;  %v752_v42 = vsel %vm7019_vm12, 0.0, %v706_v50 }
 0x31b   :  { %v5166_v16 = vsel %vm6992_vm11, %v751_v19, %v4942_v5  ;;  %v5171_v57 = vsel %vm6991_vm15, %v752_v42, %v4947_v40  ;;  %v5182_v5 = vld [vmem:[%s6897_s5 + $0x128] sm:$0xff]  ;;  %v5187_v40 = vld [vmem:[%s6897_s5 + $0x130] sm:$0xff] }
 0x31c   :  { %833 = vrot.lane.b32.xlu1 %v5166_v16, %s4162_s16  ;;  %835 = vrot.lane.b32.xlu0 %v5171_v57, %s4162_s16  ;;  %7117 = vst [vmem:[#allocation61_spill] sm:$0xff] %v5182_v5  ;;  %7118 = vst [vmem:[#allocation62_spill] sm:$0xff] %v5187_v40  ;;  %vm7000_vm15 = vcmp.gt.f32.partialorder %v5182_v5, 0.5  ;;  %vm6999_vm11 = vcmp.gt.f32.partialorder %v5187_v40, 0.5 }
 0x31d   :  { %v708_v50 = vpop.permute.xlu1 %707  ;;  %v710_v30 = vpop.permute.xlu0 %709 }
 0x31e   :  { %v753_v19 = vsel %vm7019_vm12, 0.0, %v708_v50  ;;  %v754_v42 = vsel %vm7019_vm12, 0.0, %v710_v30 }
 0x31f   :  { %v5194_v39 = vsel %vm6996_vm14, %v753_v19, %v4970_v49  ;;  %v5199_v48 = vsel %vm6995_vm13, %v754_v42, %v4975_v58  ;;  %v5210_v49 = vld [vmem:[%s6897_s5 + $0x138] sm:$0xff]  ;;  %v5215_v58 = vld [vmem:[%s6897_s5 + $0x140] sm:$0xff] }
 0x320   :  { %837 = vrot.lane.b32.xlu1 %v5194_v39, %s4162_s16  ;;  %839 = vrot.lane.b32.xlu0 %v5199_v48, %s4162_s16  ;;  %7119 = vst [vmem:[#allocation63_spill] sm:$0xff] %v5210_v49  ;;  %7120 = vst [vmem:[#allocation64_spill] sm:$0xff] %v5215_v58  ;;  %vm7004_vm13 = vcmp.gt.f32.partialorder %v5210_v49, 0.5  ;;  %vm7003_vm14 = vcmp.gt.f32.partialorder %v5215_v58, 0.5 }
 0x321   :  { %v712_v50 = vpop.permute.xlu1 %711  ;;  %v714_v30 = vpop.permute.xlu0 %713 }
 0x322   :  { %v755_v19 = vsel %vm7019_vm12, 0.0, %v712_v50  ;;  %v756_v42 = vsel %vm7019_vm12, 0.0, %v714_v30 }
 0x323   :  { %v5222_v4 = vsel %vm7000_vm15, %v755_v19, %v4998_v45  ;;  %v5227_v47 = vsel %vm6999_vm11, %v756_v42, %v5003_v2  ;;  %v5238_v45 = vld [vmem:[%s6897_s5 + $0x148] sm:$0xff]  ;;  %v5243_v2 = vld [vmem:[%s6897_s5 + $0x150] sm:$0xff] }
 0x324   :  { %841 = vrot.lane.b32.xlu1 %v5222_v4, %s4162_s16  ;;  %843 = vrot.lane.b32.xlu0 %v5227_v47, %s4162_s16  ;;  %7121 = vst [vmem:[#allocation65_spill] sm:$0xff] %v5238_v45  ;;  %7122 = vst [vmem:[#allocation66_spill] sm:$0xff] %v5243_v2  ;;  %vm7008_vm11 = vcmp.gt.f32.partialorder %v5238_v45, 0.5  ;;  %vm7007_vm15 = vcmp.gt.f32.partialorder %v5243_v2, 0.5 }
 0x325   :  { %v716_v50 = vpop.permute.xlu1 %715  ;;  %v718_v30 = vpop.permute.xlu0 %717 }
 0x326   :  { %v757_v19 = vsel %vm7019_vm12, 0.0, %v716_v50  ;;  %v758_v42 = vsel %vm7019_vm12, 0.0, %v718_v30 }
 0x327   :  { %v5250_v40 = vsel %vm7004_vm13, %v757_v19, %v5026_v53  ;;  %v5255_v5 = vsel %vm7003_vm14, %v758_v42, %v5031_v52  ;;  %v5266_v53 = vld [vmem:[%s6897_s5 + $0x158] sm:$0xff]  ;;  %v5271_v52 = vld [vmem:[%s6897_s5 + $0x160] sm:$0xff] }
 0x328   :  { %845 = vrot.lane.b32.xlu1 %v5250_v40, %s4162_s16  ;;  %847 = vrot.lane.b32.xlu0 %v5255_v5, %s4162_s16  ;;  %7123 = vst [vmem:[#allocation67_spill] sm:$0xff] %v5266_v53  ;;  %7124 = vst [vmem:[#allocation68_spill] sm:$0xff] %v5271_v52  ;;  %vm7017_vm14 = vcmp.gt.f32.partialorder %v5266_v53, 0.5  ;;  %vm7010_vm13 = vcmp.gt.f32.partialorder %v5271_v52, 0.5 }
 0x329   :  { %v720_v50 = vpop.permute.xlu1 %719  ;;  %v722_v30 = vpop.permute.xlu0 %721 }
 0x32a   :  { %v759_v19 = vsel %vm7019_vm12, 0.0, %v720_v50  ;;  %v760_v42 = vsel %vm7019_vm12, 0.0, %v722_v30 }
 0x32b   :  { %v5278_v58 = vsel %vm7008_vm11, %v759_v19, %v5054_v1  ;;  %v5283_v49 = vsel %vm7007_vm15, %v760_v42, %v5059_v0  ;;  %v5294_v1 = vld [vmem:[%s6897_s5 + $0x168] sm:$0xff]  ;;  %v5299_v0 = vld [vmem:[%s6897_s5 + $0x170] sm:$0xff] }
 0x32c   :  { %849 = vrot.lane.b32.xlu1 %v5278_v58, %s4162_s16  ;;  %851 = vrot.lane.b32.xlu0 %v5283_v49, %s4162_s16  ;;  %7125 = vst [vmem:[#allocation69_spill] sm:$0xff] %v5294_v1  ;;  %7126 = vst [vmem:[#allocation70_spill] sm:$0xff] %v5299_v0  ;;  %vm7012_vm15 = vcmp.gt.f32.partialorder %v5294_v1, 0.5  ;;  %vm7011_vm11 = vcmp.gt.f32.partialorder %v5299_v0, 0.5  ;;  %v5376_v0 = vld [vmem:[%s6897_s5 + $0x198] sm:$0xff] }
 0x32d   :  { %v724_v50 = vpop.permute.xlu1 %723  ;;  %v726_v30 = vpop.permute.xlu0 %725 }
 0x32e   :  { %v761_v19 = vsel %vm7019_vm12, 0.0, %v724_v50  ;;  %v762_v42 = vsel %vm7019_vm12, 0.0, %v726_v30 }
 0x32f   :  { %v5306_v2 = vsel %vm7017_vm14, %v761_v19, %v5082_v44  ;;  %v5311_v45 = vsel %vm7010_vm13, %v762_v42, %v5087_v41  ;;  %v5322_v44 = vld [vmem:[%s6897_s5 + $0x178] sm:$0xff] }
 0x330   :  { %853 = vrot.lane.b32.xlu1 %v5306_v2, %s4162_s16  ;;  %855 = vrot.lane.b32.xlu0 %v5311_v45, %s4162_s16  ;;  %7127 = vst [vmem:[#allocation71_spill] sm:$0xff] %v5322_v44  ;;  %vm7014_vm13 = vcmp.gt.f32.partialorder %v5322_v44, 0.5  ;;  %v170_v44 = vld [vmem:[%s6896_s4] sm:$0xff] }
 0x331   :  { %v728_v50 = vpop.permute.xlu1 %727  ;;  %v730_v30 = vpop.permute.xlu0 %729 }
 0x332   :  { %v763_v41 = vsel %vm7019_vm12, 0.0, %v728_v50  ;;  %v764_v19 = vsel %vm7019_vm12, 0.0, %v730_v30 }
 0x333   :  { %v5329_v42 = vsel %vm7012_vm15, %v763_v41, %v5105_v61  ;;  %v5334_v52 = vsel %vm7011_vm11, %v764_v19, %v5110_v62  ;;  %v5352_v62 = vld [vmem:[%s6897_s5 + $0x180] sm:$0xff]  ;;  %vm879_vm11 = vcmask 64512   ;;  %v5358_v19 = vld [vmem:[%s6897_s5 + $0x188] sm:$0xff] }
 0x334   :  { %857 = vrot.lane.b32.xlu1 %v5329_v42, %s4162_s16  ;;  %859 = vrot.lane.b32.xlu0 %v5334_v52, %s4162_s16  ;;  %7128 = vst [vmem:[#allocation72_spill] sm:$0xff] %v5352_v62  ;;  %vm7023_vm15 = vcmp.gt.f32.partialorder %v5352_v62, 0.5 }
 0x335   :  { %v732_v50 = vpop.permute.xlu1 %731 }
 0x336   :  { %v765_v30 = vsel %vm7019_vm12, 0.0, %v732_v50  ;;  %v5364_v50 = vld [vmem:[%s6897_s5 + $0x190] sm:$0xff]  ;;  %vm1117_vm12 = vcmask 293888  }
 0x337   :  { %v5345_v61 = vsel %vm7014_vm13, %v765_v30, %v5121_v17  ;;  %7129 = vst [vmem:[#allocation73_spill] sm:$0xff] %v5364_v50  ;;  %vm7031_vm13 = vcmp.gt.f32.partialorder %v5358_v19, 0.5  ;;  %vm7027_vm14 = vcmp.gt.f32.partialorder %v5364_v50, 0.5 }
 0x338   :  { %861 = vrot.lane.b32.xlu1 %v5345_v61, %s4162_s16 }
 0x38a   :  { %v832_v41 = vpop.permute.xlu0 %831 }
 0x38b   :  { %v880_v17 = vsel %vm879_vm11, 0.0, %v832_v41 }
 0x38c   :  { %v929_v30 = vsel %vm7023_vm15, %v880_v17, %v5145_v43  ;;  %v5383_v43 = vld [vmem:[%s6897_s5 + $0x1a0] sm:$0xff]  ;;  %vm7028_vm15 = vcmp.gt.f32.partialorder %v5376_v0, 0.5 }
 0x38d   :  { %v1023_v41 = vadd.f32 %v4747_v63, %v929_v30  ;;  %7130 = vst [vmem:[#allocation74_spill] sm:$0xff] %v5383_v43  ;;  %v171_v30 = vld [vmem:[%s6896_s4 + $0x8] sm:$0xff]  ;;  %vm7029_vm10 = vcmp.gt.f32.partialorder %v5383_v43, 0.5 }
 0x38e   :  { %v834_v1 = vpop.permute.xlu1 %833  ;;  %v836_v53 = vpop.permute.xlu0 %835 }
 0x38f   :  { %v881_v17 = vsel %vm879_vm11, 0.0, %v834_v1  ;;  %v882_v62 = vsel %vm879_vm11, 0.0, %v836_v53  ;;  %v5387_v59 = vadd.f32 %v1023_v41, %v170_v44 }
 0x390   :  { %v930_v63 = vsel %vm7031_vm13, %v881_v17, %v5166_v16  ;;  %v931_v22 = vsel %vm7027_vm14, %v882_v62, %v5171_v57  ;;  %v5406_v16 = vld [vmem:[%s6897_s5 + $0x1a8] sm:$0xff]  ;;  %v5411_v17 = vld [vmem:[%s6897_s5 + $0x1b0] sm:$0xff] }
 0x391   :  { %v1118_v1 = vsel %vm1117_vm12, %v5387_v59, -inf  ;;  %v1028_v53 = vadd.f32 %v4735_v54, %v930_v63  ;;  %7131 = vst [vmem:[#allocation75_spill] sm:$0xff] %v5411_v17  ;;  %v5420_v54 = vld [vmem:[%s6897_s5 + $0x1b8] sm:$0xff]  ;;  %vm7034_vm14 = vcmp.gt.f32.partialorder %v5406_v16, 0.5 }
 0x392   :  { %v838_v44 = vpop.permute.xlu1 %837  ;;  %1119 = vmax.xlane.f32.xlu0 %v1118_v1  ;;  %v840_v41 = vpop.permute.xlu0 %839 }
 0x393   :  { %v883_v57 = vsel %vm879_vm11, 0.0, %v838_v44  ;;  %v884_v62 = vsel %vm879_vm11, 0.0, %v840_v41  ;;  %v5415_v50 = vadd.f32 %v1028_v53, %v171_v30  ;;  %v173_v30 = vld [vmem:[%s6896_s4 + $0x18] sm:$0xff]  ;;  %v174_v53 = vld [vmem:[%s6896_s4 + $0x20] sm:$0xff]  ;;  %v1033_v44 = vadd.f32 %v4779_v51, %v931_v22 }
 0x394   :  { %v932_v63 = vsel %vm7028_vm15, %v883_v57, %v5194_v39  ;;  %v933_v1 = vsel %vm7029_vm10, %v884_v62, %v5199_v48  ;;  %vm7033_vm15 = vcmp.gt.f32.partialorder %v5411_v17, 0.5  ;;  %v5444_v57 = vld [vmem:[%s6897_s5 + $0x1c0] sm:$0xff]  ;;  %v172_v62 = vld [vmem:[%s6896_s4 + $0x10] sm:$0xff]  ;;  %vm7036_vm10 = vcmp.gt.f32.partialorder %v5420_v54, 0.5 }
 0x395   :  { %v1121_v41 = vsel %vm1117_vm12, %v5415_v50, -inf  ;;  %v1038_v39 = vadd.f32 %v4767_v46, %v932_v63  ;;  %v1043_v48 = vadd.f32 %v4811_v18, %v933_v1  ;;  %vm7035_vm13 = vcmp.gt.f32.partialorder %v5444_v57, 0.5 }
 0x396   :  { %1122 = vmax.xlane.f32.xlu1 %v1121_v41  ;;  %v842_v22 = vpop.permute.xlu1 %841  ;;  %v844_v51 = vpop.permute.xlu0 %843 }
 0x397   :  { %v885_v43 = vsel %vm879_vm11, 0.0, %v842_v22  ;;  %v886_v46 = vsel %vm879_vm11, 0.0, %v844_v51  ;;  %v5452_v63 = vadd.f32 %v1038_v39, %v173_v30  ;;  %v5454_v18 = vadd.f32 %v1043_v48, %v174_v53  ;;  %v5466_v22 = vld [vmem:[%s6897_s5 + $0x1c8] sm:$0xff]  ;;  %v176_v30 = vld [vmem:[%s6896_s4 + $0x30] sm:$0xff] }
 0x398   :  { %v934_v1 = vsel %vm7034_vm14, %v885_v43, %v5222_v4  ;;  %v935_v41 = vsel %vm7033_vm15, %v886_v46, %v5227_v47  ;;  %v5468_v51 = vadd.f32 %v1033_v44, %v172_v62  ;;  %v5481_v53 = vld [vmem:[%s6897_s5 + $0x1d0] sm:$0xff]  ;;  %v175_v44 = vld [vmem:[%s6896_s4 + $0x28] sm:$0xff]  ;;  %vm7038_vm15 = vcmp.gt.f32.partialorder %v5466_v22, 0.5 }
 0x399   :  { %v1127_v4 = vsel %vm1117_vm12, %v5452_v63, -inf  ;;  %v1130_v43 = vsel %vm1117_vm12, %v5454_v18, -inf  ;;  %v1053_v47 = vadd.f32 %v4838_v15, %v935_v41  ;;  %v1048_v39 = vadd.f32 %v4799_v60, %v934_v1  ;;  %v5502_v1 = vld [vmem:[%s6897_s5 + $0x1d8] sm:$0xff] }
 0x39a   :  { %v846_v48 = vpop.permute.xlu1 %845  ;;  %1128 = vmax.xlane.f32.xlu0 %v1127_v4  ;;  %1131 = vmax.xlane.f32.xlu1 %v1130_v43  ;;  %v848_v62 = vpop.permute.xlu0 %847  ;;  %vm7037_vm14 = vcmp.gt.f32.partialorder %v5481_v53, 0.5 }
 0x39b   :  { %v887_v46 = vsel %vm879_vm11, 0.0, %v846_v48  ;;  %v888_v17 = vsel %vm879_vm11, 0.0, %v848_v62  ;;  %v5490_v15 = vadd.f32 %v1053_v47, %v176_v30  ;;  %v5504_v4 = vadd.f32 %v1048_v39, %v175_v44  ;;  %v178_v30 = vld [vmem:[%s6896_s4 + $0x40] sm:$0xff]  ;;  %v177_v48 = vld [vmem:[%s6896_s4 + $0x38] sm:$0xff] }
 0x39c   :  { %v936_v41 = vsel %vm7036_vm10, %v887_v46, %v5250_v40  ;;  %v937_v60 = vsel %vm7035_vm13, %v888_v17, %v5255_v5  ;;  %v1124_v40 = vsel %vm1117_vm12, %v5468_v51, -inf  ;;  %v5517_v17 = vld [vmem:[%s6897_s5 + $0x1e0] sm:$0xff]  ;;  %vm924_vm13 = vcmp.gt.f32.partialorder %v5502_v1, 0.5 }
 0x39d   :  { %v1136_v43 = vsel %vm1117_vm12, %v5490_v15, -inf  ;;  %v1063_v5 = vadd.f32 %v4853_v37, %v937_v60  ;;  %v1058_v47 = vadd.f32 %v4826_v28, %v936_v41  ;;  %v1133_v60 = vsel %vm1117_vm12, %v5504_v4, -inf }
 0x39e   :  { %v850_v44 = vpop.permute.xlu1 %849  ;;  %1125 = vmax.xlane.f32.xlu0 %v1124_v40  ;;  %1137 = vmax.xlane.f32.xlu1 %v1136_v43  ;;  %v852_v39 = vpop.permute.xlu0 %851  ;;  %vm7039_vm10 = vcmp.gt.f32.partialorder %v5517_v17, 0.5  ;;  %v5540_v40 = vld [vmem:[%s6897_s5 + $0x1e8] sm:$0xff] }
 0x39f   :  { %v889_v62 = vsel %vm879_vm11, 0.0, %v850_v44  ;;  %v890_v46 = vsel %vm879_vm11, 0.0, %v852_v39  ;;  %v5526_v37 = vadd.f32 %v1063_v5, %v178_v30  ;;  %v180_v30 = vld [vmem:[%s6896_s4 + $0x50] sm:$0xff]  ;;  %v5547_v43 = vadd.f32 %v1058_v47, %v177_v48  ;;  %v179_v44 = vld [vmem:[%s6896_s4 + $0x48] sm:$0xff] }
 0x3a0   :  { %v938_v28 = vsel %vm7038_vm15, %v889_v62, %v5278_v58  ;;  %v939_v41 = vsel %vm7037_vm14, %v890_v46, %v5283_v49  ;;  %v5553_v5 = vld [vmem:[%s6897_s5 + $0x1f0] sm:$0xff]  ;;  %vm926_vm14 = vcmp.gt.f32.partialorder %v5540_v40, 0.5 }
 0x3a1   :  { %v1142_v58 = vsel %vm1117_vm12, %v5526_v37, -inf  ;;  %v1073_v49 = vadd.f32 %v4859_v14, %v939_v41  ;;  %v1068_v39 = vadd.f32 %v4846_v36, %v938_v28  ;;  %vm7041_vm15 = vcmp.gt.f32.partialorder %v5553_v5, 0.5 }
 0x3a2   :  { %v854_v62 = vpop.permute.xlu1 %853  ;;  %1134 = vmax.xlane.f32.xlu0 %v1133_v60  ;;  %1143 = vmax.xlane.f32.xlu1 %v1142_v58  ;;  %v856_v46 = vpop.permute.xlu0 %855  ;;  %v182_v60 = vld [vmem:[%s6896_s4 + $0x60] sm:$0xff] }
 0x3a3   :  { %v891_v47 = vsel %vm879_vm11, 0.0, %v854_v62  ;;  %v892_v48 = vsel %vm879_vm11, 0.0, %v856_v46  ;;  %v5562_v14 = vadd.f32 %v1073_v49, %v180_v30  ;;  %v5571_v28 = vadd.f32 %v1068_v39, %v179_v44  ;;  %v181_v62 = vld [vmem:[%s6896_s4 + $0x58] sm:$0xff] }
 0x3a4   :  { %v940_v41 = vsel %vm924_vm13, %v891_v47, %v5306_v2  ;;  %v941_v36 = vsel %vm7039_vm10, %v892_v48, %v5311_v45  ;;  %v1139_v30 = vsel %vm1117_vm12, %v5547_v43, -inf  ;;  %v5583_v2 = vld [vmem:[%s6897_s5 + $0x1f8] sm:$0xff] }
 0x3a5   :  { %v1148_v58 = vsel %vm1117_vm12, %v5562_v14, -inf  ;;  %v1083_v45 = vadd.f32 %v4863_v35, %v941_v36  ;;  %v1078_v49 = vadd.f32 %v4857_v25, %v940_v41  ;;  %vm7040_vm10 = vcmp.gt.f32.partialorder %v5583_v2, 0.5  ;;  %v184_v36 = vld [vmem:[%s6896_s4 + $0x70] sm:$0xff] }
 0x3a6   :  { %v858_v44 = vpop.permute.xlu1 %857  ;;  %1140 = vmax.xlane.f32.xlu0 %v1139_v30  ;;  %1149 = vmax.xlane.f32.xlu1 %v1148_v58  ;;  %v860_v39 = vpop.permute.xlu0 %859  ;;  %v1145_v41 = vsel %vm1117_vm12, %v5571_v28, -inf }
 0x3a7   :  { %v893_v46 = vsel %vm879_vm11, 0.0, %v858_v44  ;;  %v894_v47 = vsel %vm879_vm11, 0.0, %v860_v39  ;;  %v5592_v48 = vadd.f32 %v1083_v45, %v182_v60  ;;  %v5608_v30 = vadd.f32 %v1078_v49, %v181_v62 }
 0x3a8   :  { %v942_v35 = vsel %vm926_vm14, %v893_v46, %v5329_v42  ;;  %v943_v25 = vsel %vm7041_vm15, %v894_v47, %v5334_v52  ;;  %v183_v52 = vld [vmem:[%s6896_s4 + $0x68] sm:$0xff]  ;;  %v185_v47 = vld [vmem:[%s6896_s4 + $0x78] sm:$0xff] }
 0x3a9   :  { %v1154_v60 = vsel %vm1117_vm12, %v5592_v48, -inf  ;;  %v1093_v42 = vadd.f32 %v4867_v29, %v943_v25  ;;  %v1088_v58 = vadd.f32 %v4861_v13, %v942_v35  ;;  %v1151_v29 = vsel %vm1117_vm12, %v5608_v30, -inf }
 0x3aa   :  { %v862_v45 = vpop.permute.xlu1 %861  ;;  %1146 = vmax.xlane.f32.xlu0 %v1145_v41  ;;  %1155 = vmax.xlane.f32.xlu1 %v1154_v60 }
 0x3ab   :  { %v895_v44 = vsel %vm879_vm11, 0.0, %v862_v45  ;;  %v5616_v39 = vadd.f32 %v1093_v42, %v184_v36  ;;  %v5625_v62 = vadd.f32 %v1088_v58, %v183_v52 }
 0x3ac   :  { %v944_v49 = vsel %vm7040_vm10, %v895_v44, %v5345_v61  ;;  %vm3332_vm10 = vmneg %vm192_vm1 }
 0x3ad   :  { %v1160_v13 = vsel %vm1117_vm12, %v5616_v39, -inf  ;;  %v1098_v46 = vadd.f32 %v4865_v3, %v944_v49  ;;  %v1157_v35 = vsel %vm1117_vm12, %v5625_v62, -inf  ;;  %v7132_v3 = vpack.i.bf16 %v4321_v26, %v4308_v23  ;;  %vm5685_vm15 = vmpackc.low %vm3332_vm10, %vm4157_vm2 }
 0x3ae   :  { %1152 = vmax.xlane.f32.xlu0 %v1151_v29  ;;  %1161 = vmax.xlane.f32.xlu1 %v1160_v13  ;;  %vm5708_vm10 = vmpackc.low %vm192_vm1, %vm4157_vm2 }
 0x3af   :  { %v5633_v61 = vadd.f32 %v1098_v46, %v185_v47 }
 0x3b1   :  { %v1163_v25 = vsel %vm1117_vm12, %v5633_v61, -inf }
 0x3b2   :  { %1158 = vmax.xlane.f32.xlu0 %v1157_v35 }
 0x3b6   :  { %1164 = vmax.xlane.f32.xlu0 %v1163_v25 }
 0x3bf   :  { %3922 = vrot.lane.b32.xlu1 %v7132_v3, %s4163_s30 }
 0x3cc   :  { %210 = vrot.lane.b32.xlu0 %v4305_v21, %s4163_s30 }
 0x41f   :  { %v1120_v41 = vpop.xlane.xlu0 %1119 }
 0x420   :  { %v1166_v36 = vsub.f32 %v5387_v59, %v1120_v41 }
 0x422   :  { %v1182_v60 = vmul.f32 1.442695, %v1166_v36 }
 0x423   :  { %v1123_v42 = vpop.xlane.xlu1 %1122 }
 0x424   :  { %3936 = vpow2.f32 %v1182_v60  ;;  %v1167_v58 = vsub.f32 %v5415_v50, %v1123_v42 }
 0x426   :  { %v1184_v45 = vmul.f32 1.442695, %v1167_v58 }
 0x427   :  { %v1132_v52 = vpop.xlane.xlu1 %1131  ;;  %v1129_v44 = vpop.xlane.xlu0 %1128 }
 0x428   :  { %3938 = vpow2.f32 %v1184_v45  ;;  %v1169_v49 = vsub.f32 %v5452_v63, %v1129_v44  ;;  %v1170_v23 = vsub.f32 %v5454_v18, %v1132_v52 }
 0x42a   :  { %v1188_v29 = vmul.f32 1.442695, %v1169_v49  ;;  %v1190_v47 = vmul.f32 1.442695, %v1170_v23 }
 0x42b   :  { %v1138_v26 = vpop.xlane.xlu1 %1137  ;;  %v1126_v13 = vpop.xlane.xlu0 %1125 }
 0x42c   :  { %v1168_v21 = vsub.f32 %v5468_v51, %v1126_v13  ;;  %3940 = vpow2.f32 %v1188_v29  ;;  %v1172_v50 = vsub.f32 %v5490_v15, %v1138_v26 }
 0x42e   :  { %v5648_v59 = vpop.eup %3936  ;;  %v1186_v46 = vmul.f32 1.442695, %v1168_v21  ;;  %v1194_v51 = vmul.f32 1.442695, %v1172_v50 }
 0x42f   :  { %v1144_v35 = vpop.xlane.xlu1 %1143  ;;  %v1135_v25 = vpop.xlane.xlu0 %1134  ;;  %v1214_v3 = vsel %vm1117_vm12, %v5648_v59, 0.0 }
 0x430   :  { %v1171_v63 = vsub.f32 %v5504_v4, %v1135_v25  ;;  %1215 = vadd.xlane.f32.xlu1 %v1214_v3  ;;  %3942 = vpow2.f32 %v1186_v46  ;;  %v1174_v36 = vsub.f32 %v5526_v37, %v1144_v35 }
 0x431   :  { %3944 = vpow2.f32 %v1190_v47 }
 0x432   :  { %v5654_v18 = vpop.eup %3938  ;;  %v1192_v41 = vmul.f32 1.442695, %v1171_v63  ;;  %v1198_v52 = vmul.f32 1.442695, %v1174_v36 }
 0x433   :  { %v1150_v60 = vpop.xlane.xlu1 %1149  ;;  %v1141_v42 = vpop.xlane.xlu0 %1140  ;;  %v1217_v15 = vsel %vm1117_vm12, %v5654_v18, 0.0 }
 0x434   :  { %v1173_v58 = vsub.f32 %v5547_v43, %v1141_v42  ;;  %1218 = vadd.xlane.f32.xlu0 %v1217_v15  ;;  %3946 = vpow2.f32 %v1192_v41  ;;  %v1176_v47 = vsub.f32 %v5562_v14, %v1150_v60 }
 0x435   :  { %3948 = vpow2.f32 %v1194_v51 }
 0x436   :  { %v1196_v45 = vmul.f32 1.442695, %v1173_v58  ;;  %v5660_v4 = vpop.eup %3940  ;;  %v1202_v41 = vmul.f32 1.442695, %v1176_v47  ;;  %v7135_v58 = vmov 0.0  }
 0x437   :  { %v1156_v44 = vpop.xlane.xlu1 %1155  ;;  %v1147_v49 = vpop.xlane.xlu0 %1146  ;;  %v1223_v23 = vsel %vm1117_vm12, %v5660_v4, 0.0 }
 0x438   :  { %v1178_v29 = vsub.f32 %v5592_v48, %v1156_v44  ;;  %v1175_v37 = vsub.f32 %v5571_v28, %v1147_v49  ;;  %3950 = vpow2.f32 %v1196_v45  ;;  %1224 = vadd.xlane.f32.xlu0 %v1223_v23 }
 0x439   :  { %3952 = vpow2.f32 %v1198_v52 }
 0x43a   :  { %v1200_v26 = vmul.f32 1.442695, %v1175_v37  ;;  %v5666_v43 = vpop.eup %3942  ;;  %v1206_v13 = vmul.f32 1.442695, %v1178_v29 }
 0x43b   :  { %v1162_v21 = vpop.xlane.xlu1 %1161  ;;  %v1153_v46 = vpop.xlane.xlu0 %1152  ;;  %v1220_v48 = vsel %vm1117_vm12, %v5666_v43, 0.0 }
 0x43c   :  { %v1177_v50 = vsub.f32 %v5608_v30, %v1153_v46  ;;  %v5672_v28 = vpop.eup %3944  ;;  %3954 = vpow2.f32 %v1200_v26  ;;  %1221 = vadd.xlane.f32.xlu1 %v1220_v48  ;;  %v1180_v15 = vsub.f32 %v5616_v39, %v1162_v21 }
 0x43d   :  { %3956 = vpow2.f32 %v1206_v13  ;;  %v1226_v30 = vsel %vm1117_vm12, %v5672_v28, 0.0 }
 0x43e   :  { %v1204_v35 = vmul.f32 1.442695, %v1177_v50  ;;  %v5675_v25 = vpop.eup %3946  ;;  %v1210_v23 = vmul.f32 1.442695, %v1180_v15 }
 0x43f   :  { %v3923_v3 = vpop.permute.xlu1 %3922  ;;  %v1159_v63 = vpop.xlane.xlu0 %1158  ;;  %v1229_v60 = vsel %vm1117_vm12, %v5675_v25, 0.0 }
 0x440   :  { %v3924_v51 = vunpack.i.l.bf16 %v3923_v3  ;;  %v1179_v14 = vsub.f32 %v5625_v62, %v1159_v63  ;;  %v5680_v36 = vpop.eup %3948  ;;  %3958 = vpow2.f32 %v1204_v35  ;;  %1227 = vadd.xlane.f32.xlu1 %v1226_v30  ;;  %1230 = vadd.xlane.f32.xlu0 %v1229_v60  ;;  %v3925_v26 = vunpack.i.h.bf16 %v3923_v3 }
 0x441   :  { %3960 = vpow2.f32 %v1202_v41  ;;  %v1232_v29 = vsel %vm1117_vm12, %v5680_v36, 0.0 }
 0x442   :  { %v3837_v45 = vpack.c.bf16 %v3924_v51, %v7135_v58  ;;  %v5691_v62 = vpop.eup %3950  ;;  %v1208_v52 = vmul.f32 1.442695, %v1179_v14 }
 0x443   :  { %v1165_v44 = vpop.xlane.xlu0 %1164  ;;  %v1235_v37 = vsel %vm1117_vm12, %v5691_v62, 0.0  ;;  %v5700_v39 = vpop.eup %3952 }
 0x444   :  { %v1181_v49 = vsub.f32 %v5633_v61, %v1165_v44  ;;  %3839 = vmatprep.subr.msk.bf16.mxu1 %vm5685_vm15, %v3837_v45  ;;  %1233 = vadd.xlane.f32.xlu1 %v1232_v29  ;;  %3962 = vpow2.f32 %v1208_v52  ;;  %v1238_v50 = vsel %vm1117_vm12, %v5700_v39, 0.0  ;;  %v5748_v29 = vrot.slane %v4425_v55, 6  ;;  %v7138_v55 = vld [vmem:[#allocation39_spill] sm:$0xff] }
 0x445   :  { %3842 = vmatpush3.bf16.msk.msra.mxu1 %vm5685_vm15, %v3837_v45  ;;  %1236 = vadd.xlane.f32.xlu0 %v1235_v37 }
 0x446   :  { %v1212_v13 = vmul.f32 1.442695, %v1181_v49  ;;  %v5704_v61 = vpop.eup %3954  ;;  %v5745_v49 = vrot.slane %v4427_v56, 6 }
 0x447   :  { %v211_v21 = vpop.permute.xlu0 %210  ;;  %v1241_v48 = vsel %vm1117_vm12, %v5704_v61, 0.0  ;;  %v5716_v35 = vpop.eup %3956 }
 0x448   :  { %3964 = vpow2.f32 %v1212_v13  ;;  %v3843_v47 = vpack.c.bf16 %v211_v21, %v3925_v26  ;;  %1239 = vadd.xlane.f32.xlu1 %v1238_v50  ;;  %v1250_v63 = vsel %vm1117_vm12, %v5716_v35, 0.0  ;;  %v5753_v37 = vsel %vm192_vm1, %v5745_v49, %v5748_v29 }
 0x449   :  { %3966 = vpow2.f32 %v1210_v23  ;;  %1242 = vadd.xlane.f32.xlu0 %v1241_v48  ;;  %v3926_v23 = vpack.i.bf16 %v5753_v37, %v5748_v29 }
 0x44a   :  { %3845 = vmatprep.subr.msk.bf16.mxu1 %vm5708_vm10, %v3843_v47  ;;  %v5720_v3 = vpop.eup %3958 }
 0x44b   :  { %3848 = vmatpush3.bf16.msk.msra.mxu1 %vm5708_vm10, %v3843_v47  ;;  %v1247_v41 = vsel %vm1117_vm12, %v5720_v3, 0.0  ;;  %v5728_v51 = vpop.eup %3960 }
 0x44c   :  { %1251 = vadd.xlane.f32.xlu1 %v1250_v63  ;;  %v1244_v30 = vsel %vm1117_vm12, %v5728_v51, 0.0 }
 0x44d   :  { %1248 = vadd.xlane.f32.xlu0 %v1247_v41 }
 0x44e   :  { %v5730_v14 = vpop.eup %3962 }
 0x44f   :  { %v1253_v52 = vsel %vm1117_vm12, %v5730_v14, 0.0 }
 0x451   :  { %1245 = vadd.xlane.f32.xlu0 %v1244_v30 }
 0x452   :  { %v5734_v60 = vpop.eup %3964 }
 0x453   :  { %v1259_v15 = vsel %vm1117_vm12, %v5734_v60, 0.0  ;;  %v5738_v45 = vpop.eup %3966 }
 0x454   :  { %1260 = vadd.xlane.f32.xlu1 %v1259_v15  ;;  %v1256_v44 = vsel %vm1117_vm12, %v5738_v45, 0.0 }
 0x455   :  { %1254 = vadd.xlane.f32.xlu0 %v1253_v52 }
 0x458   :  { %1257 = vadd.xlane.f32.xlu1 %v1256_v44 }
 0x469   :  { %1541 = vrot.lane.b32.xlu1 %v5745_v49, %s4156_s1 }
 0x46b   :  { %3927 = vrot.lane.b32.xlu0 %v3926_v23, %s4156_s1 }
 0x46d   :  { %1787 = vrot.lane.b32.xlu1 %v4871_v38, %s4159_s18 }
 0x46f   :  { %1791 = vrot.lane.b32.xlu0 %v4875_v12, %s4159_s18 }
 0x471   :  { %1789 = vrot.lane.b32.xlu1 %v4869_v32, %s4159_s18 }
 0x473   :  { %1795 = vrot.lane.b32.xlu0 %v4879_v33, %s4159_s18 }
 0x475   :  { %1793 = vrot.lane.b32.xlu1 %v4873_v34, %s4159_s18 }
 0x477   :  { %1799 = vrot.lane.b32.xlu0 %v4883_v10, %s4159_s18 }
 0x479   :  { %1797 = vrot.lane.b32.xlu1 %v4877_v11, %s4159_s18 }
 0x47b   :  { %1803 = vrot.lane.b32.xlu0 %v4887_v31, %s4159_s18 }
 0x47d   :  { %1801 = vrot.lane.b32.xlu1 %v4881_v20, %s4159_s18 }
 0x47f   :  { %1807 = vrot.lane.b32.xlu0 %v4891_v8, %s4159_s18 }
 0x481   :  { %1805 = vrot.lane.b32.xlu1 %v4885_v9, %s4159_s18 }
 0x483   :  { %1811 = vrot.lane.b32.xlu0 %v4895_v24, %s4159_s18 }
 0x485   :  { %1809 = vrot.lane.b32.xlu1 %v4889_v27, %s4159_s18 }
 0x487   :  { %1815 = vrot.lane.b32.xlu0 %v4899_v6, %s4159_s18 }
 0x489   :  { %1813 = vrot.lane.b32.xlu1 %v4893_v7, %s4159_s18 }
 0x48d   :  { %1817 = vrot.lane.b32.xlu1 %v7138_v55, %s4159_s18 }
 0x4bd   :  { %v1216_v56 = vpop.xlane.xlu1 %1215 }
 0x4be   :  { %3968 = vrcp.f32 %v1216_v56 }
 0x4c1   :  { %v1219_v26 = vpop.xlane.xlu0 %1218 }
 0x4c2   :  { %3970 = vrcp.f32 %v1219_v26 }
 0x4c5   :  { %v1225_v13 = vpop.xlane.xlu0 %1224 }
 0x4c6   :  { %3972 = vrcp.f32 %v1225_v13 }
 0x4c8   :  { %v3969_v21 = vpop.eup %3968 }
 0x4c9   :  { %v1278_v47 = vmul.f32 %v3969_v21, %v5648_v59  ;;  %v1222_v50 = vpop.xlane.xlu1 %1221 }
 0x4ca   :  { %3974 = vrcp.f32 %v1222_v50 }
 0x4cb   :  { %3653 = vmatprep.mubr.msk.f32.mxu1 %vm1117_vm12, %v1278_v47 }
 0x4cc   :  { %v3971_v48 = vpop.eup %3970 }
 0x4cd   :  { %v1279_v63 = vmul.f32 %v3971_v48, %v5654_v18  ;;  %v1228_v41 = vpop.xlane.xlu1 %1227  ;;  %v1231_v30 = vpop.xlane.xlu0 %1230 }
 0x4ce   :  { %3976 = vrcp.f32 %v1228_v41 }
 0x4cf   :  { %3654 = vmatmul.mubr.msk.f32.vlgmr.msra.gmra.mrb[20].mxu1 %vm1117_vm12, %v1279_v63  ;;  %3978 = vrcp.f32 %v1231_v30 }
 0x4d0   :  { %v3973_v44 = vpop.eup %3972 }
 0x4d1   :  { %v1234_v15 = vpop.xlane.xlu1 %1233  ;;  %v1281_v13 = vmul.f32 %v3973_v44, %v5660_v4 }
 0x4d2   :  { %3980 = vrcp.f32 %v1234_v15  ;;  %v1237_v52 = vpop.xlane.xlu0 %1236 }
 0x4d3   :  { %3982 = vrcp.f32 %v1237_v52 }
 0x4d4   :  { %v3975_v59 = vpop.eup %3974 }
 0x4d5   :  { %v1240_v23 = vpop.xlane.xlu1 %1239  ;;  %v1280_v56 = vmul.f32 %v3975_v59, %v5666_v43 }
 0x4d6   :  { %3984 = vrcp.f32 %v1240_v23  ;;  %v1243_v26 = vpop.xlane.xlu0 %1242 }
 0x4d7   :  { %3986 = vrcp.f32 %v1243_v26  ;;  %3656 = vmatprep.mubr.msk.f32.mxu1 %vm1117_vm12, %v1280_v56 }
 0x4d8   :  { %v3977_v18 = vpop.eup %3976  ;;  %3657 = vmatmul.mubr.msk.f32.gmra.mrb[22].mxu1 %vm1117_vm12, %v1281_v13 }
 0x4d9   :  { %v3979_v21 = vpop.eup %3978  ;;  %v1282_v47 = vmul.f32 %v3977_v18, %v5672_v28  ;;  %v1252_v50 = vpop.xlane.xlu1 %1251 }
 0x4da   :  { %v1249_v48 = vpop.xlane.xlu0 %1248  ;;  %v1283_v63 = vmul.f32 %v3979_v21, %v5675_v25  ;;  %3988 = vrcp.f32 %v1252_v50 }
 0x4db   :  { %3659 = vmatprep.mubr.msk.f32.mxu1 %vm1117_vm12, %v1282_v47  ;;  %3990 = vrcp.f32 %v1249_v48 }
 0x4dc   :  { %v3981_v43 = vpop.eup %3980  ;;  %3660 = vmatmul.mubr.msk.f32.gmra.mrb[24].mxu1 %vm1117_vm12, %v1283_v63 }
 0x4dd   :  { %v3983_v41 = vpop.eup %3982  ;;  %v1284_v4 = vmul.f32 %v3981_v43, %v5680_v36 }
 0x4de   :  { %v1246_v30 = vpop.xlane.xlu0 %1245  ;;  %v1285_v15 = vmul.f32 %v3983_v41, %v5691_v62 }
 0x4df   :  { %3992 = vrcp.f32 %v1246_v30  ;;  %3662 = vmatprep.mubr.msk.f32.mxu1 %vm1117_vm12, %v1284_v4 }
 0x4e0   :  { %v3985_v28 = vpop.eup %3984  ;;  %3663 = vmatmul.mubr.msk.f32.gmra.mrb[26].mxu1 %vm1117_vm12, %v1285_v15 }
 0x4e1   :  { %v1261_v25 = vpop.xlane.xlu1 %1260  ;;  %v3987_v52 = vpop.eup %3986  ;;  %v1286_v44 = vmul.f32 %v3985_v28, %v5700_v39 }
 0x4e2   :  { %v1255_v59 = vpop.xlane.xlu0 %1254  ;;  %v1287_v23 = vmul.f32 %v3987_v52, %v5704_v61 }
 0x4e3   :  { %3994 = vrcp.f32 %v1255_v59  ;;  %3665 = vmatprep.mubr.msk.f32.mxu1 %vm1117_vm12, %v1286_v44 }
 0x4e4   :  { %3666 = vmatmul.mubr.msk.f32.gmra.mrb[28].mxu1 %vm1117_vm12, %v1287_v23  ;;  %v3989_v56 = vpop.eup %3988  ;;  %v7156_v23 = vld [vmem:[#allocation31_spill] sm:$0xff] }
 0x4e5   :  { %v1258_v36 = vpop.xlane.xlu1 %1257  ;;  %v3991_v13 = vpop.eup %3990  ;;  %v1290_v4 = vmul.f32 %v3989_v56, %v5716_v35 }
 0x4e6   :  { %3996 = vrcp.f32 %v1258_v36  ;;  %v3928_v62 = vpop.permute.xlu0 %3927  ;;  %v1289_v43 = vmul.f32 %v3991_v13, %v5720_v3 }
 0x4e7   :  { %3998 = vrcp.f32 %v1261_v25  ;;  %v3929_v26 = vunpack.i.l.bf16 %v3928_v62  ;;  %v3930_v47 = vunpack.i.h.bf16 %v3928_v62 }
 0x4e9   :  { %v1542_v18 = vpop.permute.xlu1 %1541  ;;  %v3993_v21 = vpop.eup %3992  ;;  %v1550_v50 = vsel %vm192_vm1, %v3929_v26, 0.0 }
 0x4ea   :  { %v1549_v39 = vsel %vm192_vm1, 0.0, %v1542_v18  ;;  %v1792_v48 = vpop.permute.xlu0 %1791  ;;  %v1288_v63 = vmul.f32 %v3993_v21, %v5728_v51  ;;  %v3863_v28 = vpack.c.bf16 %v1550_v50, %v3930_v47  ;;  %v7144_v50 = vld [vmem:[#allocation7_spill] sm:$0xff]  ;;  %v7162_v18 = vld [vmem:[#allocation33_spill] sm:$0xff] }
 0x4eb   :  { %v3857_v61 = vpack.c.bf16 %v1549_v39, %v7135_v58  ;;  %v1837_v59 = vsel %vm490_vm5, 0.0, %v1792_v48 }
 0x4ec   :  { %3668 = vmatprep.mubr.msk.f32.mxu1 %vm1117_vm12, %v1288_v63  ;;  %v5849_v21 = vsel %vm525_vm8, %v1837_v59, %v4875_v12  ;;  %vm7163_vm8 = vcmp.gt.f32.partialorder %v7162_v18, 0.5 }
 0x4ed   :  { %v1788_v41 = vpop.permute.xlu1 %1787  ;;  %3859 = vmatprep.subr.msk.bf16.mxu1 %vm4432_vm3, %v3857_v61  ;;  %v3995_v15 = vpop.eup %3994  ;;  %3669 = vmatmul.mubr.msk.f32.gmra.mrb[30].mxu1 %vm1117_vm12, %v1289_v43 }
 0x4ee   :  { %v1835_v25 = vsel %vm490_vm5, 0.0, %v1788_v41  ;;  %3671 = vmatprep.mubr.msk.f32.mxu1 %vm1117_vm12, %v1290_v4  ;;  %v1796_v52 = vpop.permute.xlu0 %1795  ;;  %3862 = vmatpush3.bf16.xpose.msk.msra.mxu1 %vm4432_vm3, %v3857_v61  ;;  %v1291_v35 = vmul.f32 %v3995_v15, %v5730_v14 }
 0x4ef   :  { %v5829_v51 = vsel %vm523_vm6, %v1835_v25, %v4871_v38  ;;  %3865 = vmatprep.subr.msk.bf16.mxu1 %vm4444_vm4, %v3863_v28  ;;  %v1839_v47 = vsel %vm490_vm5, 0.0, %v1796_v52  ;;  %vm7157_vm6 = vcmp.gt.f32.partialorder %v7156_v23, 0.5  ;;  %v7181_v23 = vld [vmem:[#allocation19_spill] sm:$0xff] }
 0x4f0   :  { %v3997_v44 = vpop.eup %3996  ;;  %1883 = vrot.lane.b32.xlu0 %v5829_v51, %s4160_s2 }
 0x4f1   :  { %v3999_v36 = vpop.eup %3998  ;;  %v1790_v62 = vpop.permute.xlu1 %1789  ;;  %v1292_v56 = vmul.f32 %v3997_v44, %v5738_v45  ;;  %3672 = vmatmul.mubr.msk.f32.gmra.mrb[32].mxu1 %vm1117_vm12, %v1291_v35  ;;  %v7152_v35 = vld [vmem:[#allocation8_spill] sm:$0xff]  ;;  %v7153_v44 = vld [vmem:[#allocation9_spill] sm:$0xff] }
 0x4f2   :  { %v1836_v38 = vsel %vm490_vm5, 0.0, %v1790_v62  ;;  %v1800_v26 = vpop.permute.xlu0 %1799  ;;  %v1293_v45 = vmul.f32 %v3999_v36, %v5734_v60  ;;  %v7146_v60 = vld [vmem:[#allocation27_spill] sm:$0xff] }
 0x4f3   :  { %3674 = vmatprep.mubr.msk.f32.mxu1 %vm1117_vm12, %v1292_v56  ;;  %v5844_v13 = vsel %vm524_vm7, %v1836_v38, %v4869_v32  ;;  %vm7147_vm1 = vcmp.gt.f32.partialorder %v7146_v60, 0.5  ;;  %v1841_v43 = vsel %vm490_vm5, 0.0, %v1800_v26  ;;  %v7158_v26 = vld [vmem:[#allocation10_spill] sm:$0xff]  ;;  %v7168_v60 = vld [vmem:[#allocation35_spill] sm:$0xff] }
 0x4f4   :  { %1885 = vrot.lane.b32.xlu1 %v5844_v13, %s4160_s2  ;;  %1887 = vrot.lane.b32.xlu0 %v5849_v21, %s4160_s2  ;;  %v5871_v63 = vsel %vm7147_vm1, %v1839_v47, %v4879_v33  ;;  %v7150_v33 = vld [vmem:[#allocation29_spill] sm:$0xff]  ;;  %vm7169_vm1 = vcmp.gt.f32.partialorder %v7168_v60, 0.5 }
 0x4f5   :  { %v1794_v39 = vpop.permute.xlu1 %1793  ;;  %3675 = vmatmul.mubr.msk.f32.gmra.mrb[34].mxu1 %vm1117_vm12, %v1293_v45  ;;  %vm7151_vm3 = vcmp.gt.f32.partialorder %v7150_v33, 0.5 }
 0x4f6   :  { %v1838_v32 = vsel %vm490_vm5, 0.0, %v1794_v39  ;;  %3717 = vmatprep.mubr.msk.f32.mxu1 %vm56_vm0, %v7144_v50  ;;  %v1804_v12 = vpop.permute.xlu0 %1803  ;;  %3868 = vmatpush3.bf16.xpose.msk.msra.mxu1 %vm4444_vm4, %v3863_v28  ;;  %v5887_v28 = vsel %vm7151_vm3, %v1841_v43, %v4883_v10  ;;  %v7154_v10 = vld [vmem:[#allocation30_spill] sm:$0xff] }
 0x4f7   :  { %v5866_v48 = vsel %vm526_vm9, %v1838_v32, %v4873_v34  ;;  %v7148_v34 = vld [vmem:[#allocation28_spill] sm:$0xff]  ;;  %v1843_v25 = vsel %vm490_vm5, 0.0, %v1804_v12  ;;  %vm7155_vm4 = vcmp.gt.f32.partialorder %v7154_v10, 0.5  ;;  %v7179_v10 = vld [vmem:[#allocation17_spill] sm:$0xff] }
 0x4f8   :  { %1889 = vrot.lane.b32.xlu1 %v5866_v48, %s4160_s2  ;;  %1891 = vrot.lane.b32.xlu0 %v5871_v63, %s4160_s2  ;;  %vm7149_vm2 = vcmp.gt.f32.partialorder %v7148_v34, 0.5  ;;  %v5907_v36 = vsel %vm7157_vm6, %v1843_v25, %v4887_v31  ;;  %v7160_v31 = vld [vmem:[#allocation32_spill] sm:$0xff]  ;;  %v7170_v34 = vld [vmem:[#allocation14_spill] sm:$0xff]  ;;  %v7174_v25 = vld [vmem:[#allocation37_spill] sm:$0xff] }
 0x4f9   :  { %v1798_v41 = vpop.permute.xlu1 %1797  ;;  %vm7161_vm7 = vcmp.gt.f32.partialorder %v7160_v31, 0.5  ;;  %v7164_v12 = vld [vmem:[#allocation12_spill] sm:$0xff]  ;;  %vm7175_vm3 = vcmp.gt.f32.partialorder %v7174_v25, 0.5 }
 0x4fa   :  { %v1840_v4 = vsel %vm490_vm5, 0.0, %v1798_v41  ;;  %v1808_v30 = vpop.permute.xlu0 %1807 }
 0x4fb   :  { %v5882_v15 = vsel %vm7149_vm2, %v1840_v4, %v4877_v11  ;;  %v1845_v62 = vsel %vm490_vm5, 0.0, %v1808_v30 }
 0x4fc   :  { %1893 = vrot.lane.b32.xlu1 %v5882_v15, %s4160_s2  ;;  %1895 = vrot.lane.b32.xlu0 %v5887_v28, %s4160_s2  ;;  %v5927_v47 = vsel %vm7163_vm8, %v1845_v62, %v4891_v8  ;;  %v7166_v8 = vld [vmem:[#allocation34_spill] sm:$0xff]  ;;  %v7182_v62 = vld [vmem:[#allocation20_spill] sm:$0xff] }
 0x4fd   :  { %v1802_v52 = vpop.permute.xlu1 %1801  ;;  %3718 = vmatmul.mubr.msk.f32.vlgmr.msra.gmra.mrb[36].mxu1 %vm56_vm0, %v7152_v35  ;;  %vm7167_vm9 = vcmp.gt.f32.partialorder %v7166_v8, 0.5 }
 0x4fe   :  { %v1842_v3 = vsel %vm490_vm5, 0.0, %v1802_v52  ;;  %v1812_v11 = vpop.permute.xlu0 %1811  ;;  %3720 = vmatprep.mubr.msk.f32.mxu1 %vm56_vm0, %v7153_v44 }
 0x4ff   :  { %v5902_v59 = vsel %vm7155_vm4, %v1842_v3, %v4881_v20  ;;  %v7159_v20 = vld [vmem:[#allocation11_spill] sm:$0xff]  ;;  %v1847_v45 = vsel %vm490_vm5, 0.0, %v1812_v11  ;;  %v7176_v11 = vld [vmem:[#allocation16_spill] sm:$0xff] }
 0x500   :  { %1897 = vrot.lane.b32.xlu1 %v5902_v59, %s4160_s2  ;;  %1899 = vrot.lane.b32.xlu0 %v5907_v36, %s4160_s2  ;;  %v5947_v43 = vsel %vm7169_vm1, %v1847_v45, %v4895_v24  ;;  %v7172_v24 = vld [vmem:[#allocation36_spill] sm:$0xff] }
 0x501   :  { %v1806_v56 = vpop.permute.xlu1 %1805  ;;  %3721 = vmatmul.mubr.msk.f32.gmra.mrb[38].mxu1 %vm56_vm0, %v7158_v26  ;;  %vm7173_vm2 = vcmp.gt.f32.partialorder %v7172_v24, 0.5 }
 0x502   :  { %v1844_v38 = vsel %vm490_vm5, 0.0, %v1806_v56  ;;  %3723 = vmatprep.mubr.msk.f32.mxu1 %vm56_vm0, %v7159_v20  ;;  %v1816_v39 = vpop.permute.xlu0 %1815  ;;  %v7183_v56 = vld [vmem:[#allocation21_spill] sm:$0xff]  ;;  %v7186_v20 = vld [vmem:[#allocation40_spill] sm:$0xff] }
 0x503   :  { %v5922_v14 = vsel %vm7161_vm7, %v1844_v38, %v4885_v9  ;;  %v7165_v9 = vld [vmem:[#allocation13_spill] sm:$0xff]  ;;  %v1849_v41 = vsel %vm490_vm5, 0.0, %v1816_v39  ;;  %vm7187_vm6 = vcmp.gt.f32.partialorder %v7186_v20, 0.5 }
 0x504   :  { %1901 = vrot.lane.b32.xlu1 %v5922_v14, %s4160_s2  ;;  %1903 = vrot.lane.b32.xlu0 %v5927_v47, %s4160_s2  ;;  %v5967_v52 = vsel %vm7175_vm3, %v1849_v41, %v4899_v6  ;;  %v7180_v6 = vld [vmem:[#allocation18_spill] sm:$0xff] }
 0x505   :  { %v1810_v32 = vpop.permute.xlu1 %1809  ;;  %3724 = vmatmul.mubr.msk.f32.gmra.mrb[40].mxu1 %vm56_vm0, %v7164_v12 }
 0x506   :  { %v1846_v50 = vsel %vm490_vm5, 0.0, %v1810_v32  ;;  %3726 = vmatprep.mubr.msk.f32.mxu1 %vm56_vm0, %v7165_v9  ;;  %v7192_v9 = vld [vmem:[#allocation42_spill] sm:$0xff] }
 0x507   :  { %v5942_v61 = vsel %vm7167_vm9, %v1846_v50, %v4889_v27  ;;  %v7171_v27 = vld [vmem:[#allocation15_spill] sm:$0xff]  ;;  %v7190_v50 = vld [vmem:[#allocation41_spill] sm:$0xff]  ;;  %vm7193_vm1 = vcmp.gt.f32.partialorder %v7192_v9, 0.5 }
 0x508   :  { %1905 = vrot.lane.b32.xlu1 %v5942_v61, %s4160_s2  ;;  %1907 = vrot.lane.b32.xlu0 %v5947_v43, %s4160_s2  ;;  %vm7191_vm9 = vcmp.gt.f32.partialorder %v7190_v50, 0.5 }
 0x509   :  { %v1814_v4 = vpop.permute.xlu1 %1813  ;;  %3727 = vmatmul.mubr.msk.f32.gmra.mrb[42].mxu1 %vm56_vm0, %v7170_v34 }
 0x50a   :  { %v1848_v30 = vsel %vm490_vm5, 0.0, %v1814_v4  ;;  %3729 = vmatprep.mubr.msk.f32.mxu1 %vm56_vm0, %v7171_v27 }
 0x50b   :  { %v5962_v33 = vsel %vm7173_vm2, %v1848_v30, %v4893_v7  ;;  %v7177_v7 = vld [vmem:[#allocation38_spill] sm:$0xff] }
 0x50c   :  { %1909 = vrot.lane.b32.xlu1 %v5962_v33, %s4160_s2  ;;  %1911 = vrot.lane.b32.xlu0 %v5967_v52, %s4160_s2  ;;  %vm7178_vm4 = vcmp.gt.f32.partialorder %v7177_v7, 0.5 }
 0x50d   :  { %v1818_v3 = vpop.permute.xlu1 %1817  ;;  %3730 = vmatmul.mubr.msk.f32.gmra.mrb[44].mxu1 %vm56_vm0, %v7176_v11 }
 0x50e   :  { %v1850_v35 = vsel %vm490_vm5, 0.0, %v1818_v3  ;;  %3732 = vmatprep.mubr.msk.f32.mxu1 %vm56_vm0, %v7179_v10  ;;  %vm7185_vm5 = vcmask 15360  }
 0x50f   :  { %v5979_v44 = vsel %vm7178_vm4, %v1850_v35, %v7138_v55  ;;  %v7184_v55 = vld [vmem:[#allocation22_spill] sm:$0xff]  ;;  %vm7188_vm7 = vmmov %vm7185_vm5 }
 0x510   :  { %1913 = vrot.lane.b32.xlu1 %v5979_v44, %s4160_s2  ;;  %vm7189_vm8 = vmmov %vm7185_vm5 }
 0x511   :  { %3733 = vmatmul.mubr.msk.f32.gmra.mrb[46].mxu1 %vm56_vm0, %v7180_v6  ;;  %vm7194_vm2 = vmmov %vm7185_vm5 }
 0x512   :  { %3735 = vmatprep.mubr.msk.f32.mxu1 %vm56_vm0, %v7181_v23  ;;  %vm7195_vm3 = vmmov %vm7194_vm2 }
 0x515   :  { %3736 = vmatmul.mubr.msk.f32.gmra.mrb[48].mxu1 %vm56_vm0, %v7182_v62 }
 0x516   :  { %3738 = vmatprep.mubr.msk.f32.mxu1 %vm56_vm0, %v7183_v56 }
 0x519   :  { %3739 = vmatmul.mubr.msk.f32.gmra.mrb[50].mxu1 %vm56_vm0, %v7184_v55 }
 0x562   :  { %v1884_v38 = vpop.permute.xlu0 %1883 }
 0x563   :  { %v1931_v26 = vsel %vm7185_vm5, 0.0, %v1884_v38 }
 0x564   :  { %v5999_v31 = vsel %vm7187_vm6, %v1931_v26, %v5829_v51  ;;  %vm7200_vm6 = vmmov %vm7194_vm2 }
 0x565   :  { %1979 = vrot.lane.b32.xlu0 %v5999_v31, %s4161_s27 }
 0x566   :  { %v1886_v18 = vpop.permute.xlu1 %1885  ;;  %v1888_v45 = vpop.permute.xlu0 %1887 }
 0x567   :  { %v1932_v39 = vsel %vm7188_vm7, 0.0, %v1886_v18  ;;  %v1933_v32 = vsel %vm7189_vm8, 0.0, %v1888_v45  ;;  %vm7201_vm7 = vmmov %vm7194_vm2 }
 0x568   :  { %v6008_v12 = vsel %vm7191_vm9, %v1932_v39, %v5844_v13  ;;  %v6013_v8 = vsel %vm7193_vm1, %v1933_v32, %v5849_v21  ;;  %v7196_v13 = vld [vmem:[#allocation43_spill] sm:$0xff]  ;;  %v7198_v21 = vld [vmem:[#allocation44_spill] sm:$0xff]  ;;  %vm7206_vm1 = vmmov %vm7194_vm2 }
 0x569   :  { %1981 = vrot.lane.b32.xlu1 %v6008_v12, %s4161_s27  ;;  %1983 = vrot.lane.b32.xlu0 %v6013_v8, %s4161_s27  ;;  %vm7197_vm4 = vcmp.gt.f32.partialorder %v7196_v13, 0.5  ;;  %vm7199_vm5 = vcmp.gt.f32.partialorder %v7198_v21, 0.5 }
 0x56a   :  { %v1890_v51 = vpop.permute.xlu1 %1889  ;;  %v1892_v60 = vpop.permute.xlu0 %1891 }
 0x56b   :  { %v1934_v41 = vsel %vm7194_vm2, 0.0, %v1890_v51  ;;  %v1935_v4 = vsel %vm7195_vm3, 0.0, %v1892_v60  ;;  %vm7207_vm2 = vmmov %vm7206_vm1 }
 0x56c   :  { %v6024_v30 = vsel %vm7197_vm4, %v1934_v41, %v5866_v48  ;;  %v6029_v34 = vsel %vm7199_vm5, %v1935_v4, %v5871_v63  ;;  %v7202_v48 = vld [vmem:[#allocation45_spill] sm:$0xff]  ;;  %v7204_v63 = vld [vmem:[#allocation46_spill] sm:$0xff]  ;;  %vm7212_vm5 = vmmov %vm7206_vm1 }
 0x56d   :  { %1985 = vrot.lane.b32.xlu1 %v6024_v30, %s4161_s27  ;;  %1987 = vrot.lane.b32.xlu0 %v6029_v34, %s4161_s27  ;;  %vm7203_vm8 = vcmp.gt.f32.partialorder %v7202_v48, 0.5  ;;  %vm7205_vm9 = vcmp.gt.f32.partialorder %v7204_v63, 0.5  ;;  %v7230_v48 = vld [vmem:[#allocation55_spill] sm:$0xff] }
 0x56e   :  { %v1894_v27 = vpop.permute.xlu1 %1893  ;;  %v1896_v24 = vpop.permute.xlu0 %1895 }
 0x56f   :  { %v1936_v25 = vsel %vm7200_vm6, 0.0, %v1894_v27  ;;  %v1937_v3 = vsel %vm7201_vm7, 0.0, %v1896_v24  ;;  %vm7213_vm6 = vmmov %vm7206_vm1 }
 0x570   :  { %v6040_v35 = vsel %vm7203_vm8, %v1936_v25, %v5882_v15  ;;  %v6045_v11 = vsel %vm7205_vm9, %v1937_v3, %v5887_v28  ;;  %v7208_v15 = vld [vmem:[#allocation47_spill] sm:$0xff]  ;;  %v7210_v28 = vld [vmem:[#allocation48_spill] sm:$0xff]  ;;  %vm7218_vm9 = vmmov %vm7206_vm1 }
 0x571   :  { %1989 = vrot.lane.b32.xlu1 %v6040_v35, %s4161_s27  ;;  %1991 = vrot.lane.b32.xlu0 %v6045_v11, %s4161_s27  ;;  %vm7209_vm3 = vcmp.gt.f32.partialorder %v7208_v15, 0.5  ;;  %vm7211_vm4 = vcmp.gt.f32.partialorder %v7210_v28, 0.5  ;;  %v6138_v15 = vld [vmem:[%s6895_s3 + $0x18] sm:$0xff] }
 0x572   :  { %v1898_v7 = vpop.permute.xlu1 %1897  ;;  %v1900_v10 = vpop.permute.xlu0 %1899  ;;  %7233 = vst [vmem:[#allocation5_spill] sm:$0xff] %v6138_v15 }
 0x573   :  { %v1938_v6 = vsel %vm7206_vm1, 0.0, %v1898_v7  ;;  %v1939_v23 = vsel %vm7207_vm2, 0.0, %v1900_v10  ;;  %v6126_v7 = vld [vmem:[%s6895_s3 + $0x8] sm:$0xff] }
 0x574   :  { %v6056_v62 = vsel %vm7209_vm3, %v1938_v6, %v5902_v59  ;;  %v6061_v56 = vsel %vm7211_vm4, %v1939_v23, %v5907_v36  ;;  %v7214_v59 = vld [vmem:[#allocation49_spill] sm:$0xff]  ;;  %v7216_v36 = vld [vmem:[#allocation50_spill] sm:$0xff]  ;;  %vm7223_vm4 = vmmov %vm7206_vm1 }
 0x575   :  { %1993 = vrot.lane.b32.xlu1 %v6056_v62, %s4161_s27  ;;  %1995 = vrot.lane.b32.xlu0 %v6061_v56, %s4161_s27  ;;  %vm7215_vm7 = vcmp.gt.f32.partialorder %v7214_v59, 0.5  ;;  %vm7217_vm8 = vcmp.gt.f32.partialorder %v7216_v36, 0.5  ;;  %v6132_v6 = vld [vmem:[%s6895_s3] sm:$0xff] }
 0x576   :  { %v1902_v55 = vpop.permute.xlu1 %1901  ;;  %v1904_v38 = vpop.permute.xlu0 %1903  ;;  %7232 = vst [vmem:[#allocation39_spill] sm:$0xff] %v6132_v6 }
 0x577   :  { %v1940_v26 = vsel %vm7212_vm5, 0.0, %v1902_v55  ;;  %v1941_v20 = vsel %vm7213_vm6, 0.0, %v1904_v38  ;;  %vm7224_vm5 = vmmov %vm7206_vm1  ;;  %v6144_v38 = vld [vmem:[%s6895_s3 + $0x10] sm:$0xff] }
 0x578   :  { %v6072_v18 = vsel %vm7215_vm7, %v1940_v26, %v5922_v14  ;;  %v6077_v45 = vsel %vm7217_vm8, %v1941_v20, %v5927_v47  ;;  %v7219_v14 = vld [vmem:[#allocation51_spill] sm:$0xff]  ;;  %v7221_v47 = vld [vmem:[#allocation52_spill] sm:$0xff]  ;;  %vm7229_vm8 = vmmov %vm7206_vm1  ;;  %7234 = vst [vmem:[#allocation23_spill] sm:$0xff] %v6144_v38 }
 0x579   :  { %1997 = vrot.lane.b32.xlu1 %v6072_v18, %s4161_s27  ;;  %1999 = vrot.lane.b32.xlu0 %v6077_v45, %s4161_s27  ;;  %vm7220_vm2 = vcmp.gt.f32.partialorder %v7219_v14, 0.5  ;;  %vm7222_vm3 = vcmp.gt.f32.partialorder %v7221_v47, 0.5  ;;  %v6154_v14 = vld [vmem:[%s6895_s3 + $0x28] sm:$0xff] }
 0x57a   :  { %v1906_v39 = vpop.permute.xlu1 %1905  ;;  %v1908_v32 = vpop.permute.xlu0 %1907  ;;  %7235 = vst [vmem:[#allocation6_spill] sm:$0xff] %v6154_v14 }
 0x57b   :  { %v1942_v50 = vsel %vm7218_vm9, 0.0, %v1906_v39  ;;  %v1943_v9 = vsel %vm7206_vm1, 0.0, %v1908_v32  ;;  %vm7231_vm9 = vcmp.gt.f32.partialorder %v7230_v48, 0.5  ;;  %v6168_v48 = vld [vmem:[%s6895_s3 + $0x38] sm:$0xff]  ;;  %vm7247_vm1 = vcmask 31744  }
 0x57c   :  { %v6088_v51 = vsel %vm7220_vm2, %v1942_v50, %v5942_v61  ;;  %v6093_v60 = vsel %vm7222_vm3, %v1943_v9, %v5947_v43  ;;  %v7225_v61 = vld [vmem:[#allocation53_spill] sm:$0xff]  ;;  %v7227_v43 = vld [vmem:[#allocation54_spill] sm:$0xff]  ;;  %7237 = vst [vmem:[#allocation25_spill] sm:$0xff] %v6168_v48  ;;  %vm7250_vm3 = vmmov %vm7247_vm1 }
 0x57d   :  { %2001 = vrot.lane.b32.xlu1 %v6088_v51, %s4161_s27  ;;  %2003 = vrot.lane.b32.xlu0 %v6093_v60, %s4161_s27  ;;  %vm7226_vm6 = vcmp.gt.f32.partialorder %v7225_v61, 0.5  ;;  %vm7228_vm7 = vcmp.gt.f32.partialorder %v7227_v43, 0.5 }
 0x57e   :  { %v1910_v41 = vpop.permute.xlu1 %1909  ;;  %v1912_v4 = vpop.permute.xlu0 %1911 }
 0x57f   :  { %v1944_v13 = vsel %vm7223_vm4, 0.0, %v1910_v41  ;;  %v1945_v21 = vsel %vm7224_vm5, 0.0, %v1912_v4  ;;  %v6160_v4 = vld [vmem:[%s6895_s3 + $0x20] sm:$0xff]  ;;  %vm7251_vm4 = vmmov %vm7247_vm1 }
 0x580   :  { %v6104_v27 = vsel %vm7226_vm6, %v1944_v13, %v5962_v33  ;;  %v6109_v24 = vsel %vm7228_vm7, %v1945_v21, %v5967_v52  ;;  %7236 = vst [vmem:[#allocation24_spill] sm:$0xff] %v6160_v4  ;;  %vm7256_vm7 = vmmov %vm7247_vm1 }
 0x581   :  { %2005 = vrot.lane.b32.xlu1 %v6104_v27, %s4161_s27  ;;  %2007 = vrot.lane.b32.xlu0 %v6109_v24, %s4161_s27 }
 0x582   :  { %v1914_v25 = vpop.permute.xlu1 %1913 }
 0x583   :  { %v1946_v3 = vsel %vm7229_vm8, 0.0, %v1914_v25  ;;  %vm7257_vm8 = vmmov %vm7247_vm1 }
 0x584   :  { %v6119_v63 = vsel %vm7231_vm9, %v1946_v3, %v5979_v44 }
 0x585   :  { %2009 = vrot.lane.b32.xlu1 %v6119_v63, %s4161_s27 }
 0x5a2   :  { %v3655_v33 = vpop.f32.mrb[20].mxu1 }
 0x5a3   :  { %v1411_v52 = vpop.f32.mrb[21].mxu1  ;;  %v1491_v10 = vmul.f32 %v6126_v7, %v3655_v33 }
 0x5a4   :  { %v1490_v44 = vmul.f32 %v6132_v6, %v1411_v52 }
 0x5a5   :  { %v1521_v20 = vsel %vm56_vm0, %v1491_v10, 0.0  ;;  %v6174_v10 = vld [vmem:[%s6895_s3 + $0x30] sm:$0xff] }
 0x5a6   :  { %v1506_v36 = vsel %vm56_vm0, %v1490_v44, 0.0  ;;  %7238 = vst [vmem:[#allocation7_spill] sm:$0xff] %v6174_v10 }
 0x5ab   :  { %v3658_v23 = vpop.f32.mrb[22].mxu1 }
 0x5ac   :  { %v1493_v28 = vmul.f32 %v6138_v15, %v3658_v23  ;;  %v1421_v55 = vpop.f32.mrb[23].mxu1 }
 0x5ad   :  { %v1492_v26 = vmul.f32 %v6144_v38, %v1421_v55 }
 0x5ae   :  { %v1522_v59 = vsel %vm56_vm0, %v1493_v28, 0.0 }
 0x5af   :  { %v1523_v39 = vadd.f32 %v1522_v59, %v1521_v20  ;;  %v1507_v32 = vsel %vm56_vm0, %v1492_v26, 0.0  ;;  %v3661_v50 = vpop.f32.mrb[24].mxu1  ;;  %v6182_v59 = vld [vmem:[%s6895_s3 + $0x48] sm:$0xff] }
 0x5b0   :  { %v1508_v9 = vadd.f32 %v1507_v32, %v1506_v36  ;;  %v1495_v47 = vmul.f32 %v6154_v14, %v3661_v50  ;;  %v1431_v41 = vpop.f32.mrb[25].mxu1  ;;  %7239 = vst [vmem:[#allocation26_spill] sm:$0xff] %v6182_v59  ;;  %v6188_v32 = vld [vmem:[%s6895_s3 + $0x40] sm:$0xff] }
 0x5b1   :  { %v1494_v13 = vmul.f32 %v6160_v4, %v1431_v41  ;;  %7240 = vst [vmem:[#allocation27_spill] sm:$0xff] %v6188_v32 }
 0x5b2   :  { %v1524_v21 = vsel %vm56_vm0, %v1495_v47, 0.0 }
 0x5b3   :  { %v1525_v61 = vadd.f32 %v1524_v21, %v1523_v39  ;;  %v1509_v43 = vsel %vm56_vm0, %v1494_v13, 0.0  ;;  %v3664_v25 = vpop.f32.mrb[26].mxu1 }
 0x5b4   :  { %v1510_v3 = vadd.f32 %v1509_v43, %v1508_v9  ;;  %v1497_v33 = vmul.f32 %v6168_v48, %v3664_v25  ;;  %v1441_v52 = vpop.f32.mrb[27].mxu1 }
 0x5b5   :  { %v1496_v44 = vmul.f32 %v6174_v10, %v1441_v52 }
 0x5b6   :  { %v1526_v23 = vsel %vm56_vm0, %v1497_v33, 0.0 }
 0x5b7   :  { %v1527_v28 = vadd.f32 %v1526_v23, %v1525_v61  ;;  %v1511_v55 = vsel %vm56_vm0, %v1496_v44, 0.0  ;;  %v3667_v26 = vpop.f32.mrb[28].mxu1  ;;  %v6196_v61 = vld [vmem:[%s6895_s3 + $0x58] sm:$0xff] }
 0x5b8   :  { %v1512_v20 = vadd.f32 %v1511_v55, %v1510_v3  ;;  %v1499_v36 = vmul.f32 %v6182_v59, %v3667_v26  ;;  %v1451_v39 = vpop.f32.mrb[29].mxu1  ;;  %7241 = vst [vmem:[#allocation28_spill] sm:$0xff] %v6196_v61  ;;  %v6202_v3 = vld [vmem:[%s6895_s3 + $0x50] sm:$0xff]  ;;  %v6210_v26 = vld [vmem:[%s6895_s3 + $0x68] sm:$0xff] }
 0x5b9   :  { %v1498_v50 = vmul.f32 %v6188_v32, %v1451_v39  ;;  %7242 = vst [vmem:[#allocation29_spill] sm:$0xff] %v6202_v3  ;;  %7243 = vst [vmem:[#allocation8_spill] sm:$0xff] %v6210_v26  ;;  %v6216_v39 = vld [vmem:[%s6895_s3 + $0x60] sm:$0xff] }
 0x5ba   :  { %v1528_v9 = vsel %vm56_vm0, %v1499_v36, 0.0  ;;  %7244 = vst [vmem:[#allocation9_spill] sm:$0xff] %v6216_v39 }
 0x5bb   :  { %v1529_v47 = vadd.f32 %v1528_v9, %v1527_v28  ;;  %v1513_v41 = vsel %vm56_vm0, %v1498_v50, 0.0 }
 0x5bc   :  { %v1514_v13 = vadd.f32 %v1513_v41, %v1512_v20 }
 0x5c0   :  { %v3670_v21 = vpop.f32.mrb[30].mxu1 }
 0x5c1   :  { %v1501_v43 = vmul.f32 %v6196_v61, %v3670_v21  ;;  %v1461_v25 = vpop.f32.mrb[31].mxu1 }
 0x5c2   :  { %v1500_v33 = vmul.f32 %v6202_v3, %v1461_v25 }
 0x5c3   :  { %v1530_v52 = vsel %vm56_vm0, %v1501_v43, 0.0  ;;  %v6224_v43 = vld [vmem:[%s6895_s3 + $0x78] sm:$0xff] }
 0x5c4   :  { %v1531_v44 = vadd.f32 %v1530_v52, %v1529_v47  ;;  %v1515_v23 = vsel %vm56_vm0, %v1500_v33, 0.0  ;;  %v3673_v28 = vpop.f32.mrb[32].mxu1  ;;  %7245 = vst [vmem:[#allocation30_spill] sm:$0xff] %v6224_v43  ;;  %v6230_v52 = vld [vmem:[%s6895_s3 + $0x70] sm:$0xff] }
 0x5c5   :  { %v1516_v55 = vadd.f32 %v1515_v23, %v1514_v13  ;;  %v1503_v20 = vmul.f32 %v6210_v26, %v3673_v28  ;;  %v1471_v36 = vpop.f32.mrb[33].mxu1  ;;  %7246 = vst [vmem:[#allocation31_spill] sm:$0xff] %v6230_v52 }
 0x5c6   :  { %v1502_v50 = vmul.f32 %v6216_v39, %v1471_v36 }
 0x5c7   :  { %v1532_v9 = vsel %vm56_vm0, %v1503_v20, 0.0 }
 0x5c8   :  { %v1533_v47 = vadd.f32 %v1532_v9, %v1531_v44  ;;  %v1517_v41 = vsel %vm56_vm0, %v1502_v50, 0.0  ;;  %v3676_v13 = vpop.f32.mrb[34].mxu1 }
 0x5c9   :  { %v1518_v21 = vadd.f32 %v1517_v41, %v1516_v55  ;;  %v1505_v25 = vmul.f32 %v6224_v43, %v3676_v13  ;;  %v1481_v33 = vpop.f32.mrb[35].mxu1 }
 0x5ca   :  { %v1504_v23 = vmul.f32 %v6230_v52, %v1481_v33  ;;  %v7248_v33 = vld [vmem:[#allocation56_spill] sm:$0xff] }
 0x5cb   :  { %v1534_v44 = vsel %vm56_vm0, %v1505_v25, 0.0  ;;  %vm7249_vm2 = vcmp.gt.f32.partialorder %v7248_v33, 0.5 }
 0x5cc   :  { %v6234_v28 = vadd.f32 %v1534_v44, %v1533_v47  ;;  %v1519_v55 = vsel %vm56_vm0, %v1504_v23, 0.0 }
 0x5cd   :  { %v6237_v20 = vadd.f32 %v1519_v55, %v1518_v21 }
 0x5d0   :  { %v6239_v36 = vpop.f32.mrb[36].mxu1 }
 0x5d1   :  { %v6241_v50 = vpop.f32.mrb[37].mxu1 }
 0x5d4   :  { %v6243_v9 = vpop.f32.mrb[38].mxu1 }
 0x5d5   :  { %v6245_v41 = vpop.f32.mrb[39].mxu1 }
 0x5d7   :  { %v1980_v13 = vpop.permute.xlu0 %1979 }
 0x5d8   :  { %v2027_v43 = vsel %vm7247_vm1, 0.0, %v1980_v13  ;;  %v6253_v25 = vpop.f32.mrb[40].mxu1  ;;  %v7252_v13 = vld [vmem:[#allocation57_spill] sm:$0xff] }
 0x5d9   :  { %v6251_v47 = vsel %vm7249_vm2, %v2027_v43, %v5999_v31  ;;  %v6255_v21 = vpop.f32.mrb[41].mxu1  ;;  %vm7253_vm5 = vcmp.gt.f32.partialorder %v7252_v13, 0.5  ;;  %v7254_v31 = vld [vmem:[#allocation58_spill] sm:$0xff]  ;;  %v7258_v13 = vld [vmem:[#allocation59_spill] sm:$0xff]  ;;  %vm7262_vm2 = vmmov %vm7250_vm3 }
 0x5da   :  { %2075 = vrot.lane.b32.xlu0 %v6251_v47, %s4162_s16  ;;  %vm7255_vm6 = vcmp.gt.f32.partialorder %v7254_v31, 0.5  ;;  %vm7259_vm9 = vcmp.gt.f32.partialorder %v7258_v13, 0.5  ;;  %v7264_v13 = vld [vmem:[#allocation61_spill] sm:$0xff] }
 0x5db   :  { %v1982_v23 = vpop.permute.xlu1 %1981  ;;  %v1984_v44 = vpop.permute.xlu0 %1983 }
 0x5dc   :  { %v2028_v55 = vsel %vm7250_vm3, 0.0, %v1982_v23  ;;  %v2029_v52 = vsel %vm7251_vm4, 0.0, %v1984_v44  ;;  %v6271_v33 = vpop.f32.mrb[42].mxu1  ;;  %vm7263_vm3 = vmmov %vm7262_vm2  ;;  %vm7265_vm4 = vcmp.gt.f32.partialorder %v7264_v13, 0.5  ;;  %v7270_v13 = vld [vmem:[#allocation63_spill] sm:$0xff] }
 0x5dd   :  { %v6264_v39 = vsel %vm7253_vm5, %v2028_v55, %v6008_v12  ;;  %v6269_v43 = vsel %vm7255_vm6, %v2029_v52, %v6013_v8  ;;  %v6273_v26 = vpop.f32.mrb[43].mxu1  ;;  %v7260_v52 = vld [vmem:[#allocation60_spill] sm:$0xff]  ;;  %vm7268_vm6 = vmmov %vm7262_vm2 }
 0x5de   :  { %2077 = vrot.lane.b32.xlu1 %v6264_v39, %s4162_s16  ;;  %2079 = vrot.lane.b32.xlu0 %v6269_v43, %s4162_s16  ;;  %vm7261_vm1 = vcmp.gt.f32.partialorder %v7260_v52, 0.5 }
 0x5df   :  { %v1986_v23 = vpop.permute.xlu1 %1985  ;;  %v1988_v44 = vpop.permute.xlu0 %1987 }
 0x5e0   :  { %v2030_v12 = vsel %vm7256_vm7, 0.0, %v1986_v23  ;;  %v2031_v55 = vsel %vm7257_vm8, 0.0, %v1988_v44  ;;  %v6291_v3 = vpop.f32.mrb[44].mxu1  ;;  %vm7269_vm7 = vmmov %vm7262_vm2  ;;  %vm7271_vm8 = vcmp.gt.f32.partialorder %v7270_v13, 0.5  ;;  %v7276_v13 = vld [vmem:[#allocation65_spill] sm:$0xff] }
 0x5e1   :  { %v6284_v8 = vsel %vm7259_vm9, %v2030_v12, %v6024_v30  ;;  %v6289_v31 = vsel %vm7261_vm1, %v2031_v55, %v6029_v34  ;;  %v6293_v61 = vpop.f32.mrb[45].mxu1  ;;  %v7266_v55 = vld [vmem:[#allocation62_spill] sm:$0xff]  ;;  %vm7274_vm1 = vmmov %vm7262_vm2 }
 0x5e2   :  { %2081 = vrot.lane.b32.xlu1 %v6284_v8, %s4162_s16  ;;  %2083 = vrot.lane.b32.xlu0 %v6289_v31, %s4162_s16  ;;  %vm7267_vm5 = vcmp.gt.f32.partialorder %v7266_v55, 0.5 }
 0x5e3   :  { %v1990_v23 = vpop.permute.xlu1 %1989  ;;  %v1992_v44 = vpop.permute.xlu0 %1991 }
 0x5e4   :  { %v2032_v30 = vsel %vm7262_vm2, 0.0, %v1990_v23  ;;  %v2033_v12 = vsel %vm7263_vm3, 0.0, %v1992_v44  ;;  %v6311_v32 = vpop.f32.mrb[46].mxu1  ;;  %vm7275_vm2 = vmmov %vm7274_vm1  ;;  %vm7277_vm3 = vcmp.gt.f32.partialorder %v7276_v13, 0.5  ;;  %v7282_v13 = vld [vmem:[#allocation67_spill] sm:$0xff] }
 0x5e5   :  { %v6304_v34 = vsel %vm7265_vm4, %v2032_v30, %v6040_v35  ;;  %v6309_v52 = vsel %vm7267_vm5, %v2033_v12, %v6045_v11  ;;  %v6313_v59 = vpop.f32.mrb[47].mxu1  ;;  %v7272_v12 = vld [vmem:[#allocation64_spill] sm:$0xff]  ;;  %vm7280_vm5 = vmmov %vm7274_vm1 }
 0x5e6   :  { %2085 = vrot.lane.b32.xlu1 %v6304_v34, %s4162_s16  ;;  %2087 = vrot.lane.b32.xlu0 %v6309_v52, %s4162_s16  ;;  %vm7273_vm9 = vcmp.gt.f32.partialorder %v7272_v12, 0.5 }
 0x5e7   :  { %v1994_v23 = vpop.permute.xlu1 %1993  ;;  %v1996_v44 = vpop.permute.xlu0 %1995 }
 0x5e8   :  { %v2034_v35 = vsel %vm7268_vm6, 0.0, %v1994_v23  ;;  %v2035_v30 = vsel %vm7269_vm7, 0.0, %v1996_v44  ;;  %v6331_v10 = vpop.f32.mrb[48].mxu1  ;;  %vm7281_vm6 = vmmov %vm7274_vm1  ;;  %vm7283_vm7 = vcmp.gt.f32.partialorder %v7282_v13, 0.5 }
 0x5e9   :  { %v6324_v11 = vsel %vm7271_vm8, %v2034_v35, %v6056_v62  ;;  %v6329_v55 = vsel %vm7273_vm9, %v2035_v30, %v6061_v56  ;;  %v6333_v48 = vpop.f32.mrb[49].mxu1  ;;  %v7278_v30 = vld [vmem:[#allocation66_spill] sm:$0xff]  ;;  %vm7286_vm9 = vmmov %vm7274_vm1 }
 0x5ea   :  { %2089 = vrot.lane.b32.xlu1 %v6324_v11, %s4162_s16  ;;  %2091 = vrot.lane.b32.xlu0 %v6329_v55, %s4162_s16  ;;  %vm7279_vm4 = vcmp.gt.f32.partialorder %v7278_v30, 0.5 }
 0x5eb   :  { %v1998_v23 = vpop.permute.xlu1 %1997  ;;  %v2000_v44 = vpop.permute.xlu0 %1999 }
 0x5ec   :  { %v2036_v62 = vsel %vm7274_vm1, 0.0, %v1998_v23  ;;  %v2037_v35 = vsel %vm7275_vm2, 0.0, %v2000_v44  ;;  %v6351_v4 = vpop.f32.mrb[50].mxu1 }
 0x5ed   :  { %v6344_v56 = vsel %vm7277_vm3, %v2036_v62, %v6072_v18  ;;  %v6349_v12 = vsel %vm7279_vm4, %v2037_v35, %v6077_v45  ;;  %v6353_v14 = vpop.f32.mrb[51].mxu1  ;;  %v7284_v35 = vld [vmem:[#allocation68_spill] sm:$0xff]  ;;  %vm7291_vm4 = vmmov %vm7274_vm1 }
 0x5ee   :  { %2093 = vrot.lane.b32.xlu1 %v6344_v56, %s4162_s16  ;;  %2095 = vrot.lane.b32.xlu0 %v6349_v12, %s4162_s16  ;;  %vm7285_vm8 = vcmp.gt.f32.partialorder %v7284_v35, 0.5  ;;  %v7292_v35 = vld [vmem:[#allocation71_spill] sm:$0xff] }
 0x5ef   :  { %v2002_v23 = vpop.permute.xlu1 %2001  ;;  %v2004_v44 = vpop.permute.xlu0 %2003 }
 0x5f0   :  { %v2038_v18 = vsel %vm7280_vm5, 0.0, %v2002_v23  ;;  %v2039_v62 = vsel %vm7281_vm6, 0.0, %v2004_v44  ;;  %vm7293_vm5 = vcmp.gt.f32.partialorder %v7292_v35, 0.5 }
 0x5f1   :  { %v6364_v45 = vsel %vm7283_vm7, %v2038_v18, %v6088_v51  ;;  %v6369_v30 = vsel %vm7285_vm8, %v2039_v62, %v6093_v60  ;;  %v7287_v51 = vld [vmem:[#allocation69_spill] sm:$0xff]  ;;  %v7289_v60 = vld [vmem:[#allocation70_spill] sm:$0xff]  ;;  %vm7296_vm7 = vcmp.gt.f32.partialorder %v5358_v19, 0.5 }
 0x5f2   :  { %2097 = vrot.lane.b32.xlu1 %v6364_v45, %s4162_s16  ;;  %2099 = vrot.lane.b32.xlu0 %v6369_v30, %s4162_s16  ;;  %vm7288_vm2 = vcmp.gt.f32.partialorder %v7287_v51, 0.5  ;;  %vm7290_vm3 = vcmp.gt.f32.partialorder %v7289_v60, 0.5  ;;  %v4113_v19 = vld [vmem:[%s6896_s4 + $0x8] sm:$0xff] }
 0x5f3   :  { %v2006_v38 = vpop.permute.xlu1 %2005  ;;  %v2008_v23 = vpop.permute.xlu0 %2007 }
 0x5f4   :  { %v2040_v44 = vsel %vm7286_vm9, 0.0, %v2006_v38  ;;  %v2041_v15 = vsel %vm7274_vm1, 0.0, %v2008_v23  ;;  %vm7299_vm9 = vcmp.gt.f32.partialorder %v5376_v0, 0.5 }
 0x5f5   :  { %v6380_v18 = vsel %vm7288_vm2, %v2040_v44, %v6104_v27  ;;  %v6385_v62 = vsel %vm7290_vm3, %v2041_v15, %v6109_v24  ;;  %v7294_v15 = vld [vmem:[#allocation72_spill] sm:$0xff]  ;;  %vm7302_vm2 = vcmp.gt.f32.partialorder %v5406_v16, 0.5 }
 0x5f6   :  { %2101 = vrot.lane.b32.xlu1 %v6380_v18, %s4162_s16  ;;  %2103 = vrot.lane.b32.xlu0 %v6385_v62, %s4162_s16  ;;  %vm7295_vm6 = vcmp.gt.f32.partialorder %v7294_v15, 0.5 }
 0x5f7   :  { %v2010_v13 = vpop.permute.xlu1 %2009 }
 0x5f8   :  { %v2042_v38 = vsel %vm7291_vm4, 0.0, %v2010_v13  ;;  %vm7305_vm4 = vcmp.gt.f32.partialorder %v5420_v54, 0.5 }
 0x5f9   :  { %v6395_v23 = vsel %vm7293_vm5, %v2042_v38, %v6119_v63  ;;  %v4112_v63 = vld [vmem:[%s6896_s4] sm:$0xff]  ;;  %vm7306_vm5 = vcmp.gt.f32.partialorder %v5444_v57, 0.5 }
 0x5fa   :  { %2105 = vrot.lane.b32.xlu1 %v6395_v23, %s4162_s16  ;;  %v4119_v57 = vld [vmem:[%s6896_s4 + $0x40] sm:$0xff] }
 0x64c   :  { %v2076_v27 = vpop.permute.xlu0 %2075 }
 0x64d   :  { %v2123_v24 = vsel %vm879_vm11, 0.0, %v2076_v27 }
 0x64e   :  { %v2139_v44 = vsel %vm7295_vm6, %v2123_v24, %v6251_v47  ;;  %v7297_v47 = vld [vmem:[#allocation73_spill] sm:$0xff]  ;;  %vm7307_vm6 = vcmp.gt.f32.partialorder %v5466_v22, 0.5 }
 0x64f   :  { %v2230_v51 = vadd.f32 %v6241_v50, %v2139_v44  ;;  %vm7298_vm8 = vcmp.gt.f32.partialorder %v7297_v47, 0.5 }
 0x650   :  { %v2078_v60 = vpop.permute.xlu1 %2077  ;;  %v2080_v6 = vpop.permute.xlu0 %2079 }
 0x651   :  { %v2124_v13 = vsel %vm879_vm11, 0.0, %v2078_v60  ;;  %v2125_v35 = vsel %vm879_vm11, 0.0, %v2080_v6  ;;  %v6409_v38 = vadd.f32 %v4112_v63, %v2230_v51 }
 0x652   :  { %v2140_v27 = vsel %vm7296_vm7, %v2124_v13, %v6264_v39  ;;  %v2141_v50 = vsel %vm7298_vm8, %v2125_v35, %v6269_v43  ;;  %v7300_v13 = vld [vmem:[#allocation74_spill] sm:$0xff]  ;;  %vm7308_vm7 = vcmp.gt.f32.partialorder %v5481_v53, 0.5  ;;  %v4121_v53 = vld [vmem:[%s6896_s4 + $0x50] sm:$0xff]  ;;  %vm7309_vm8 = vcmp.gt.f32.partialorder %v5517_v17, 0.5  ;;  %v4123_v17 = vld [vmem:[%s6896_s4 + $0x60] sm:$0xff] }
 0x653   :  { %v2235_v24 = vadd.f32 %v6239_v36, %v2140_v27  ;;  %v2240_v15 = vadd.f32 %v6245_v41, %v2141_v50  ;;  %v2324_v6 = vsel %vm1117_vm12, %v6409_v38, -inf  ;;  %v4114_v36 = vld [vmem:[%s6896_s4 + $0x10] sm:$0xff]  ;;  %vm7301_vm1 = vcmp.gt.f32.partialorder %v7300_v13, 0.5 }
 0x654   :  { %v2082_v44 = vpop.permute.xlu1 %2081  ;;  %v2084_v60 = vpop.permute.xlu0 %2083  ;;  %2325 = vmax.xlane.f32.xlu0 %v2324_v6 }
 0x655   :  { %v2126_v51 = vsel %vm879_vm11, 0.0, %v2082_v44  ;;  %v2127_v63 = vsel %vm879_vm11, 0.0, %v2084_v60  ;;  %v6426_v39 = vadd.f32 %v4113_v19, %v2235_v24  ;;  %v6431_v41 = vadd.f32 %v4114_v36, %v2240_v15 }
 0x656   :  { %v2142_v43 = vsel %vm7299_vm9, %v2126_v51, %v6284_v8  ;;  %v2143_v35 = vsel %vm7301_vm1, %v2127_v63, %v6289_v31  ;;  %v7303_v51 = vld [vmem:[#allocation75_spill] sm:$0xff] }
 0x657   :  { %v2245_v27 = vadd.f32 %v6243_v9, %v2142_v43  ;;  %v2250_v47 = vadd.f32 %v6255_v21, %v2143_v35  ;;  %v2327_v50 = vsel %vm1117_vm12, %v6426_v39, -inf  ;;  %v2330_v24 = vsel %vm1117_vm12, %v6431_v41, -inf  ;;  %v4115_v9 = vld [vmem:[%s6896_s4 + $0x20] sm:$0xff]  ;;  %v4116_v21 = vld [vmem:[%s6896_s4 + $0x18] sm:$0xff] }
 0x658   :  { %v2086_v15 = vpop.permute.xlu1 %2085  ;;  %v2088_v6 = vpop.permute.xlu0 %2087  ;;  %2328 = vmax.xlane.f32.xlu1 %v2327_v50  ;;  %2331 = vmax.xlane.f32.xlu0 %v2330_v24  ;;  %vm7304_vm3 = vcmp.gt.f32.partialorder %v7303_v51, 0.5 }
 0x659   :  { %v2128_v0 = vsel %vm879_vm11, 0.0, %v2086_v15  ;;  %v2129_v8 = vsel %vm879_vm11, 0.0, %v2088_v6  ;;  %v6450_v31 = vadd.f32 %v4115_v9, %v2250_v47  ;;  %v6455_v44 = vadd.f32 %v4116_v21, %v2245_v27 }
 0x65a   :  { %v2144_v60 = vsel %vm7302_vm2, %v2128_v0, %v6304_v34  ;;  %v2145_v63 = vsel %vm7304_vm3, %v2129_v8, %v6309_v52 }
 0x65b   :  { %v2255_v19 = vadd.f32 %v6253_v25, %v2144_v60  ;;  %v2260_v36 = vadd.f32 %v6273_v26, %v2145_v63  ;;  %v2336_v43 = vsel %vm1117_vm12, %v6450_v31, -inf  ;;  %v2333_v13 = vsel %vm1117_vm12, %v6455_v44, -inf  ;;  %v4117_v25 = vld [vmem:[%s6896_s4 + $0x30] sm:$0xff]  ;;  %v4118_v26 = vld [vmem:[%s6896_s4 + $0x28] sm:$0xff] }
 0x65c   :  { %v2090_v35 = vpop.permute.xlu1 %2089  ;;  %v2092_v27 = vpop.permute.xlu0 %2091  ;;  %2337 = vmax.xlane.f32.xlu1 %v2336_v43  ;;  %2334 = vmax.xlane.f32.xlu0 %v2333_v13 }
 0x65d   :  { %v2130_v16 = vsel %vm879_vm11, 0.0, %v2090_v35  ;;  %v2131_v34 = vsel %vm879_vm11, 0.0, %v2092_v27  ;;  %v6474_v52 = vadd.f32 %v4117_v25, %v2260_v36  ;;  %v6479_v47 = vadd.f32 %v4118_v26, %v2255_v19 }
 0x65e   :  { %v2146_v50 = vsel %vm7305_vm4, %v2130_v16, %v6324_v11  ;;  %v2147_v24 = vsel %vm7306_vm5, %v2131_v34, %v6329_v55 }
 0x65f   :  { %v2265_v15 = vadd.f32 %v6271_v33, %v2146_v50  ;;  %v2270_v6 = vadd.f32 %v6293_v61, %v2147_v24  ;;  %v2342_v0 = vsel %vm1117_vm12, %v6474_v52, -inf  ;;  %v2339_v8 = vsel %vm1117_vm12, %v6479_v47, -inf  ;;  %v4120_v61 = vld [vmem:[%s6896_s4 + $0x38] sm:$0xff] }
 0x660   :  { %v2094_v9 = vpop.permute.xlu1 %2093  ;;  %v2096_v21 = vpop.permute.xlu0 %2095  ;;  %2343 = vmax.xlane.f32.xlu1 %v2342_v0  ;;  %2340 = vmax.xlane.f32.xlu0 %v2339_v8 }
 0x661   :  { %v2132_v54 = vsel %vm879_vm11, 0.0, %v2094_v9  ;;  %v2133_v11 = vsel %vm879_vm11, 0.0, %v2096_v21  ;;  %v6498_v33 = vadd.f32 %v4119_v57, %v2270_v6  ;;  %v6503_v55 = vadd.f32 %v4120_v61, %v2265_v15 }
 0x662   :  { %v2148_v60 = vsel %vm7307_vm6, %v2132_v54, %v6344_v56  ;;  %v2149_v51 = vsel %vm7308_vm7, %v2133_v11, %v6349_v12 }
 0x663   :  { %v2275_v63 = vadd.f32 %v6291_v3, %v2148_v60  ;;  %v2280_v19 = vadd.f32 %v6313_v59, %v2149_v51  ;;  %v2348_v36 = vsel %vm1117_vm12, %v6498_v33, -inf  ;;  %v2345_v43 = vsel %vm1117_vm12, %v6503_v55, -inf  ;;  %v4122_v59 = vld [vmem:[%s6896_s4 + $0x48] sm:$0xff]  ;;  %v4127_v51 = vld [vmem:[%s6896_s4 + $0x78] sm:$0xff] }
 0x664   :  { %v2098_v13 = vpop.permute.xlu1 %2097  ;;  %v2100_v35 = vpop.permute.xlu0 %2099  ;;  %2349 = vmax.xlane.f32.xlu1 %v2348_v36  ;;  %2346 = vmax.xlane.f32.xlu0 %v2345_v43 }
 0x665   :  { %v2134_v22 = vsel %vm879_vm11, 0.0, %v2098_v13  ;;  %v2135_v56 = vsel %vm879_vm11, 0.0, %v2100_v35  ;;  %v6522_v3 = vadd.f32 %v4121_v53, %v2280_v19  ;;  %v6527_v12 = vadd.f32 %v4122_v59, %v2275_v63 }
 0x666   :  { %v2150_v27 = vsel %vm924_vm13, %v2134_v22, %v6364_v45  ;;  %v2151_v16 = vsel %vm7309_vm8, %v2135_v56, %v6369_v30  ;;  %vm7310_vm13 = vcmp.gt.f32.partialorder %v5553_v5, 0.5  ;;  %v4125_v5 = vld [vmem:[%s6896_s4 + $0x70] sm:$0xff] }
 0x667   :  { %v2285_v34 = vadd.f32 %v6311_v32, %v2150_v27  ;;  %v2290_v25 = vadd.f32 %v6333_v48, %v2151_v16  ;;  %v2354_v26 = vsel %vm1117_vm12, %v6522_v3, -inf  ;;  %v2351_v50 = vsel %vm1117_vm12, %v6527_v12, -inf  ;;  %v4124_v48 = vld [vmem:[%s6896_s4 + $0x58] sm:$0xff] }
 0x668   :  { %v2102_v24 = vpop.permute.xlu1 %2101  ;;  %v2104_v15 = vpop.permute.xlu0 %2103  ;;  %2355 = vmax.xlane.f32.xlu1 %v2354_v26  ;;  %2352 = vmax.xlane.f32.xlu0 %v2351_v50 }
 0x669   :  { %v2136_v1 = vsel %vm879_vm11, 0.0, %v2102_v24  ;;  %v2137_v45 = vsel %vm879_vm11, 0.0, %v2104_v15  ;;  %v6546_v32 = vadd.f32 %v4123_v17, %v2290_v25  ;;  %v6551_v30 = vadd.f32 %v4124_v48, %v2285_v34 }
 0x66a   :  { %v2152_v6 = vsel %vm926_vm14, %v2136_v1, %v6380_v18  ;;  %v2153_v0 = vsel %vm7310_vm13, %v2137_v45, %v6385_v62  ;;  %vm7311_vm14 = vcmp.gt.f32.partialorder %v5583_v2, 0.5 }
 0x66b   :  { %v2295_v8 = vadd.f32 %v6331_v10, %v2152_v6  ;;  %v2300_v9 = vadd.f32 %v6353_v14, %v2153_v0  ;;  %v2360_v21 = vsel %vm1117_vm12, %v6546_v32, -inf  ;;  %v2357_v54 = vsel %vm1117_vm12, %v6551_v30, -inf  ;;  %v4126_v14 = vld [vmem:[%s6896_s4 + $0x68] sm:$0xff] }
 0x66c   :  { %v2106_v11 = vpop.permute.xlu1 %2105  ;;  %2361 = vmax.xlane.f32.xlu1 %v2360_v21  ;;  %2358 = vmax.xlane.f32.xlu0 %v2357_v54 }
 0x66d   :  { %v2138_v40 = vsel %vm879_vm11, 0.0, %v2106_v11  ;;  %v6569_v18 = vadd.f32 %v4125_v5, %v2300_v9  ;;  %v6574_v10 = vadd.f32 %v4126_v14, %v2295_v8 }
 0x66e   :  { %v2154_v62 = vsel %vm7311_vm14, %v2138_v40, %v6395_v23 }
 0x66f   :  { %v2305_v57 = vadd.f32 %v6351_v4, %v2154_v62  ;;  %v2366_v61 = vsel %vm1117_vm12, %v6569_v18, -inf  ;;  %v2363_v60 = vsel %vm1117_vm12, %v6574_v10, -inf }
 0x670   :  { %2367 = vmax.xlane.f32.xlu1 %v2366_v61  ;;  %2364 = vmax.xlane.f32.xlu0 %v2363_v60 }
 0x671   :  { %v6587_v63 = vadd.f32 %v4127_v51, %v2305_v57 }
 0x673   :  { %v2369_v2 = vsel %vm1117_vm12, %v6587_v63, -inf }
 0x674   :  { %2370 = vmax.xlane.f32.xlu0 %v2369_v2 }
 0x6e1   :  { %v2326_v23 = vpop.xlane.xlu0 %2325 }
 0x6e2   :  { %v2372_v4 = vsub.f32 %v6409_v38, %v2326_v23 }
 0x6e4   :  { %v2388_v19 = vmul.f32 1.442695, %v2372_v4 }
 0x6e5   :  { %v2329_v36 = vpop.xlane.xlu1 %2328  ;;  %v2332_v43 = vpop.xlane.xlu0 %2331 }
 0x6e6   :  { %4000 = vpow2.f32 %v2388_v19  ;;  %v2373_v13 = vsub.f32 %v6426_v39, %v2329_v36  ;;  %v2374_v35 = vsub.f32 %v6431_v41, %v2332_v43 }
 0x6e8   :  { %v2390_v22 = vmul.f32 1.442695, %v2373_v13  ;;  %v2392_v56 = vmul.f32 1.442695, %v2374_v35 }
 0x6e9   :  { %v2338_v53 = vpop.xlane.xlu1 %2337  ;;  %v2335_v59 = vpop.xlane.xlu0 %2334 }
 0x6ea   :  { %4002 = vpow2.f32 %v2390_v22  ;;  %v2376_v27 = vsub.f32 %v6450_v31, %v2338_v53  ;;  %v2375_v16 = vsub.f32 %v6455_v44, %v2335_v59  ;;  %v3931_v53 = vpack.i.bf16 %v5753_v37, %v5745_v49 }
 0x6eb   :  { %4004 = vpow2.f32 %v2392_v56 }
 0x6ec   :  { %v2396_v34 = vmul.f32 1.442695, %v2376_v27  ;;  %v2394_v38 = vmul.f32 1.442695, %v2375_v16 }
 0x6ed   :  { %v2344_v25 = vpop.xlane.xlu1 %2343  ;;  %v2341_v26 = vpop.xlane.xlu0 %2340 }
 0x6ee   :  { %4006 = vpow2.f32 %v2396_v34  ;;  %v2378_v50 = vsub.f32 %v6474_v52, %v2344_v25  ;;  %v2377_v39 = vsub.f32 %v6479_v47, %v2341_v26 }
 0x6ef   :  { %4008 = vpow2.f32 %v2394_v38 }
 0x6f0   :  { %v6598_v41 = vpop.eup %4000  ;;  %v2400_v24 = vmul.f32 1.442695, %v2378_v50  ;;  %v2398_v15 = vmul.f32 1.442695, %v2377_v39 }
 0x6f1   :  { %v2350_v1 = vpop.xlane.xlu1 %2349  ;;  %v2347_v45 = vpop.xlane.xlu0 %2346  ;;  %v2420_v31 = vsel %vm1117_vm12, %v6598_v41, 0.0 }
 0x6f2   :  { %4010 = vpow2.f32 %v2400_v24  ;;  %v2380_v44 = vsub.f32 %v6498_v33, %v2350_v1  ;;  %v2379_v17 = vsub.f32 %v6503_v55, %v2347_v45  ;;  %2421 = vadd.xlane.f32.xlu1 %v2420_v31 }
 0x6f3   :  { %4012 = vpow2.f32 %v2398_v15 }
 0x6f4   :  { %v6604_v52 = vpop.eup %4002  ;;  %v2404_v47 = vmul.f32 1.442695, %v2380_v44  ;;  %v2402_v48 = vmul.f32 1.442695, %v2379_v17 }
 0x6f5   :  { %v6606_v6 = vpop.eup %4004  ;;  %v2353_v0 = vpop.xlane.xlu0 %2352  ;;  %v2423_v8 = vsel %vm1117_vm12, %v6604_v52, 0.0 }
 0x6f6   :  { %4014 = vpow2.f32 %v2404_v47  ;;  %v2356_v9 = vpop.xlane.xlu1 %2355  ;;  %v2381_v21 = vsub.f32 %v6527_v12, %v2353_v0  ;;  %2424 = vadd.xlane.f32.xlu0 %v2423_v8  ;;  %v2426_v33 = vsel %vm1117_vm12, %v6606_v6, 0.0  ;;  %v4129_v47 = vld [vmem:[%s6892_s0 + $0x8] sm:$0xff] }
 0x6f7   :  { %4016 = vpow2.f32 %v2402_v48  ;;  %2427 = vadd.xlane.f32.xlu1 %v2426_v33  ;;  %v2382_v40 = vsub.f32 %v6522_v3, %v2356_v9  ;;  %v6688_v48 = vadd.f32 %v4129_v47, %v6234_v28 }
 0x6f8   :  { %v6613_v55 = vpop.eup %4006  ;;  %v2406_v54 = vmul.f32 1.442695, %v2381_v21 }
 0x6f9   :  { %v6615_v11 = vpop.eup %4008  ;;  %v2359_v5 = vpop.xlane.xlu0 %2358  ;;  %v2432_v14 = vsel %vm1117_vm12, %v6613_v55, 0.0  ;;  %v2408_v51 = vmul.f32 1.442695, %v2382_v40 }
 0x6fa   :  { %v2383_v62 = vsub.f32 %v6551_v30, %v2359_v5  ;;  %v2429_v12 = vsel %vm1117_vm12, %v6615_v11, 0.0  ;;  %4018 = vpow2.f32 %v2406_v54  ;;  %v2362_v59 = vpop.xlane.xlu1 %2361 }
 0x6fb   :  { %2433 = vadd.xlane.f32.xlu1 %v2432_v14  ;;  %2430 = vadd.xlane.f32.xlu0 %v2429_v12  ;;  %v2384_v16 = vsub.f32 %v6546_v32, %v2362_v59 }
 0x6fc   :  { %v6623_v57 = vpop.eup %4010  ;;  %v2410_v61 = vmul.f32 1.442695, %v2383_v62 }
 0x6fd   :  { %v6625_v60 = vpop.eup %4012  ;;  %v2438_v3 = vsel %vm1117_vm12, %v6623_v57, 0.0  ;;  %v2365_v27 = vpop.xlane.xlu0 %2364  ;;  %v2412_v38 = vmul.f32 1.442695, %v2384_v16 }
 0x6fe   :  { %v2435_v2 = vsel %vm1117_vm12, %v6625_v60, 0.0  ;;  %4020 = vpow2.f32 %v2410_v61  ;;  %v2368_v34 = vpop.xlane.xlu1 %2367  ;;  %v2385_v49 = vsub.f32 %v6574_v10, %v2365_v27 }
 0x6ff   :  { %2439 = vadd.xlane.f32.xlu1 %v2438_v3  ;;  %2436 = vadd.xlane.f32.xlu0 %v2435_v2  ;;  %4022 = vpow2.f32 %v2408_v51  ;;  %v2386_v25 = vsub.f32 %v6569_v18, %v2368_v34 }
 0x700   :  { %v6631_v30 = vpop.eup %4014  ;;  %4024 = vpow2.f32 %v2412_v38  ;;  %v2414_v24 = vmul.f32 1.442695, %v2385_v49 }
 0x701   :  { %v6633_v23 = vpop.eup %4016  ;;  %v2444_v4 = vsel %vm1117_vm12, %v6631_v30, 0.0  ;;  %v2371_v26 = vpop.xlane.xlu0 %2370  ;;  %v2416_v50 = vmul.f32 1.442695, %v2386_v25 }
 0x702   :  { %v2441_v19 = vsel %vm1117_vm12, %v6633_v23, 0.0  ;;  %v2387_v39 = vsub.f32 %v6587_v63, %v2371_v26  ;;  %v4128_v63 = vld [vmem:[%s6892_s0] sm:$0xff] }
 0x703   :  { %2445 = vadd.xlane.f32.xlu1 %v2444_v4  ;;  %2442 = vadd.xlane.f32.xlu0 %v2441_v19  ;;  %4026 = vpow2.f32 %v2416_v50  ;;  %v6676_v45 = vadd.f32 %v4128_v63, %v6237_v20  ;;  %v2748_v20 = vsel %vm56_vm0, %v6688_v48, 0.0 }
 0x704   :  { %v6639_v36 = vpop.eup %4018  ;;  %v2418_v37 = vmul.f32 1.442695, %v2387_v39 }
 0x705   :  { %v2447_v43 = vsel %vm1117_vm12, %v6639_v36, 0.0  ;;  %v2745_v17 = vsel %vm56_vm0, %v6676_v45, 0.0 }
 0x706   :  { %4028 = vpow2.f32 %v2418_v37 }
 0x707   :  { %2448 = vadd.xlane.f32.xlu0 %v2447_v43  ;;  %4030 = vpow2.f32 %v2414_v24 }
 0x708   :  { %v6643_v13 = vpop.eup %4020 }
 0x709   :  { %v2453_v35 = vsel %vm1117_vm12, %v6643_v13, 0.0  ;;  %v6647_v22 = vpop.eup %4022 }
 0x70a   :  { %v2450_v56 = vsel %vm1117_vm12, %v6647_v22, 0.0  ;;  %v6660_v15 = vpop.eup %4024 }
 0x70b   :  { %2454 = vadd.xlane.f32.xlu0 %v2453_v35 }
 0x70d   :  { %v6664_v32 = vpop.eup %4026 }
 0x70e   :  { %v2462_v18 = vsel %vm1117_vm12, %v6664_v32, 0.0 }
 0x70f   :  { %2451 = vadd.xlane.f32.xlu0 %v2450_v56 }
 0x710   :  { %v6668_v1 = vpop.eup %4028 }
 0x711   :  { %v2465_v10 = vsel %vm1117_vm12, %v6668_v1, 0.0  ;;  %v6678_v31 = vpop.eup %4030 }
 0x712   :  { %v2459_v44 = vsel %vm1117_vm12, %v6678_v31, 0.0 }
 0x714   :  { %3932 = vrot.lane.b32.xlu1 %v3931_v53, %s4163_s30 }
 0x725   :  { %1555 = vrot.lane.b32.xlu0 %v5748_v29, %s4163_s30  ;;  %v2456_v29 = vsel %vm1117_vm12, %v6660_v15, 0.0 }
 0x738   :  { %2457 = vadd.xlane.f32.xlu1 %v2456_v29 }
 0x73c   :  { %2463 = vadd.xlane.f32.xlu1 %v2462_v18 }
 0x740   :  { %2466 = vadd.xlane.f32.xlu1 %v2465_v10 }
 0x744   :  { %2460 = vadd.xlane.f32.xlu0 %v2459_v44  ;;  %2746 = vadd.xlane.f32.xlu1 %v2745_v17 }
 0x748   :  { %2749 = vadd.xlane.f32.xlu0 %v2748_v20  ;;  %v7312_v20 = vld [vmem:[#allocation39_spill] sm:$0xff] }
 0x77f   :  { %v2422_v0 = vpop.xlane.xlu1 %2421 }
 0x780   :  { %4032 = vrcp.f32 %v2422_v0 }
 0x783   :  { %v2425_v8 = vpop.xlane.xlu0 %2424 }
 0x784   :  { %v2428_v9 = vpop.xlane.xlu1 %2427  ;;  %4034 = vrcp.f32 %v2425_v8 }
 0x785   :  { %4036 = vrcp.f32 %v2428_v9  ;;  %v7313_v9 = vld [vmem:[#allocation5_spill] sm:$0xff] }
 0x788   :  { %v2434_v21 = vpop.xlane.xlu1 %2433  ;;  %v2431_v33 = vpop.xlane.xlu0 %2430 }
 0x789   :  { %4038 = vrcp.f32 %v2431_v33  ;;  %v7314_v33 = vld [vmem:[#allocation23_spill] sm:$0xff] }
 0x78a   :  { %v4033_v54 = vpop.eup %4032  ;;  %4040 = vrcp.f32 %v2434_v21 }
 0x78b   :  { %v2484_v40 = vmul.f32 %v4033_v54, %v6598_v41 }
 0x78c   :  { %v2440_v5 = vpop.xlane.xlu1 %2439  ;;  %v2437_v14 = vpop.xlane.xlu0 %2436 }
 0x78d   :  { %3749 = vmatprep.mubr.msk.f32.mxu0 %vm1117_vm12, %v2484_v40  ;;  %4042 = vrcp.f32 %v2437_v14 }
 0x78e   :  { %4044 = vrcp.f32 %v2440_v5  ;;  %v4035_v35 = vpop.eup %4034 }
 0x78f   :  { %v4037_v56 = vpop.eup %4036  ;;  %v2485_v42 = vmul.f32 %v4035_v35, %v6604_v52  ;;  %v7317_v35 = vld [vmem:[#allocation25_spill] sm:$0xff] }
 0x790   :  { %v2446_v28 = vpop.xlane.xlu1 %2445  ;;  %v2443_v62 = vpop.xlane.xlu0 %2442  ;;  %v2486_v53 = vmul.f32 %v4037_v56, %v6606_v6 }
 0x791   :  { %4046 = vrcp.f32 %v2443_v62 }
 0x792   :  { %4048 = vrcp.f32 %v2446_v28 }
 0x794   :  { %v3933_v12 = vpop.permute.xlu1 %3932  ;;  %v2449_v61 = vpop.xlane.xlu0 %2448 }
 0x795   :  { %v3934_v51 = vunpack.i.l.bf16 %v3933_v12  ;;  %v3935_v4 = vunpack.i.h.bf16 %v3933_v12  ;;  %4050 = vrcp.f32 %v2449_v61 }
 0x797   :  { %v3869_v3 = vpack.c.bf16 %v3934_v51, %v7135_v58  ;;  %v4039_v58 = vpop.eup %4038  ;;  %v7316_v51 = vld [vmem:[#allocation24_spill] sm:$0xff] }
 0x798   :  { %v2455_v2 = vpop.xlane.xlu0 %2454  ;;  %v4041_v59 = vpop.eup %4040  ;;  %v2487_v27 = vmul.f32 %v4039_v58, %v6615_v11  ;;  %v7318_v58 = vld [vmem:[#allocation7_spill] sm:$0xff] }
 0x799   :  { %3871 = vmatprep.subr.msk.bf16.mxu0 %vm5685_vm15, %v3869_v3  ;;  %v4043_v16 = vpop.eup %4042  ;;  %v2488_v34 = vmul.f32 %v4041_v59, %v6613_v55 }
 0x79a   :  { %3874 = vmatpush3.bf16.msk.msra.mxu0 %vm5685_vm15, %v3869_v3  ;;  %v4045_v46 = vpop.eup %4044  ;;  %v2489_v52 = vmul.f32 %v4043_v16, %v6625_v60  ;;  %vm3049_vm15 = vcmask 523264  }
 0x79b   :  { %v4047_v6 = vpop.eup %4046  ;;  %v2490_v38 = vmul.f32 %v4045_v46, %v6623_v57 }
 0x79c   :  { %v2452_v41 = vpop.xlane.xlu0 %2451  ;;  %v4049_v25 = vpop.eup %4048  ;;  %v2491_v11 = vmul.f32 %v4047_v6, %v6633_v23 }
 0x79d   :  { %4052 = vrcp.f32 %v2452_v41  ;;  %v2492_v55 = vmul.f32 %v4049_v25, %v6631_v30  ;;  %v7320_v25 = vld [vmem:[#allocation27_spill] sm:$0xff] }
 0x79e   :  { %4054 = vrcp.f32 %v2455_v2 }
 0x79f   :  { %v4051_v26 = vpop.eup %4050 }
 0x7a0   :  { %v1556_v19 = vpop.permute.xlu0 %1555  ;;  %v2493_v60 = vmul.f32 %v4051_v26, %v6639_v36 }
 0x7a1   :  { %v3875_v43 = vpack.c.bf16 %v1556_v19, %v3935_v4 }
 0x7a3   :  { %3877 = vmatprep.subr.msk.bf16.mxu0 %vm5708_vm10, %v3875_v43 }
 0x7a4   :  { %3880 = vmatpush3.bf16.msk.msra.mxu0 %vm5708_vm10, %v3875_v43 }
 0x7a7   :  { %3750 = vmatmul.mubr.msk.f32.vlgmr.msra.gmra.mrb[32].mxu0 %vm1117_vm12, %v2485_v42  ;;  %v4053_v50 = vpop.eup %4052 }
 0x7a8   :  { %3752 = vmatprep.mubr.msk.f32.mxu0 %vm1117_vm12, %v2486_v53  ;;  %v4055_v39 = vpop.eup %4054  ;;  %v2494_v57 = vmul.f32 %v4053_v50, %v6647_v22 }
 0x7a9   :  { %v2495_v49 = vmul.f32 %v4055_v39, %v6643_v13 }
 0x7ab   :  { %3753 = vmatmul.mubr.msk.f32.gmra.mrb[34].mxu0 %vm1117_vm12, %v2487_v27 }
 0x7ac   :  { %3755 = vmatprep.mubr.msk.f32.mxu0 %vm1117_vm12, %v2488_v34 }
 0x7af   :  { %3756 = vmatmul.mubr.msk.f32.gmra.mrb[36].mxu0 %vm1117_vm12, %v2489_v52  ;;  %v7319_v52 = vld [vmem:[#allocation26_spill] sm:$0xff] }
 0x7b0   :  { %3758 = vmatprep.mubr.msk.f32.mxu0 %vm1117_vm12, %v2490_v38 }
 0x7b3   :  { %3759 = vmatmul.mubr.msk.f32.gmra.mrb[38].mxu0 %vm1117_vm12, %v2491_v11 }
 0x7b4   :  { %3761 = vmatprep.mubr.msk.f32.mxu0 %vm1117_vm12, %v2492_v55 }
 0x7b7   :  { %3762 = vmatmul.mubr.msk.f32.gmra.mrb[40].mxu0 %vm1117_vm12, %v2493_v60 }
 0x7b8   :  { %3764 = vmatprep.mubr.msk.f32.mxu0 %vm1117_vm12, %v2494_v57  ;;  %v7321_v57 = vld [vmem:[#allocation28_spill] sm:$0xff] }
 0x7bb   :  { %3765 = vmatmul.mubr.msk.f32.gmra.mrb[42].mxu0 %vm1117_vm12, %v2495_v49 }
 0x7c5   :  { %v2458_v23 = vpop.xlane.xlu1 %2457 }
 0x7c6   :  { %4056 = vrcp.f32 %v2458_v23 }
 0x7c9   :  { %v2464_v30 = vpop.xlane.xlu1 %2463 }
 0x7ca   :  { %4058 = vrcp.f32 %v2464_v30  ;;  %v7322_v30 = vld [vmem:[#allocation29_spill] sm:$0xff] }
 0x7cd   :  { %v2467_v24 = vpop.xlane.xlu1 %2466 }
 0x7d0   :  { %v4057_v37 = vpop.eup %4056 }
 0x7d1   :  { %v2461_v29 = vpop.xlane.xlu0 %2460  ;;  %v2496_v36 = vmul.f32 %v4057_v37, %v6660_v15 }
 0x7d2   :  { %4060 = vrcp.f32 %v2461_v29 }
 0x7d3   :  { %3767 = vmatprep.mubr.msk.f32.mxu0 %vm1117_vm12, %v2496_v36  ;;  %4062 = vrcp.f32 %v2467_v24 }
 0x7d4   :  { %v4059_v22 = vpop.eup %4058 }
 0x7d5   :  { %v2498_v63 = vmul.f32 %v4059_v22, %v6664_v32 }
 0x7dc   :  { %v4061_v18 = vpop.eup %4060 }
 0x7dd   :  { %v2497_v10 = vmul.f32 %v4061_v18, %v6678_v31  ;;  %v4063_v13 = vpop.eup %4062 }
 0x7de   :  { %v2499_v44 = vmul.f32 %v4063_v13, %v6668_v1  ;;  %v7323_v13 = vld [vmem:[#allocation8_spill] sm:$0xff] }
 0x7df   :  { %3768 = vmatmul.mubr.msk.f32.gmra.mrb[44].mxu0 %vm1117_vm12, %v2497_v10  ;;  %v2750_v10 = vpop.xlane.xlu0 %2749 }
 0x7e0   :  { %3770 = vmatprep.mubr.msk.f32.mxu0 %vm1117_vm12, %v2498_v63 }
 0x7e3   :  { %3771 = vmatmul.mubr.msk.f32.gmra.mrb[46].mxu0 %vm1117_vm12, %v2499_v44 }
 0x87a   :  { %v3751_v15 = vpop.f32.mrb[32].mxu0 }
 0x87b   :  { %v2614_v17 = vpop.f32.mrb[33].mxu0  ;;  %v2694_v47 = vmul.f32 %v6126_v7, %v3751_v15  ;;  %v7315_v7 = vld [vmem:[#allocation6_spill] sm:$0xff]  ;;  %v2747_v15 = vpop.xlane.xlu1 %2746 }
 0x87c   :  { %v2693_v0 = vmul.f32 %v7312_v20, %v2614_v17  ;;  %v7324_v17 = vld [vmem:[#allocation9_spill] sm:$0xff] }
 0x87d   :  { %v2724_v54 = vsel %vm56_vm0, %v2694_v47, 0.0 }
 0x87e   :  { %v3754_v8 = vpop.f32.mrb[34].mxu0  ;;  %v2709_v1 = vsel %vm56_vm0, %v2693_v0, 0.0  ;;  %v2759_v0 = vmul.f32 0.03125, %v2750_v10 }
 0x87f   :  { %v2696_v31 = vmul.f32 %v7313_v9, %v3754_v8  ;;  %v2624_v21 = vpop.f32.mrb[35].mxu0 }
 0x880   :  { %v2695_v32 = vmul.f32 %v7314_v33, %v2624_v21  ;;  %v2758_v21 = vmul.f32 0.03125, %v2747_v15  ;;  %v3035_v15 = vld [vmem:[%s6902_s10 + $0x8] sm:$0xff] }
 0x881   :  { %v2725_v40 = vsel %vm56_vm0, %v2696_v31, 0.0 }
 0x882   :  { %v2726_v5 = vadd.f32 %v2725_v40, %v2724_v54  ;;  %v2710_v14 = vsel %vm56_vm0, %v2695_v32, 0.0  ;;  %v3757_v28 = vpop.f32.mrb[36].mxu0  ;;  %v7325_v32 = vld [vmem:[#allocation30_spill] sm:$0xff] }
 0x883   :  { %v2711_v62 = vadd.f32 %v2710_v14, %v2709_v1  ;;  %v2698_v12 = vmul.f32 %v7315_v7, %v3757_v28  ;;  %v2634_v61 = vpop.f32.mrb[37].mxu0  ;;  %v7326_v1 = vld [vmem:[#allocation31_spill] sm:$0xff]  ;;  %v2763_v28 = vsub.f32 %v6688_v48, %v2759_v0 }
 0x884   :  { %v2697_v3 = vmul.f32 %v7316_v51, %v2634_v61  ;;  %v4130_v51 = vld [vmem:[%s6892_s0 + $0x18] sm:$0xff] }
 0x885   :  { %v2727_v2 = vsel %vm56_vm0, %v2698_v12, 0.0  ;;  %v2762_v12 = vsub.f32 %v6676_v45, %v2758_v21  ;;  %v3037_v21 = vld [vmem:[%s6902_s10 + $0x18] sm:$0xff] }
 0x886   :  { %v2728_v41 = vadd.f32 %v2727_v2, %v2726_v5  ;;  %v2712_v4 = vsel %vm56_vm0, %v2697_v3, 0.0  ;;  %v3760_v19 = vpop.f32.mrb[38].mxu0  ;;  %v4131_v2 = vld [vmem:[%s6892_s0 + $0x10] sm:$0xff] }
 0x887   :  { %v2713_v43 = vadd.f32 %v2712_v4, %v2711_v62  ;;  %v2700_v56 = vmul.f32 %v7317_v35, %v3760_v19  ;;  %v2644_v42 = vpop.f32.mrb[39].mxu0  ;;  %v2767_v19 = vmul.f32 %v2763_v28, %v2763_v28 }
 0x888   :  { %v2699_v53 = vmul.f32 %v7318_v58, %v2644_v42  ;;  %v2819_v42 = vld [vmem:[%s6900_s8 + $0x8] sm:$0xff]  ;;  %v2820_v58 = vld [vmem:[%s6900_s8 + $0x10] sm:$0xff] }
 0x889   :  { %v2729_v59 = vsel %vm56_vm0, %v2700_v56, 0.0  ;;  %v2773_v45 = vsel %vm56_vm0, %v2767_v19, 0.0  ;;  %v2818_v56 = vld [vmem:[%s6900_s8] sm:$0xff] }
 0x88a   :  { %v2730_v27 = vadd.f32 %v2729_v59, %v2728_v41  ;;  %v2714_v16 = vsel %vm56_vm0, %v2699_v53, 0.0  ;;  %v3763_v34 = vpop.f32.mrb[40].mxu0  ;;  %v3881_v53 = vpack.c.bf16 %v2819_v42, %v2818_v56  ;;  %v2821_v59 = vld [vmem:[%s6900_s8 + $0x18] sm:$0xff] }
 0x88b   :  { %v2715_v46 = vadd.f32 %v2714_v16, %v2713_v43  ;;  %v2702_v6 = vmul.f32 %v7319_v52, %v3763_v34  ;;  %v2654_v38 = vpop.f32.mrb[41].mxu0  ;;  %v2766_v43 = vmul.f32 %v2762_v12, %v2762_v12 }
 0x88c   :  { %v2701_v11 = vmul.f32 %v7320_v25, %v2654_v38  ;;  %3882 = vmatprep.subr.bf16.mxu1 %v3881_v53 }
 0x88d   :  { %v2731_v26 = vsel %vm56_vm0, %v2702_v6, 0.0  ;;  %v2770_v35 = vsel %vm56_vm0, %v2766_v43, 0.0  ;;  %3884 = vmatpush3.bf16.msra.mxu1 %v3881_v53 }
 0x88e   :  { %v2732_v55 = vadd.f32 %v2731_v26, %v2730_v27  ;;  %v2716_v50 = vsel %vm56_vm0, %v2701_v11, 0.0  ;;  %v3766_v60 = vpop.f32.mrb[42].mxu0  ;;  %v3885_v27 = vpack.c.bf16 %v2821_v59, %v2820_v58 }
 0x88f   :  { %v2717_v39 = vadd.f32 %v2716_v50, %v2715_v46  ;;  %v2704_v49 = vmul.f32 %v7321_v57, %v3766_v60  ;;  %v2664_v23 = vpop.f32.mrb[43].mxu0 }
 0x890   :  { %v2703_v37 = vmul.f32 %v7322_v30, %v2664_v23  ;;  %3886 = vmatprep.subr.bf16.mxu1 %v3885_v27 }
 0x891   :  { %v2733_v24 = vsel %vm56_vm0, %v2704_v49, 0.0  ;;  %3888 = vmatpush3.bf16.msra.mxu1 %v3885_v27 }
 0x892   :  { %v2734_v29 = vadd.f32 %v2733_v24, %v2732_v55  ;;  %v2718_v36 = vsel %vm56_vm0, %v2703_v37, 0.0  ;;  %v3405_v37 = vld [vmem:[%s6898_s6] ss:$0 sm:$0xff] }
 0x893   :  { %v2719_v22 = vadd.f32 %v2718_v36, %v2717_v39 }
 0x8b2   :  { %v3769_v18 = vpop.f32.mrb[44].mxu0 }
 0x8b3   :  { %v2706_v63 = vmul.f32 %v7323_v13, %v3769_v18  ;;  %v2674_v44 = vpop.f32.mrb[45].mxu0 }
 0x8b4   :  { %v2705_v47 = vmul.f32 %v7324_v17, %v2674_v44  ;;  %v3034_v44 = vld [vmem:[%s6902_s10] sm:$0xff] }
 0x8b5   :  { %v2735_v20 = vsel %vm56_vm0, %v2706_v63, 0.0 }
 0x8b6   :  { %v2736_v8 = vadd.f32 %v2735_v20, %v2734_v29  ;;  %v2720_v9 = vsel %vm56_vm0, %v2705_v47, 0.0  ;;  %v3772_v31 = vpop.f32.mrb[46].mxu0  ;;  %v3889_v47 = vpack.c.bf16 %v3035_v15, %v3034_v44 }
 0x8b7   :  { %v2721_v33 = vadd.f32 %v2720_v9, %v2719_v22  ;;  %v2708_v54 = vmul.f32 %v7325_v32, %v3772_v31  ;;  %v2684_v40 = vpop.f32.mrb[47].mxu0  ;;  %v3406_v22 = vld [vmem:[%s6899_s7] ss:$0 sm:$0xff]  ;;  %v3036_v31 = vld [vmem:[%s6902_s10 + $0x10] sm:$0xff] }
 0x8b8   :  { %v2707_v5 = vmul.f32 %v7326_v1, %v2684_v40  ;;  %3890 = vmatprep.subr.bf16.mxu0 %v3889_v47  ;;  %v3893_v32 = vpack.c.bf16 %v3037_v21, %v3036_v31  ;;  %v3039_v40 = vld [vmem:[%s6902_s10 + $0x28] sm:$0xff]  ;;  %v4164_v31 = vmov -1.0  }
 0x8b9   :  { %v2737_v14 = vsel %vm56_vm0, %v2708_v54, 0.0  ;;  %3892 = vmatpush3.bf16.msra.mxu0 %v3889_v47  ;;  %v3038_v54 = vld [vmem:[%s6902_s10 + $0x20] sm:$0xff] }
 0x8ba   :  { %v2738_v62 = vadd.f32 %v2737_v14, %v2736_v8  ;;  %v2722_v7 = vsel %vm56_vm0, %v2707_v5, 0.0  ;;  %3894 = vmatprep.subr.bf16.mxu0 %v3893_v32  ;;  %v3897_v1 = vpack.c.bf16 %v3039_v40, %v3038_v54  ;;  %v3040_v5 = vld [vmem:[%s6902_s10 + $0x30] sm:$0xff]  ;;  %v3041_v14 = vld [vmem:[%s6902_s10 + $0x38] sm:$0xff] }
 0x8bb   :  { %v2723_v61 = vadd.f32 %v2722_v7, %v2721_v33 }
 0x8bc   :  { %v2742_v3 = vadd.f32 %v4130_v51, %v2738_v62 }
 0x8bd   :  { %v2741_v41 = vadd.f32 %v4131_v2, %v2723_v61  ;;  %3896 = vmatpush3.bf16.msra.mxu0 %v3893_v32 }
 0x8be   :  { %v2754_v4 = vsel %vm56_vm0, %v2742_v3, 0.0  ;;  %3898 = vmatprep.subr.bf16.mxu0 %v3897_v1 }
 0x8bf   :  { %2755 = vadd.xlane.f32.xlu0 %v2754_v4  ;;  %v2751_v48 = vsel %vm56_vm0, %v2741_v41, 0.0  ;;  %v6840_v4 = vld [vmem:[%s6901_s9] ss:$0 sm:$0xff] }
 0x8c0   :  { %2752 = vadd.xlane.f32.xlu1 %v2751_v48 }
 0x8c1   :  { %3900 = vmatpush3.bf16.msra.mxu0 %v3897_v1 }
 0x8c3   :  { %2774 = vadd.xlane.f32.xlu0 %v2773_v45 }
 0x8c4   :  { %2771 = vadd.xlane.f32.xlu1 %v2770_v35 }
 0x94c   :  { %v2756_v16 = vpop.xlane.xlu0 %2755 }
 0x94d   :  { %v2761_v34 = vmul.f32 0.03125, %v2756_v16  ;;  %v2753_v46 = vpop.xlane.xlu1 %2752 }
 0x94e   :  { %v2760_v52 = vmul.f32 0.03125, %v2753_v46 }
 0x94f   :  { %v2765_v6 = vsub.f32 %v2742_v3, %v2761_v34 }
 0x950   :  { %v2764_v38 = vsub.f32 %v2741_v41, %v2760_v52  ;;  %v2775_v25 = vpop.xlane.xlu0 %2774 }
 0x951   :  { %v2783_v11 = vmul.f32 0.03125, %v2775_v25  ;;  %v2772_v26 = vpop.xlane.xlu1 %2771  ;;  %v2769_v55 = vmul.f32 %v2765_v6, %v2765_v6 }
 0x952   :  { %v2782_v50 = vmul.f32 0.03125, %v2772_v26  ;;  %v2768_v60 = vmul.f32 %v2764_v38, %v2764_v38 }
 0x953   :  { %v2787_v39 = vadd.f32 1e-05, %v2783_v11  ;;  %v2779_v57 = vsel %vm56_vm0, %v2769_v55, 0.0 }
 0x954   :  { %v2786_v49 = vadd.f32 1e-05, %v2782_v50  ;;  %2780 = vadd.xlane.f32.xlu0 %v2779_v57  ;;  %v2776_v23 = vsel %vm56_vm0, %v2768_v60, 0.0 }
 0x955   :  { %4064 = vrsqrt.f32 %v2787_v39  ;;  %2777 = vadd.xlane.f32.xlu1 %v2776_v23 }
 0x956   :  { %4066 = vrsqrt.f32 %v2786_v49 }
 0x95f   :  { %v4065_v30 = vpop.eup %4064 }
 0x960   :  { %v4067_v24 = vpop.eup %4066  ;;  %v2795_v29 = vmul.f32 %v4065_v30, %v2763_v28  ;;  %v3901_v28 = vpack.c.bf16 %v3041_v14, %v3040_v5 }
 0x961   :  { %v2794_v36 = vmul.f32 %v4067_v24, %v2762_v12 }
 0x962   :  { %v2805_v18 = vmul.f32 %v3405_v37, %v2795_v29  ;;  %3902 = vmatprep.subr.bf16.mxu0 %v3901_v28 }
 0x963   :  { %v2804_v10 = vmul.f32 %v3405_v37, %v2794_v36  ;;  %3904 = vmatpush3.bf16.msra.mxu0 %v3901_v28 }
 0x964   :  { %v6799_v63 = vadd.f32 %v3406_v22, %v2805_v18 }
 0x965   :  { %v6797_v13 = vadd.f32 %v3406_v22, %v2804_v10 }
 0x967   :  { %3781 = vmatprep.mubr.msk.f32.mxu1 %vm56_vm0, %v6797_v13 }
 0x968   :  { %3782 = vmatmul.mubr.msk.f32.vlgmr.msra.gmra.mrb[52].mxu1 %vm56_vm0, %v6799_v63 }
 0x9e1   :  { %v2781_v17 = vpop.xlane.xlu0 %2780 }
 0x9e2   :  { %v2785_v20 = vmul.f32 0.03125, %v2781_v17  ;;  %v2778_v0 = vpop.xlane.xlu1 %2777 }
 0x9e3   :  { %v2784_v8 = vmul.f32 0.03125, %v2778_v0 }
 0x9e4   :  { %v2789_v9 = vadd.f32 1e-05, %v2785_v20 }
 0x9e5   :  { %v2788_v33 = vadd.f32 1e-05, %v2784_v8 }
 0x9e6   :  { %4068 = vrsqrt.f32 %v2789_v9 }
 0x9e7   :  { %4070 = vrsqrt.f32 %v2788_v33 }
 0x9f0   :  { %v4069_v62 = vpop.eup %4068 }
 0x9f1   :  { %v4071_v7 = vpop.eup %4070  ;;  %v2797_v12 = vmul.f32 %v4069_v62, %v2765_v6 }
 0x9f2   :  { %v2796_v61 = vmul.f32 %v4071_v7, %v2764_v38 }
 0x9f3   :  { %v2807_v51 = vmul.f32 %v3405_v37, %v2797_v12 }
 0x9f4   :  { %v2806_v3 = vmul.f32 %v3405_v37, %v2796_v61 }
 0x9f5   :  { %v6831_v41 = vadd.f32 %v3406_v22, %v2807_v51 }
 0x9f6   :  { %v6829_v2 = vadd.f32 %v3406_v22, %v2806_v3 }
 0x9f8   :  { %3784 = vmatprep.mubr.msk.f32.mxu1 %vm56_vm0, %v6829_v2 }
 0x9f9   :  { %3785 = vmatmul.mubr.msk.f32.gmra.mrb[54].mxu1 %vm56_vm0, %v6831_v41 }
 0xa3b   :  { %v3783_v19 = vpop.f32.mrb[52].mxu1 }
 0xa3c   :  { %v2913_v48 = vadd.f32 %v3783_v19, %v6840_v4  ;;  %v2907_v43 = vpop.f32.mrb[53].mxu1 }
 0xa3d   :  { %v2908_v45 = vadd.f32 %v6840_v4, %v2907_v43 }
 0xa3e   :  { %v2931_v35 = vmul.f32 0.70710677, %v2913_v48  ;;  %v2927_v28 = vmul.f32 0.5, %v2913_v48 }
 0xa3f   :  { %v2930_v56 = vmul.f32 0.70710677, %v2908_v45  ;;  %v2926_v5 = vmul.f32 0.5, %v2908_v45 }
 0xa40   :  { %v2943_v42 = vand.u32 2147483647, %v2931_v35  ;;  %vm2935_vm11 = vcmp.ge.f32.partialorder %v2931_v35, 0.0 }
 0xa41   :  { %v2942_v58 = vand.u32 2147483647, %v2930_v56  ;;  %vm2934_vm12 = vcmp.ge.f32.partialorder %v2930_v56, 0.0  ;;  %v2939_v21 = vsel %vm2935_vm11, 1.0, %v4164_v31 }
 0xa42   :  { %v2947_v53 = vmul.f32 0.3275911, %v2943_v42  ;;  %v2999_v34 = vsub.f32 0.0, %v2943_v42  ;;  %v2938_v54 = vsel %vm2934_vm12, 1.0, %v4164_v31 }
 0xa43   :  { %v2946_v59 = vmul.f32 0.3275911, %v2942_v58  ;;  %v2998_v46 = vsub.f32 0.0, %v2942_v58 }
 0xa44   :  { %v2951_v27 = vadd.f32 1.0, %v2947_v53  ;;  %v3003_v6 = vmul.f32 %v2999_v34, %v2943_v42 }
 0xa45   :  { %v2950_v16 = vadd.f32 1.0, %v2946_v59  ;;  %v3002_v11 = vmul.f32 %v2998_v46, %v2942_v58 }
 0xa46   :  { %4072 = vrcp.f32 %v2951_v27  ;;  %v3008_v50 = vmul.f32 1.442695, %v3003_v6 }
 0xa47   :  { %4074 = vrcp.f32 %v2950_v16  ;;  %v3006_v57 = vmul.f32 1.442695, %v3002_v11 }
 0xa48   :  { %4076 = vpow2.f32 %v3008_v50 }
 0xa49   :  { %4078 = vpow2.f32 %v3006_v57 }
 0xa50   :  { %v4073_v52 = vpop.eup %4072 }
 0xa51   :  { %v4075_v38 = vpop.eup %4074  ;;  %v2963_v25 = vmul.f32 1.0614054, %v4073_v52 }
 0xa52   :  { %v2962_v26 = vmul.f32 1.0614054, %v4075_v38  ;;  %v4077_v17 = vpop.eup %4076 }
 0xa53   :  { %v2967_v55 = vadd.f32 -1.4531521, %v2963_v25  ;;  %v4079_v20 = vpop.eup %4078 }
 0xa54   :  { %v2966_v60 = vadd.f32 -1.4531521, %v2962_v26 }
 0xa55   :  { %v2971_v39 = vmul.f32 %v4073_v52, %v2967_v55 }
 0xa56   :  { %v2970_v49 = vmul.f32 %v4075_v38, %v2966_v60 }
 0xa57   :  { %v2975_v23 = vadd.f32 1.4214138, %v2971_v39 }
 0xa58   :  { %v2974_v30 = vadd.f32 1.4214138, %v2970_v49 }
 0xa59   :  { %v2979_v37 = vmul.f32 %v4073_v52, %v2975_v23 }
 0xa5a   :  { %v2978_v24 = vmul.f32 %v4075_v38, %v2974_v30 }
 0xa5b   :  { %v2983_v29 = vadd.f32 -0.28449672, %v2979_v37 }
 0xa5c   :  { %v2982_v36 = vadd.f32 -0.28449672, %v2978_v24 }
 0xa5d   :  { %v2987_v22 = vmul.f32 %v4073_v52, %v2983_v29 }
 0xa5e   :  { %v2986_v18 = vmul.f32 %v4075_v38, %v2982_v36 }
 0xa5f   :  { %v2991_v10 = vadd.f32 0.2548296, %v2987_v22 }
 0xa60   :  { %v2990_v44 = vadd.f32 0.2548296, %v2986_v18 }
 0xa61   :  { %v2995_v15 = vmul.f32 %v4073_v52, %v2991_v10 }
 0xa62   :  { %v2994_v47 = vmul.f32 %v4075_v38, %v2990_v44 }
 0xa63   :  { %v3015_v0 = vmul.f32 %v4077_v17, %v2995_v15 }
 0xa64   :  { %v3014_v8 = vmul.f32 %v4079_v20, %v2994_v47 }
 0xa65   :  { %v3019_v9 = vsub.f32 1.0, %v3015_v0 }
 0xa66   :  { %v3018_v33 = vsub.f32 1.0, %v3014_v8 }
 0xa67   :  { %v3023_v32 = vmul.f32 %v3019_v9, %v2939_v21 }
 0xa68   :  { %v3022_v40 = vmul.f32 %v3018_v33, %v2938_v54 }
 0xa69   :  { %v3027_v1 = vadd.f32 1.0, %v3023_v32 }
 0xa6a   :  { %v3026_v14 = vadd.f32 1.0, %v3022_v40 }
 0xa6b   :  { %v3031_v7 = vmul.f32 %v3027_v1, %v2927_v28 }
 0xa6c   :  { %v3030_v62 = vmul.f32 %v3026_v14, %v2926_v5  ;;  %v3412_v5 = vld [vmem:[%s6903_s11] ss:$0 sm:$0xff] }
 0xa6e   :  { %3803 = vmatprep.mubr.msk.f32.mxu0 %vm3049_vm15, %v3030_v62 }
 0xa6f   :  { %3804 = vmatmul.mubr.msk.f32.vlgmr.msra.gmra.mrb[48].mxu0 %vm3049_vm15, %v3031_v7 }
 0xacc   :  { %v3786_v12 = vpop.f32.mrb[54].mxu1 }
 0xacd   :  { %v2923_v61 = vadd.f32 %v3786_v12, %v6840_v4  ;;  %v2917_v51 = vpop.f32.mrb[55].mxu1 }
 0xace   :  { %v2918_v3 = vadd.f32 %v6840_v4, %v2917_v51 }
 0xacf   :  { %v2933_v19 = vmul.f32 0.70710677, %v2923_v61  ;;  %v2929_v54 = vmul.f32 0.5, %v2923_v61 }
 0xad0   :  { %v2932_v43 = vmul.f32 0.70710677, %v2918_v3  ;;  %v2928_v33 = vmul.f32 0.5, %v2918_v3 }
 0xad1   :  { %v2945_v35 = vand.u32 2147483647, %v2933_v19  ;;  %vm2937_vm10 = vcmp.ge.f32.partialorder %v2933_v19, 0.0 }
 0xad2   :  { %v2944_v56 = vand.u32 2147483647, %v2932_v43  ;;  %vm2936_vm9 = vcmp.ge.f32.partialorder %v2932_v43, 0.0  ;;  %v2941_v47 = vsel %vm2937_vm10, 1.0, %v4164_v31 }
 0xad3   :  { %v2949_v45 = vmul.f32 0.3275911, %v2945_v35  ;;  %v3001_v53 = vsub.f32 0.0, %v2945_v35  ;;  %v2940_v8 = vsel %vm2936_vm9, 1.0, %v4164_v31 }
 0xad4   :  { %v2948_v42 = vmul.f32 0.3275911, %v2944_v56  ;;  %v3000_v59 = vsub.f32 0.0, %v2944_v56 }
 0xad5   :  { %v2953_v48 = vadd.f32 1.0, %v2949_v45  ;;  %v3005_v16 = vmul.f32 %v3001_v53, %v2945_v35 }
 0xad6   :  { %v2952_v58 = vadd.f32 1.0, %v2948_v42  ;;  %v3004_v52 = vmul.f32 %v3000_v59, %v2944_v56 }
 0xad7   :  { %4080 = vrcp.f32 %v2953_v48  ;;  %v3012_v4 = vmul.f32 1.442695, %v3005_v16 }
 0xad8   :  { %4082 = vrcp.f32 %v2952_v58  ;;  %v3010_v26 = vmul.f32 1.442695, %v3004_v52 }
 0xad9   :  { %4084 = vpow2.f32 %v3012_v4 }
 0xada   :  { %4086 = vpow2.f32 %v3010_v26 }
 0xae1   :  { %v4081_v27 = vpop.eup %4080 }
 0xae2   :  { %v4083_v34 = vpop.eup %4082  ;;  %v2965_v46 = vmul.f32 1.0614054, %v4081_v27 }
 0xae3   :  { %v2964_v6 = vmul.f32 1.0614054, %v4083_v34  ;;  %v4085_v22 = vpop.eup %4084 }
 0xae4   :  { %v2969_v38 = vadd.f32 -1.4531521, %v2965_v46  ;;  %v4087_v10 = vpop.eup %4086 }
 0xae5   :  { %v2968_v25 = vadd.f32 -1.4531521, %v2964_v6 }
 0xae6   :  { %v2973_v11 = vmul.f32 %v4081_v27, %v2969_v38 }
 0xae7   :  { %v2972_v55 = vmul.f32 %v4083_v34, %v2968_v25 }
 0xae8   :  { %v2977_v50 = vadd.f32 1.4214138, %v2973_v11 }
 0xae9   :  { %v2976_v60 = vadd.f32 1.4214138, %v2972_v55 }
 0xaea   :  { %v2981_v39 = vmul.f32 %v4081_v27, %v2977_v50 }
 0xaeb   :  { %v2980_v57 = vmul.f32 %v4083_v34, %v2976_v60 }
 0xaec   :  { %v2985_v49 = vadd.f32 -0.28449672, %v2981_v39 }
 0xaed   :  { %v2984_v23 = vadd.f32 -0.28449672, %v2980_v57 }
 0xaee   :  { %v2989_v30 = vmul.f32 %v4081_v27, %v2985_v49 }
 0xaef   :  { %v2988_v37 = vmul.f32 %v4083_v34, %v2984_v23 }
 0xaf0   :  { %v2993_v24 = vadd.f32 0.2548296, %v2989_v30 }
 0xaf1   :  { %v2992_v29 = vadd.f32 0.2548296, %v2988_v37 }
 0xaf2   :  { %v2997_v36 = vmul.f32 %v4081_v27, %v2993_v24  ;;  %v3417_v24 = vld [vmem:[%s6904_s12] ss:$0 sm:$0xff]  ;;  %s4165_s12 = smov [#allocation2]  }
 0xaf3   :  { %v2996_v18 = vmul.f32 %v4083_v34, %v2992_v29 }
 0xaf4   :  { %v3017_v44 = vmul.f32 %v4085_v22, %v2997_v36  ;;  %v3418_v22 = vld [vmem:[%s6905_s13] ss:$0 sm:$0xff]  ;;  %s3234_s13 = sshll.u32 %s4165_s12, 4  ;;  %s3235_s13 = int_to_ptr.vmem [resolvable:$true] %s3234_s13 }
 0xaf5   :  { %v3016_v15 = vmul.f32 %v4087_v10, %v2996_v18  ;;  %s4132_s27 = scalar_lea.vmem %s3235_s13, 512  ;;  %p4137_p1 = scmp.lt.s32.totalorder %s3235_s13, %s3235_s13 }
 0xaf6   :  { %v3021_v17 = vsub.f32 1.0, %v3017_v44  ;;  %p4133_p0 = scmp.ne.s32.totalorder %s3235_s13, %s4132_s27  ;;  %p4138_p2 = scmp.lt.s32.totalorder %s4132_s27, %s4132_s27 }
 0xaf7   :  { %v3020_v20 = vsub.f32 1.0, %v3016_v15 }
 0xaf8   :  { %v3025_v0 = vmul.f32 %v3021_v17, %v2941_v47  ;;  %p4139_p3 = por %p4138_p2, %p4137_p1 }
 0xaf9   :  { %v3024_v9 = vmul.f32 %v3020_v20, %v2940_v8 }
 0xafa   :  { %v3029_v21 = vadd.f32 1.0, %v3025_v0  ;;  %p4140_p4 = pnand %p4139_p3, %p4133_p0 }
 0xafb   :  { %v3028_v32 = vadd.f32 1.0, %v3024_v9 }
 0xafc   :  { %v3033_v1 = vmul.f32 %v3029_v21, %v2929_v54 }
 0xafd   :  { %v3032_v40 = vmul.f32 %v3028_v32, %v2928_v33 }
 0xaff   :  { %3806 = vmatprep.mubr.msk.f32.mxu0 %vm3049_vm15, %v3032_v40 }
 0xb00   :  { %3807 = vmatmul.mubr.msk.f32.gmra.mrb[50].mxu0 %vm3049_vm15, %v3033_v1 }
 0xb42   :  { %v3805_v14 = vpop.f32.mrb[48].mxu0 }
 0xb43   :  { %v3134_v28 = vadd.f32 %v3805_v14, %v3412_v5  ;;  %v3128_v62 = vpop.f32.mrb[49].mxu0 }
 0xb44   :  { %v3129_v7 = vadd.f32 %v3412_v5, %v3128_v62 }
 0xb45   :  { %v3148_v31 = vadd.f32 %v3134_v28, %v6799_v63 }
 0xb46   :  { %v3147_v12 = vadd.f32 %v3129_v7, %v6797_v13 }
 0xb47   :  { %v3156_v61 = vsel %vm56_vm0, %v3148_v31, 0.0 }
 0xb48   :  { %3157 = vadd.xlane.f32.xlu0 %v3156_v61  ;;  %v3153_v51 = vsel %vm56_vm0, %v3147_v12, 0.0 }
 0xb49   :  { %3154 = vadd.xlane.f32.xlu1 %v3153_v51 }
 0xbd3   :  { %v3808_v3 = vpop.f32.mrb[50].mxu0 }
 0xbd4   :  { %v3144_v19 = vadd.f32 %v3808_v3, %v3412_v5  ;;  %v3138_v43 = vpop.f32.mrb[51].mxu0 }
 0xbd5   :  { %v3139_v35 = vadd.f32 %v3412_v5, %v3138_v43  ;;  %v3158_v56 = vpop.xlane.xlu0 %3157 }
 0xbd6   :  { %v3150_v45 = vadd.f32 %v3144_v19, %v6831_v41  ;;  %v3166_v42 = vmul.f32 0.03125, %v3158_v56  ;;  %v3155_v48 = vpop.xlane.xlu1 %3154 }
 0xbd7   :  { %v3149_v58 = vadd.f32 %v3139_v35, %v6829_v2  ;;  %v3165_v63 = vmul.f32 0.03125, %v3155_v48 }
 0xbd8   :  { %v3170_v53 = vsub.f32 %v3148_v31, %v3166_v42  ;;  %v3162_v13 = vsel %vm56_vm0, %v3150_v45, 0.0 }
 0xbd9   :  { %v3169_v59 = vsub.f32 %v3147_v12, %v3165_v63  ;;  %3163 = vadd.xlane.f32.xlu0 %v3162_v13  ;;  %v3159_v27 = vsel %vm56_vm0, %v3149_v58, 0.0 }
 0xbda   :  { %3160 = vadd.xlane.f32.xlu1 %v3159_v27  ;;  %v3174_v16 = vmul.f32 %v3170_v53, %v3170_v53 }
 0xbdb   :  { %v3173_v34 = vmul.f32 %v3169_v59, %v3169_v59 }
 0xbdc   :  { %v3180_v46 = vsel %vm56_vm0, %v3174_v16, 0.0 }
 0xbdd   :  { %3181 = vadd.xlane.f32.xlu0 %v3180_v46  ;;  %v3177_v41 = vsel %vm56_vm0, %v3173_v34, 0.0 }
 0xbde   :  { %3178 = vadd.xlane.f32.xlu1 %v3177_v41 }
 0xc66   :  { %v3164_v52 = vpop.xlane.xlu0 %3163 }
 0xc67   :  { %v3168_v6 = vmul.f32 0.03125, %v3164_v52  ;;  %v3161_v2 = vpop.xlane.xlu1 %3160 }
 0xc68   :  { %v3167_v38 = vmul.f32 0.03125, %v3161_v2 }
 0xc69   :  { %v3172_v4 = vsub.f32 %v3150_v45, %v3168_v6 }
 0xc6a   :  { %v3171_v25 = vsub.f32 %v3149_v58, %v3167_v38  ;;  %v3182_v11 = vpop.xlane.xlu0 %3181 }
 0xc6b   :  { %v3190_v26 = vmul.f32 0.03125, %v3182_v11  ;;  %v3179_v55 = vpop.xlane.xlu1 %3178  ;;  %v3176_v50 = vmul.f32 %v3172_v4, %v3172_v4 }
 0xc6c   :  { %v3189_v60 = vmul.f32 0.03125, %v3179_v55  ;;  %v3175_v39 = vmul.f32 %v3171_v25, %v3171_v25 }
 0xc6d   :  { %v3194_v57 = vadd.f32 1e-05, %v3190_v26  ;;  %v3186_v49 = vsel %vm56_vm0, %v3176_v50, 0.0 }
 0xc6e   :  { %v3193_v23 = vadd.f32 1e-05, %v3189_v60  ;;  %3187 = vadd.xlane.f32.xlu0 %v3186_v49  ;;  %v3183_v30 = vsel %vm56_vm0, %v3175_v39, 0.0 }
 0xc6f   :  { %4088 = vrsqrt.f32 %v3194_v57  ;;  %3184 = vadd.xlane.f32.xlu1 %v3183_v30 }
 0xc70   :  { %4090 = vrsqrt.f32 %v3193_v23 }
 0xc79   :  { %v4089_v37 = vpop.eup %4088 }
 0xc7a   :  { %v4091_v29 = vpop.eup %4090  ;;  %v3202_v36 = vmul.f32 %v4089_v37, %v3170_v53 }
 0xc7b   :  { %v3201_v18 = vmul.f32 %v4091_v29, %v3169_v59 }
 0xc7c   :  { %v3212_v10 = vmul.f32 %v3417_v24, %v3202_v36 }
 0xc7d   :  { %v3211_v44 = vmul.f32 %v3417_v24, %v3201_v18 }
 0xc7e   :  { %v3222_v15 = vadd.f32 %v3418_v22, %v3212_v10 }
 0xc7f   :  { %v3221_v17 = vadd.f32 %v3418_v22, %v3211_v44 }
 0xc80   :  { %3226 = vst.msk [vmem:[#allocation2 + $0x8] sm:$0xff] %vm56_vm0, %v3222_v15 }
 0xc81   :  { %3225 = vst.msk [vmem:[#allocation2] sm:$0xff] %vm56_vm0, %v3221_v17 }
 0xcfb   :  { %v3188_v47 = vpop.xlane.xlu0 %3187 }
 0xcfc   :  { %v3192_v20 = vmul.f32 0.03125, %v3188_v47  ;;  %v3185_v0 = vpop.xlane.xlu1 %3184 }
 0xcfd   :  { %v3191_v8 = vmul.f32 0.03125, %v3185_v0 }
 0xcfe   :  { %v3196_v9 = vadd.f32 1e-05, %v3192_v20 }
 0xcff   :  { %v3195_v21 = vadd.f32 1e-05, %v3191_v8 }
 0xd00   :  { %4092 = vrsqrt.f32 %v3196_v9 }
 0xd01   :  { %4094 = vrsqrt.f32 %v3195_v21 }
 0xd0a   :  { %v4093_v33 = vpop.eup %4092 }
 0xd0b   :  { %v4095_v32 = vpop.eup %4094  ;;  %v3204_v54 = vmul.f32 %v4093_v33, %v3172_v4 }
 0xd0c   :  { %v3203_v40 = vmul.f32 %v4095_v32, %v3171_v25 }
 0xd0d   :  { %v3214_v1 = vmul.f32 %v3417_v24, %v3204_v54 }
 0xd0e   :  { %v3213_v5 = vmul.f32 %v3417_v24, %v3203_v40 }
 0xd0f   :  { %v3224_v14 = vadd.f32 %v3418_v22, %v3214_v1 }
 0xd10   :  { %v3223_v28 = vadd.f32 %v3418_v22, %v3213_v5 }
 0xd11   :  { %3228 = vst.msk [vmem:[#allocation2 + $0x18] sm:$0xff] %vm56_vm0, %v3224_v14 }
 0xd12   :  { %3227 = vst.msk [vmem:[#allocation2 + $0x10] sm:$0xff] %vm56_vm0, %v3223_v28 }
 0xd13   :  { %4143 = shalt.err (!%p4140_p4)
}
 0xd14   :  { %s4144_s6 = scalar_lea.hbm %s6906_s14, 512 }
 0xd15   :  { %p4145_p5 = scmp.ne.s32.totalorder %s6906_s14, %s4144_s6  ;;  %p4148_p6 = scmp.lt.u32.totalorder %s4144_s6, %s6906_s14 }
 0xd17   :  { %p4150_p7 = pnand %p4148_p6, %p4145_p5 }
 0xd19   :  { %4153 = shalt.err (!%p4150_p7)
}
 0xd1a   :  { %s4166_s30 = smov 128  }
 0xd1b   :  { %3240 = dma.vmem_to_hbm [thread:$0]  %s3235_s13, 512, %s6906_s14, [#allocation3], %s4166_s30, %s4166_s30, %s4162_s16  }
 0xd1c   :  { %4154 = dma.done.wait [#allocation3], 512  }
 0xd1d   :  { %4155 = vsyncadd [#allocation3], 4294966784 }
 0xd1e   :  { %3244 = vsyncpa [#allocation3], 1 }

</bundles_post_ra>
